<compile_context>
chip_gen: v7x
topology: tpu7x:2x2x1
jax: 0.10.0
libtpu: 0.0.40
codegen_flags: <defaults>
</compile_context>

<pallas_src>
import functools

import jax
import jax.numpy as jnp
from jax.experimental import pallas as pl
from jax.experimental.pallas import tpu as pltpu

PRIMITIVES = (
    "none",
    "max_pool_3x3",
    "avg_pool_3x3",
    "skip_connect",
    "sep_conv_3x3",
    "sep_conv_5x5",
    "dil_conv_3x3",
    "dil_conv_5x5",
)

BN_EPS = 1e-5
MAX_PAD = 4      # largest H halo: dil_conv_5x5 (K=5, dilation=2)
SEP_PAD = 2      # H halo for the separable-conv second halves (K<=5, dilation=1)

# H row offsets (ascending) of each depthwise conv's taps.
SEP3_OFFS = (-1, 0, 1)
SEP5_OFFS = (-2, -1, 0, 1, 2)
DIL3_OFFS = (-2, 0, 2)
DIL5_OFFS = (-4, -2, 0, 2, 4)


# --------------------------------------------------------------------------- #
# Static layout helpers (shared by the one-time packer and by the kernel).
# --------------------------------------------------------------------------- #
def _group_layout(branch_offsets, wc):
    """Column layout when several branches' per-row-offset (wc,wc) matrices share one
    packed RHS tensor.  Returns (layout, total_cols); layout entries are
    (row_offset, col_start, member_branch_indices)."""
    all_offs = sorted({o for offs in branch_offsets for o in offs})
    layout, col = [], 0
    for off in all_offs:
        members = tuple(b for b, offs in enumerate(branch_offsets) if off in offs)
        layout.append((off, col, members))
        col += wc * len(members)
    return tuple(layout), col


def _pack_group(mats_per_branch, branch_offsets, wc):
    layout, _ = _group_layout(branch_offsets, wc)
    blocks = []
    for off, _, members in layout:
        for b in members:
            blocks.append(mats_per_branch[b][branch_offsets[b].index(off)])
    return jnp.concatenate(blocks, axis=1)


def _band_pw_matrices(dw, pw, dil, W):
    """Fold depthwise KxK ('same' pad, dilation `dil`) followed by a 1x1 conv into K
    (W*C, W*C) matrices, one per H row offset:  out_row(h) = sum_i in_row(h+off_i)@M_i
    in the packed layout (lane q = w*C + c)."""
    K, _, C = dw.shape
    p = dil * (K - 1) // 2
    f32 = jnp.float32
    P = jnp.kron(jnp.eye(W, dtype=f32), pw.astype(f32))          # 1x1 conv, block-diag
    mats = []
    for i in range(K):
        B = jnp.zeros((W * C, W * C), f32)
        for j in range(K):
            shift = jnp.eye(W, k=-(j * dil - p), dtype=f32)      # W-direction tap shift
            B = B + jnp.kron(shift, jnp.diag(dw[i, j, :].astype(f32)))
        mats.append(B @ P)
    return mats


# --------------------------------------------------------------------------- #
# One-time parameter / constant packing (outside the hot path).
# --------------------------------------------------------------------------- #
def pack_params(params, N, C, H, W):
    WC = W * C
    f32 = jnp.float32
    bf16 = jnp.bfloat16

    p3, p5 = params["sep_conv_3x3"], params["sep_conv_5x5"]
    d3, d5 = params["dil_conv_3x3"], params["dil_conv_5x5"]

    s3a = _band_pw_matrices(p3["dw1"], p3["pw1"], 1, W)
    s3b = _band_pw_matrices(p3["dw2"], p3["pw2"], 1, W)
    s5a = _band_pw_matrices(p5["dw1"], p5["pw1"], 1, W)
    s5b = _band_pw_matrices(p5["dw2"], p5["pw2"], 1, W)
    dm3 = _band_pw_matrices(d3["dw"], d3["pw"], 2, W)
    dm5 = _band_pw_matrices(d5["dw"], d5["pw"], 2, W)

    ga = _pack_group([s3a, s5a], (SEP3_OFFS, SEP5_OFFS), WC).astype(bf16)
    gb = _pack_group([dm3, dm5], (DIL3_OFFS, DIL5_OFFS), WC).astype(bf16)
    s3b_m = _pack_group([s3b], (SEP3_OFFS,), WC).astype(bf16)
    s5b_m = _pack_group([s5b], (SEP5_OFFS,), WC).astype(bf16)

    # ---- pooling constants (3x3, stride 1, pad 1) ----
    ones = jnp.pad(jnp.ones((H, W), f32), 1)
    cnt = sum(ones[i:i + H, j:j + W] for i in range(3) for j in range(3))
    inv_cnt = jnp.tile(jnp.repeat(1.0 / cnt, C, axis=1), (N, 1))      # (N*H, W*C)

    neg_inf = jnp.float32(-jnp.inf)
    row_h = jnp.arange(N * H, dtype=jnp.int32) % H
    zeros = jnp.zeros((N * H, WC), f32)
    hmask = jnp.stack([
        jnp.where((row_h == 0)[:, None], neg_inf, zeros),             # di=-1 reads h-1
        jnp.where((row_h == H - 1)[:, None], neg_inf, zeros),         # di=+1 reads h+1
    ])
    lane_w = jnp.arange(WC, dtype=jnp.int32) // C
    wmul = jnp.stack([(lane_w >= 1), (lane_w <= W - 2)]).astype(f32)  # dj=-1, dj=+1
    wadd = jnp.where(wmul > 0.5, 0.0, neg_inf).astype(f32)

    return dict(ga=ga, gb=gb, s3b=s3b_m, s5b=s5b_m,
                hmask=hmask, wmul=wmul, wadd=wadd, inv_cnt=inv_cnt)


# --------------------------------------------------------------------------- #
# Fused MixedOp kernel: everything lives in VMEM / vregs, one invocation.
# --------------------------------------------------------------------------- #
def _mixed_op_kernel(
    x_ref,                       # (N, H, W*C)      packed input, lane dim = 128
    ga_ref, gb_ref,              # (W*C, *) bf16    sep first halves / dil convs (dw@1x1 folded)
    s3b_ref, s5b_ref,            # (W*C, K*W*C)     sep second halves
    hmask_ref,                   # (2, N*H, W*C)    max-pool H-boundary additive -inf masks
    wmul_ref, wadd_ref,          # (2, W*C)         pool W-boundary masks (0/1 and 0/-inf)
    invc_ref,                    # (N*H, W*C)       avg-pool 1/valid-count
    w_ref,                       # (8,)   SMEM      path weights
    o_ref,                       # (N, H, W*C)      output
    pad1_ref,                    # scratch (N, H+2*MAX_PAD, W*C)  zero H halo: x / ReLU(x)
    pad2_ref,                    # scratch (N, H+2*SEP_PAD, W*C)  zero H halo: sep intermediates
    *, N, C, H, W, layout_a, layout_b, layout_s3b, layout_s5b,
):
    WC = W * C
    NH = N * H
    w_log2 = W.bit_length() - 1
    inv_n = 1.0 / float(N * H * W)

    def slab(ref, halo, off):
        """(N*H, W*C) view of an H-padded scratch, shifted by `off` rows."""
        return ref[:, halo + off: halo + off + H, :].reshape(NH, WC)

    def group_reduce(s):
        """(8, W*C) per-(w,c) partial sums -> per-channel totals replicated over W."""
        for k in range(w_log2):
            s = s + pltpu.roll(s, C << k, axis=1)
        return jnp.sum(s, axis=0, keepdims=True)                      # (1, W*C)

    def bn_stats(t):
        """BatchNorm2d(affine=False), training-mode (biased) batch statistics."""
        t8 = t.reshape(NH // 8, 8, WC)
        s1 = group_reduce(jnp.sum(t8, axis=0))
        s2 = group_reduce(jnp.sum(t8 * t8, axis=0))
        mean = s1 * inv_n
        var = s2 * inv_n - mean * mean
        return mean, jax.lax.rsqrt(var + BN_EPS)

    def bn_weighted(t, w_scalar):
        """path_weight * BatchNorm(t): path weight folded into the per-channel scale."""
        mean, rsig = bn_stats(t)
        return (t - mean) * (w_scalar * rsig)

    def conv_group(pad, halo, rhs_ref, layout, n_branches):
        """ReLU -> depthwise -> 1x1 for one or two branches sharing the same padded
        input: one MXU matmul per H row offset against the folded banded matrices;
        branches sharing an offset share the LHS slab (wider RHS)."""
        accs = [jnp.zeros((NH, WC), jnp.float32) for _ in range(n_branches)]
        for off, col0, members in layout:
            lhs = slab(pad, halo, off).astype(jnp.bfloat16)
            width = WC * len(members)
            r = jnp.dot(lhs, rhs_ref[:, col0:col0 + width],
                        preferred_element_type=jnp.float32)
            for pos, b in enumerate(members):
                accs[b] = accs[b] + r[:, pos * WC:(pos + 1) * WC]
        return accs

    # ---- input + zero-halo padded copy (H halo only: lane dim stays exactly 128) ----
    x = x_ref[...]                                        # (N, H, WC)
    x2 = x.reshape(NH, WC)
    pad1_ref[...] = jnp.zeros_like(pad1_ref)
    pad1_ref[:, MAX_PAD:MAX_PAD + H, :] = x

    # ---- pooling branches (3x3, stride 1, pad 1) + BN ------------------------------
    v_m1 = slab(pad1_ref, MAX_PAD, -1)
    v_p1 = slab(pad1_ref, MAX_PAD, 1)
    col_sum = v_m1 + x2 + v_p1
    col_max = jnp.maximum(jnp.maximum(v_m1 + hmask_ref[0], x2), v_p1 + hmask_ref[1])
    ap, mp = col_sum, col_max
    for mi, dj in ((0, -1), (1, 1)):                      # W neighbours via lane roll
        sh = (-dj * C) % WC
        ap = ap + pltpu.roll(col_sum, sh, axis=1) * wmul_ref[mi:mi + 1]
        mp = jnp.maximum(mp, pltpu.roll(col_max, sh, axis=1) + wadd_ref[mi:mi + 1])
    ap = ap * invc_ref[...]                               # count_include_pad=False

    acc = bn_weighted(mp, w_ref[1])                       # max_pool_3x3 -> BN
    acc = acc + bn_weighted(ap, w_ref[2])                 # avg_pool_3x3 -> BN
    acc = acc + w_ref[3] * x2                             # skip_connect (stride 1)
    # 'none' contributes weights[0] * 0 -> skipped entirely.

    # ---- one shared ReLU(x) feeds all four first depthwise+pointwise stages --------
    pad1_ref[:, MAX_PAD:MAX_PAD + H, :] = jnp.maximum(x, 0.0)   # halo stays zero

    # ---- dilated convs first: their accumulators die immediately -------------------
    t_d3, t_d5 = conv_group(pad1_ref, MAX_PAD, gb_ref, layout_b, 2)
    acc = acc + bn_weighted(t_d3, w_ref[6])               # dil_conv_3x3
    acc = acc + bn_weighted(t_d5, w_ref[7])               # dil_conv_5x5

    # ---- separable convs: shared first halves, each chain finished end-to-end ------
    t_s3, t_s5 = conv_group(pad1_ref, MAX_PAD, ga_ref, layout_a, 2)
    pad2_ref[...] = jnp.zeros_like(pad2_ref)

    mean, rsig = bn_stats(t_s3)                           # sep_conv_3x3 second half
    pad2_ref[:, SEP_PAD:SEP_PAD + H, :] = (
        jnp.maximum((t_s3 - mean) * rsig, 0.0).reshape(N, H, WC))
    (t,) = conv_group(pad2_ref, SEP_PAD, s3b_ref, layout_s3b, 1)
    acc = acc + bn_weighted(t, w_ref[4])

    mean, rsig = bn_stats(t_s5)                           # sep_conv_5x5 second half
    pad2_ref[:, SEP_PAD:SEP_PAD + H, :] = (
        jnp.maximum((t_s5 - mean) * rsig, 0.0).reshape(N, H, WC))
    (t,) = conv_group(pad2_ref, SEP_PAD, s5b_ref, layout_s5b, 1)
    acc = acc + bn_weighted(t, w_ref[5])

    o_ref[...] = acc.reshape(N, H, WC)


# --------------------------------------------------------------------------- #
# MixedOp forward (NCHW in / NCHW out, matching the PyTorch module, stride 1).
# --------------------------------------------------------------------------- #
def mixed_op_forward(x_nchw, weights, packed):
    N, C, H, W = x_nchw.shape
    WC = W * C
    assert WC == 128 and (W & (W - 1)) == 0, "packed layout needs W*C == 128, W a power of two"
    assert (N * H) % 8 == 0, "N*H must be a multiple of 8 (sublane tiling)"

    x = jnp.transpose(x_nchw, (0, 2, 3, 1)).astype(jnp.float32).reshape(N, H, WC)

    layout_a, _ = _group_layout((SEP3_OFFS, SEP5_OFFS), WC)
    layout_b, _ = _group_layout((DIL3_OFFS, DIL5_OFFS), WC)
    layout_s3b, _ = _group_layout((SEP3_OFFS,), WC)
    layout_s5b, _ = _group_layout((SEP5_OFFS,), WC)

    kern = functools.partial(
        _mixed_op_kernel, N=N, C=C, H=H, W=W,
        layout_a=layout_a, layout_b=layout_b,
        layout_s3b=layout_s3b, layout_s5b=layout_s5b)

    vmem = pl.BlockSpec(memory_space=pltpu.MemorySpace.VMEM)
    smem = pl.BlockSpec(memory_space=pltpu.MemorySpace.SMEM)

    total_cols = sum(a.shape[1] for a in
                     (packed["ga"], packed["gb"], packed["s3b"], packed["s5b"]))
    flops = 2 * (N * H) * WC * total_cols + 60 * N * H * WC
    bytes_accessed = (2 * (packed["ga"].size + packed["gb"].size
                           + packed["s3b"].size + packed["s5b"].size)
                      + 4 * (2 * N * H * WC + 3 * N * H * WC + 4 * WC + 8))

    out_packed = pl.pallas_call(
        kern,
        out_shape=jax.ShapeDtypeStruct((N, H, WC), jnp.float32),
        in_specs=[vmem] * 9 + [smem],
        out_specs=vmem,
        scratch_shapes=[
            pltpu.VMEM((N, H + 2 * MAX_PAD, WC), jnp.float32),
            pltpu.VMEM((N, H + 2 * SEP_PAD, WC), jnp.float32),
        ],
        cost_estimate=pl.CostEstimate(flops=int(flops), transcendentals=8 * WC,
                                      bytes_accessed=int(bytes_accessed)),
    )(x, packed["ga"], packed["gb"], packed["s3b"], packed["s5b"],
      packed["hmask"], packed["wmul"], packed["wadd"], packed["inv_cnt"],
      weights.astype(jnp.float32))

    return jnp.transpose(out_packed.reshape(N, H, W, C), (0, 3, 1, 2))   # NHWC -> NCHW


# --------------------------------------------------------------------------- #
# Deterministic parameter init (shapes from OPS[...](C, stride=1, affine=False)).
# --------------------------------------------------------------------------- #
def init_params(key, C):
    def nrm(k, shape, fan):
        return jax.random.normal(k, shape, jnp.float32) / jnp.sqrt(jnp.float32(fan))

    ks = jax.random.split(key, 12)
    return {
        "sep_conv_3x3": {"dw1": nrm(ks[0], (3, 3, C), 9), "pw1": nrm(ks[1], (C, C), C),
                         "dw2": nrm(ks[2], (3, 3, C), 9), "pw2": nrm(ks[3], (C, C), C)},
        "sep_conv_5x5": {"dw1": nrm(ks[4], (5, 5, C), 25), "pw1": nrm(ks[5], (C, C), C),
                         "dw2": nrm(ks[6], (5, 5, C), 25), "pw2": nrm(ks[7], (C, C), C)},
        "dil_conv_3x3": {"dw": nrm(ks[8], (3, 3, C), 9), "pw": nrm(ks[9], (C, C), C)},
        "dil_conv_5x5": {"dw": nrm(ks[10], (5, 5, C), 25), "pw": nrm(ks[11], (C, C), C)},
    }


if __name__ == "__main__":
    key = jax.random.PRNGKey(0)
    k_x, k_a, k_p = jax.random.split(key, 3)

    N, C, H, W = 2, 8, 16, 16                        # W*C = 128 -> lane-dense packing
    x = jax.random.normal(k_x, (N, C, H, W), jnp.float32)       # NCHW like PyTorch
    alphas = jax.random.normal(k_a, (len(PRIMITIVES),), jnp.float32)
    weights = jax.nn.softmax(alphas)                             # DARTS path weights
    params = init_params(k_p, C)

    packed = pack_params(params, N, C, H, W)         # one-time packing, off the hot path

    fwd = jax.jit(mixed_op_forward)
    out = fwd(x, weights, packed)
    out = jax.block_until_ready(out)

    assert out.shape == (N, C, H, W), out.shape
    assert bool(jnp.all(jnp.isfinite(out)))
    print("KERNEL_OK")
</pallas_src>

<mosaic_0001>
module attributes {stable_mosaic.version = 11 : i64} {
  func.func @_mixed_op_kernel(%arg0: memref<2x16x128xf32, #tpu.memory_space<vmem>>, %arg1: memref<128x1024xbf16, #tpu.memory_space<vmem>>, %arg2: memref<128x1024xbf16, #tpu.memory_space<vmem>>, %arg3: memref<128x384xbf16, #tpu.memory_space<vmem>>, %arg4: memref<128x640xbf16, #tpu.memory_space<vmem>>, %arg5: memref<2x32x128xf32, #tpu.memory_space<vmem>>, %arg6: memref<2x128xf32, #tpu.memory_space<vmem>>, %arg7: memref<2x128xf32, #tpu.memory_space<vmem>>, %arg8: memref<32x128xf32, #tpu.memory_space<vmem>>, %arg9: memref<8xf32, #tpu.memory_space<smem>>, %arg10: memref<2x16x128xf32, #tpu.memory_space<vmem>>, %arg11: memref<2x24x128xf32, #tpu.memory_space<vmem>>, %arg12: memref<2x20x128xf32, #tpu.memory_space<vmem>>) attributes {dimension_semantics = [], scalar_prefetch = 0 : i64, scratch_operands = 2 : i64, tpu.core_type = #tpu.core_type<tc>} {
    %c0 = arith.constant 0 : index
    %c0_0 = arith.constant 0 : index
    %c0_1 = arith.constant 0 : index
    %0 = vector.load %arg0[%c0, %c0_0, %c0_1] : memref<2x16x128xf32, #tpu.memory_space<vmem>>, vector<2x16x128xf32>
    %1 = vector.shape_cast %0 : vector<2x16x128xf32> to vector<32x128xf32>
    %cst = arith.constant 0.000000e+00 : f32
    %2 = vector.broadcast %cst : f32 to vector<2x24x128xf32>
    %c0_2 = arith.constant 0 : index
    %c0_3 = arith.constant 0 : index
    %c0_4 = arith.constant 0 : index
    %3 = vector.load %arg11[%c0_2, %c0_3, %c0_4] : memref<2x24x128xf32, #tpu.memory_space<vmem>>, vector<2x24x128xf32>
    tpu.vector_store %arg11[%c0_2, %c0_3, %c0_4], %2 {strides = array<i32>} : memref<2x24x128xf32, #tpu.memory_space<vmem>>, vector<2x24x128xf32>,
    %c0_5 = arith.constant 0 : index
    %c4 = arith.constant 4 : index
    %c0_6 = arith.constant 0 : index
    %4 = vector.load %arg11[%c0_5, %c4, %c0_6] : memref<2x24x128xf32, #tpu.memory_space<vmem>>, vector<2x16x128xf32>
    tpu.vector_store %arg11[%c0_5, %c4, %c0_6], %0 {strides = array<i32>} : memref<2x24x128xf32, #tpu.memory_space<vmem>>, vector<2x16x128xf32>,
    %c0_7 = arith.constant 0 : index
    %c3 = arith.constant 3 : index
    %c0_8 = arith.constant 0 : index
    %5 = vector.load %arg11[%c0_7, %c3, %c0_8] : memref<2x24x128xf32, #tpu.memory_space<vmem>>, vector<2x16x128xf32>
    %6 = vector.shape_cast %5 : vector<2x16x128xf32> to vector<32x128xf32>
    %c0_9 = arith.constant 0 : index
    %c5 = arith.constant 5 : index
    %c0_10 = arith.constant 0 : index
    %7 = vector.load %arg11[%c0_9, %c5, %c0_10] : memref<2x24x128xf32, #tpu.memory_space<vmem>>, vector<2x16x128xf32>
    %8 = vector.shape_cast %7 : vector<2x16x128xf32> to vector<32x128xf32>
    %9 = arith.addf %6, %1 : vector<32x128xf32>
    %10 = arith.addf %9, %8 : vector<32x128xf32>
    %c0_11 = arith.constant 0 : index
    %c0_12 = arith.constant 0 : index
    %c0_13 = arith.constant 0 : index
    %11 = vector.load %arg5[%c0_11, %c0_12, %c0_13] : memref<2x32x128xf32, #tpu.memory_space<vmem>>, vector<1x32x128xf32>
    %12 = vector.shape_cast %11 : vector<1x32x128xf32> to vector<32x128xf32>
    %13 = arith.addf %6, %12 : vector<32x128xf32>
    %14 = arith.maximumf %13, %1 : vector<32x128xf32>
    %c1 = arith.constant 1 : index
    %c0_14 = arith.constant 0 : index
    %c0_15 = arith.constant 0 : index
    %15 = vector.load %arg5[%c1, %c0_14, %c0_15] : memref<2x32x128xf32, #tpu.memory_space<vmem>>, vector<1x32x128xf32>
    %16 = vector.shape_cast %15 : vector<1x32x128xf32> to vector<32x128xf32>
    %17 = arith.addf %8, %16 : vector<32x128xf32>
    %18 = arith.maximumf %14, %17 : vector<32x128xf32>
    %c8_i32 = arith.constant 8 : i32
    %19 = tpu.dynamic_rotate %10 by %c8_i32 dim 1 : vector<32x128xf32>, i32 -> vector<32x128xf32>
    %c0_16 = arith.constant 0 : index
    %c0_17 = arith.constant 0 : index
    %20 = vector.load %arg6[%c0_16, %c0_17] : memref<2x128xf32, #tpu.memory_space<vmem>>, vector<1x128xf32>
    %21 = vector.broadcast %20 : vector<1x128xf32> to vector<32x128xf32>
    %22 = arith.mulf %19, %21 : vector<32x128xf32>
    %23 = arith.addf %10, %22 : vector<32x128xf32>
    %c8_i32_18 = arith.constant 8 : i32
    %24 = tpu.dynamic_rotate %18 by %c8_i32_18 dim 1 : vector<32x128xf32>, i32 -> vector<32x128xf32>
    %c0_19 = arith.constant 0 : index
    %c0_20 = arith.constant 0 : index
    %25 = vector.load %arg7[%c0_19, %c0_20] : memref<2x128xf32, #tpu.memory_space<vmem>>, vector<1x128xf32>
    %26 = vector.broadcast %25 : vector<1x128xf32> to vector<32x128xf32>
    %27 = arith.addf %24, %26 : vector<32x128xf32>
    %28 = arith.maximumf %18, %27 : vector<32x128xf32>
    %c120_i32 = arith.constant 120 : i32
    %29 = tpu.dynamic_rotate %10 by %c120_i32 dim 1 : vector<32x128xf32>, i32 -> vector<32x128xf32>
    %c1_21 = arith.constant 1 : index
    %c0_22 = arith.constant 0 : index
    %30 = vector.load %arg6[%c1_21, %c0_22] : memref<2x128xf32, #tpu.memory_space<vmem>>, vector<1x128xf32>
    %31 = vector.broadcast %30 : vector<1x128xf32> to vector<32x128xf32>
    %32 = arith.mulf %29, %31 : vector<32x128xf32>
    %33 = arith.addf %23, %32 : vector<32x128xf32>
    %c120_i32_23 = arith.constant 120 : i32
    %34 = tpu.dynamic_rotate %18 by %c120_i32_23 dim 1 : vector<32x128xf32>, i32 -> vector<32x128xf32>
    %c1_24 = arith.constant 1 : index
    %c0_25 = arith.constant 0 : index
    %35 = vector.load %arg7[%c1_24, %c0_25] : memref<2x128xf32, #tpu.memory_space<vmem>>, vector<1x128xf32>
    %36 = vector.broadcast %35 : vector<1x128xf32> to vector<32x128xf32>
    %37 = arith.addf %34, %36 : vector<32x128xf32>
    %38 = arith.maximumf %28, %37 : vector<32x128xf32>
    %c0_26 = arith.constant 0 : index
    %c0_27 = arith.constant 0 : index
    %39 = vector.load %arg8[%c0_26, %c0_27] : memref<32x128xf32, #tpu.memory_space<vmem>>, vector<32x128xf32>
    %40 = arith.mulf %33, %39 : vector<32x128xf32>
    %c1_28 = arith.constant 1 : index
    %41 = memref.load %arg9[%c1_28] : memref<8xf32, #tpu.memory_space<smem>>
    %42 = vector.shape_cast %38 : vector<32x128xf32> to vector<4x8x128xf32>
    %cst_29 = arith.constant dense<0.000000e+00> : vector<8x128xf32>
    %43 = vector.multi_reduction <add>, %42, %cst_29 [0] : vector<4x8x128xf32> to vector<8x128xf32>
    %c8_i32_30 = arith.constant 8 : i32
    %44 = tpu.dynamic_rotate %43 by %c8_i32_30 dim 1 : vector<8x128xf32>, i32 -> vector<8x128xf32>
    %45 = arith.addf %43, %44 : vector<8x128xf32>
    %c16_i32 = arith.constant 16 : i32
    %46 = tpu.dynamic_rotate %45 by %c16_i32 dim 1 : vector<8x128xf32>, i32 -> vector<8x128xf32>
    %47 = arith.addf %45, %46 : vector<8x128xf32>
    %c32_i32 = arith.constant 32 : i32
    %48 = tpu.dynamic_rotate %47 by %c32_i32 dim 1 : vector<8x128xf32>, i32 -> vector<8x128xf32>
    %49 = arith.addf %47, %48 : vector<8x128xf32>
    %c64_i32 = arith.constant 64 : i32
    %50 = tpu.dynamic_rotate %49 by %c64_i32 dim 1 : vector<8x128xf32>, i32 -> vector<8x128xf32>
    %51 = arith.addf %49, %50 : vector<8x128xf32>
    %cst_31 = arith.constant dense<0.000000e+00> : vector<128xf32>
    %52 = vector.multi_reduction <add>, %51, %cst_31 [0] : vector<8x128xf32> to vector<128xf32>
    %53 = vector.shape_cast %52 : vector<128xf32> to vector<1x128xf32>
    %54 = arith.mulf %42, %42 : vector<4x8x128xf32>
    %cst_32 = arith.constant dense<0.000000e+00> : vector<8x128xf32>
    %55 = vector.multi_reduction <add>, %54, %cst_32 [0] : vector<4x8x128xf32> to vector<8x128xf32>
    %c8_i32_33 = arith.constant 8 : i32
    %56 = tpu.dynamic_rotate %55 by %c8_i32_33 dim 1 : vector<8x128xf32>, i32 -> vector<8x128xf32>
    %57 = arith.addf %55, %56 : vector<8x128xf32>
    %c16_i32_34 = arith.constant 16 : i32
    %58 = tpu.dynamic_rotate %57 by %c16_i32_34 dim 1 : vector<8x128xf32>, i32 -> vector<8x128xf32>
    %59 = arith.addf %57, %58 : vector<8x128xf32>
    %c32_i32_35 = arith.constant 32 : i32
    %60 = tpu.dynamic_rotate %59 by %c32_i32_35 dim 1 : vector<8x128xf32>, i32 -> vector<8x128xf32>
    %61 = arith.addf %59, %60 : vector<8x128xf32>
    %c64_i32_36 = arith.constant 64 : i32
    %62 = tpu.dynamic_rotate %61 by %c64_i32_36 dim 1 : vector<8x128xf32>, i32 -> vector<8x128xf32>
    %63 = arith.addf %61, %62 : vector<8x128xf32>
    %cst_37 = arith.constant dense<0.000000e+00> : vector<128xf32>
    %64 = vector.multi_reduction <add>, %63, %cst_37 [0] : vector<8x128xf32> to vector<128xf32>
    %65 = vector.shape_cast %64 : vector<128xf32> to vector<1x128xf32>
    %cst_38 = arith.constant 0.001953125 : f32
    %66 = vector.broadcast %cst_38 : f32 to vector<1x128xf32>
    %67 = arith.mulf %53, %66 : vector<1x128xf32>
    %cst_39 = arith.constant 0.001953125 : f32
    %68 = vector.broadcast %cst_39 : f32 to vector<1x128xf32>
    %69 = arith.mulf %65, %68 : vector<1x128xf32>
    %70 = arith.mulf %67, %67 : vector<1x128xf32>
    %71 = arith.subf %69, %70 : vector<1x128xf32>
    %cst_40 = arith.constant 9.99999974E-6 : f32
    %72 = vector.broadcast %cst_40 : f32 to vector<1x128xf32>
    %73 = arith.addf %71, %72 : vector<1x128xf32>
    %74 = math.rsqrt %73 : vector<1x128xf32>
    %75 = vector.broadcast %67 : vector<1x128xf32> to vector<32x128xf32>
    %76 = arith.subf %38, %75 : vector<32x128xf32>
    %77 = vector.broadcast %41 : f32 to vector<1x128xf32>
    %78 = arith.mulf %77, %74 : vector<1x128xf32>
    %79 = vector.broadcast %78 : vector<1x128xf32> to vector<32x128xf32>
    %80 = arith.mulf %76, %79 : vector<32x128xf32>
    %c2 = arith.constant 2 : index
    %81 = memref.load %arg9[%c2] : memref<8xf32, #tpu.memory_space<smem>>
    %82 = vector.shape_cast %40 : vector<32x128xf32> to vector<4x8x128xf32>
    %cst_41 = arith.constant dense<0.000000e+00> : vector<8x128xf32>
    %83 = vector.multi_reduction <add>, %82, %cst_41 [0] : vector<4x8x128xf32> to vector<8x128xf32>
    %c8_i32_42 = arith.constant 8 : i32
    %84 = tpu.dynamic_rotate %83 by %c8_i32_42 dim 1 : vector<8x128xf32>, i32 -> vector<8x128xf32>
    %85 = arith.addf %83, %84 : vector<8x128xf32>
    %c16_i32_43 = arith.constant 16 : i32
    %86 = tpu.dynamic_rotate %85 by %c16_i32_43 dim 1 : vector<8x128xf32>, i32 -> vector<8x128xf32>
    %87 = arith.addf %85, %86 : vector<8x128xf32>
    %c32_i32_44 = arith.constant 32 : i32
    %88 = tpu.dynamic_rotate %87 by %c32_i32_44 dim 1 : vector<8x128xf32>, i32 -> vector<8x128xf32>
    %89 = arith.addf %87, %88 : vector<8x128xf32>
    %c64_i32_45 = arith.constant 64 : i32
    %90 = tpu.dynamic_rotate %89 by %c64_i32_45 dim 1 : vector<8x128xf32>, i32 -> vector<8x128xf32>
    %91 = arith.addf %89, %90 : vector<8x128xf32>
    %cst_46 = arith.constant dense<0.000000e+00> : vector<128xf32>
    %92 = vector.multi_reduction <add>, %91, %cst_46 [0] : vector<8x128xf32> to vector<128xf32>
    %93 = vector.shape_cast %92 : vector<128xf32> to vector<1x128xf32>
    %94 = arith.mulf %82, %82 : vector<4x8x128xf32>
    %cst_47 = arith.constant dense<0.000000e+00> : vector<8x128xf32>
    %95 = vector.multi_reduction <add>, %94, %cst_47 [0] : vector<4x8x128xf32> to vector<8x128xf32>
    %c8_i32_48 = arith.constant 8 : i32
    %96 = tpu.dynamic_rotate %95 by %c8_i32_48 dim 1 : vector<8x128xf32>, i32 -> vector<8x128xf32>
    %97 = arith.addf %95, %96 : vector<8x128xf32>
    %c16_i32_49 = arith.constant 16 : i32
    %98 = tpu.dynamic_rotate %97 by %c16_i32_49 dim 1 : vector<8x128xf32>, i32 -> vector<8x128xf32>
    %99 = arith.addf %97, %98 : vector<8x128xf32>
    %c32_i32_50 = arith.constant 32 : i32
    %100 = tpu.dynamic_rotate %99 by %c32_i32_50 dim 1 : vector<8x128xf32>, i32 -> vector<8x128xf32>
    %101 = arith.addf %99, %100 : vector<8x128xf32>
    %c64_i32_51 = arith.constant 64 : i32
    %102 = tpu.dynamic_rotate %101 by %c64_i32_51 dim 1 : vector<8x128xf32>, i32 -> vector<8x128xf32>
    %103 = arith.addf %101, %102 : vector<8x128xf32>
    %cst_52 = arith.constant dense<0.000000e+00> : vector<128xf32>
    %104 = vector.multi_reduction <add>, %103, %cst_52 [0] : vector<8x128xf32> to vector<128xf32>
    %105 = vector.shape_cast %104 : vector<128xf32> to vector<1x128xf32>
    %cst_53 = arith.constant 0.001953125 : f32
    %106 = vector.broadcast %cst_53 : f32 to vector<1x128xf32>
    %107 = arith.mulf %93, %106 : vector<1x128xf32>
    %cst_54 = arith.constant 0.001953125 : f32
    %108 = vector.broadcast %cst_54 : f32 to vector<1x128xf32>
    %109 = arith.mulf %105, %108 : vector<1x128xf32>
    %110 = arith.mulf %107, %107 : vector<1x128xf32>
    %111 = arith.subf %109, %110 : vector<1x128xf32>
    %cst_55 = arith.constant 9.99999974E-6 : f32
    %112 = vector.broadcast %cst_55 : f32 to vector<1x128xf32>
    %113 = arith.addf %111, %112 : vector<1x128xf32>
    %114 = math.rsqrt %113 : vector<1x128xf32>
    %115 = vector.broadcast %107 : vector<1x128xf32> to vector<32x128xf32>
    %116 = arith.subf %40, %115 : vector<32x128xf32>
    %117 = vector.broadcast %81 : f32 to vector<1x128xf32>
    %118 = arith.mulf %117, %114 : vector<1x128xf32>
    %119 = vector.broadcast %118 : vector<1x128xf32> to vector<32x128xf32>
    %120 = arith.mulf %116, %119 : vector<32x128xf32>
    %121 = arith.addf %80, %120 : vector<32x128xf32>
    %c3_56 = arith.constant 3 : index
    %122 = memref.load %arg9[%c3_56] : memref<8xf32, #tpu.memory_space<smem>>
    %123 = vector.broadcast %122 : f32 to vector<32x128xf32>
    %124 = arith.mulf %123, %1 : vector<32x128xf32>
    %125 = arith.addf %121, %124 : vector<32x128xf32>
    %cst_57 = arith.constant 0.000000e+00 : f32
    %126 = vector.broadcast %cst_57 : f32 to vector<2x16x128xf32>
    %127 = arith.maximumf %0, %126 : vector<2x16x128xf32>
    %c0_58 = arith.constant 0 : index
    %c4_59 = arith.constant 4 : index
    %c0_60 = arith.constant 0 : index
    %128 = vector.load %arg11[%c0_58, %c4_59, %c0_60] : memref<2x24x128xf32, #tpu.memory_space<vmem>>, vector<2x16x128xf32>
    tpu.vector_store %arg11[%c0_58, %c4_59, %c0_60], %127 {strides = array<i32>} : memref<2x24x128xf32, #tpu.memory_space<vmem>>, vector<2x16x128xf32>,
    %cst_61 = arith.constant 0.000000e+00 : f32
    %129 = vector.broadcast %cst_61 : f32 to vector<32x128xf32>
    %cst_62 = arith.constant 0.000000e+00 : f32
    %130 = vector.broadcast %cst_62 : f32 to vector<32x128xf32>
    %c0_63 = arith.constant 0 : index
    %c0_64 = arith.constant 0 : index
    %c0_65 = arith.constant 0 : index
    %131 = vector.load %arg11[%c0_63, %c0_64, %c0_65] : memref<2x24x128xf32, #tpu.memory_space<vmem>>, vector<2x16x128xf32>
    %132 = vector.shape_cast %131 : vector<2x16x128xf32> to vector<32x128xf32>
    %133 = arith.truncf %132 : vector<32x128xf32> to vector<32x128xbf16>
    %c0_66 = arith.constant 0 : index
    %c0_67 = arith.constant 0 : index
    %134 = vector.load %arg2[%c0_66, %c0_67] : memref<128x1024xbf16, #tpu.memory_space<vmem>>, vector<128x128xbf16>
    %cst_68 = arith.constant dense<0.000000e+00> : vector<32x128xf32>
    %135 = tpu.matmul %133, %134, %cst_68 {dimension_numbers = #tpu.dot_dimension_numbers<[1], [0], [0], [1], [0, 0, 1, 1], [], []>} : vector<32x128xbf16>, vector<128x128xbf16>, vector<32x128xf32> -> vector<32x128xf32>
    %136 = arith.addf %130, %135 : vector<32x128xf32>
    %c0_69 = arith.constant 0 : index
    %c2_70 = arith.constant 2 : index
    %c0_71 = arith.constant 0 : index
    %137 = vector.load %arg11[%c0_69, %c2_70, %c0_71] : memref<2x24x128xf32, #tpu.memory_space<vmem>>, vector<2x16x128xf32>
    %138 = vector.shape_cast %137 : vector<2x16x128xf32> to vector<32x128xf32>
    %139 = arith.truncf %138 : vector<32x128xf32> to vector<32x128xbf16>
    %c0_72 = arith.constant 0 : index
    %c128 = arith.constant 128 : index
    %140 = vector.load %arg2[%c0_72, %c128] : memref<128x1024xbf16, #tpu.memory_space<vmem>>, vector<128x256xbf16>
    %cst_73 = arith.constant dense<0.000000e+00> : vector<32x256xf32>
    %141 = tpu.matmul %139, %140, %cst_73 {dimension_numbers = #tpu.dot_dimension_numbers<[1], [0], [0], [1], [0, 0, 1, 1], [], []>} : vector<32x128xbf16>, vector<128x256xbf16>, vector<32x256xf32> -> vector<32x256xf32>
    %142 = vector.extract_strided_slice %141 {offsets = [0, 0], sizes = [32, 128], strides = [1, 1]} : vector<32x256xf32> to vector<32x128xf32>
    %143 = arith.addf %129, %142 : vector<32x128xf32>
    %144 = vector.extract_strided_slice %141 {offsets = [0, 128], sizes = [32, 128], strides = [1, 1]} : vector<32x256xf32> to vector<32x128xf32>
    %145 = arith.addf %136, %144 : vector<32x128xf32>
    %c0_74 = arith.constant 0 : index
    %c4_75 = arith.constant 4 : index
    %c0_76 = arith.constant 0 : index
    %146 = vector.load %arg11[%c0_74, %c4_75, %c0_76] : memref<2x24x128xf32, #tpu.memory_space<vmem>>, vector<2x16x128xf32>
    %147 = vector.shape_cast %146 : vector<2x16x128xf32> to vector<32x128xf32>
    %148 = arith.truncf %147 : vector<32x128xf32> to vector<32x128xbf16>
    %c0_77 = arith.constant 0 : index
    %c384 = arith.constant 384 : index
    %149 = vector.load %arg2[%c0_77, %c384] : memref<128x1024xbf16, #tpu.memory_space<vmem>>, vector<128x256xbf16>
    %cst_78 = arith.constant dense<0.000000e+00> : vector<32x256xf32>
    %150 = tpu.matmul %148, %149, %cst_78 {dimension_numbers = #tpu.dot_dimension_numbers<[1], [0], [0], [1], [0, 0, 1, 1], [], []>} : vector<32x128xbf16>, vector<128x256xbf16>, vector<32x256xf32> -> vector<32x256xf32>
    %151 = vector.extract_strided_slice %150 {offsets = [0, 0], sizes = [32, 128], strides = [1, 1]} : vector<32x256xf32> to vector<32x128xf32>
    %152 = arith.addf %143, %151 : vector<32x128xf32>
    %153 = vector.extract_strided_slice %150 {offsets = [0, 128], sizes = [32, 128], strides = [1, 1]} : vector<32x256xf32> to vector<32x128xf32>
    %154 = arith.addf %145, %153 : vector<32x128xf32>
    %c0_79 = arith.constant 0 : index
    %c6 = arith.constant 6 : index
    %c0_80 = arith.constant 0 : index
    %155 = vector.load %arg11[%c0_79, %c6, %c0_80] : memref<2x24x128xf32, #tpu.memory_space<vmem>>, vector<2x16x128xf32>
    %156 = vector.shape_cast %155 : vector<2x16x128xf32> to vector<32x128xf32>
    %157 = arith.truncf %156 : vector<32x128xf32> to vector<32x128xbf16>
    %c0_81 = arith.constant 0 : index
    %c640 = arith.constant 640 : index
    %158 = vector.load %arg2[%c0_81, %c640] : memref<128x1024xbf16, #tpu.memory_space<vmem>>, vector<128x256xbf16>
    %cst_82 = arith.constant dense<0.000000e+00> : vector<32x256xf32>
    %159 = tpu.matmul %157, %158, %cst_82 {dimension_numbers = #tpu.dot_dimension_numbers<[1], [0], [0], [1], [0, 0, 1, 1], [], []>} : vector<32x128xbf16>, vector<128x256xbf16>, vector<32x256xf32> -> vector<32x256xf32>
    %160 = vector.extract_strided_slice %159 {offsets = [0, 0], sizes = [32, 128], strides = [1, 1]} : vector<32x256xf32> to vector<32x128xf32>
    %161 = arith.addf %152, %160 : vector<32x128xf32>
    %162 = vector.extract_strided_slice %159 {offsets = [0, 128], sizes = [32, 128], strides = [1, 1]} : vector<32x256xf32> to vector<32x128xf32>
    %163 = arith.addf %154, %162 : vector<32x128xf32>
    %c0_83 = arith.constant 0 : index
    %c8 = arith.constant 8 : index
    %c0_84 = arith.constant 0 : index
    %164 = vector.load %arg11[%c0_83, %c8, %c0_84] : memref<2x24x128xf32, #tpu.memory_space<vmem>>, vector<2x16x128xf32>
    %165 = vector.shape_cast %164 : vector<2x16x128xf32> to vector<32x128xf32>
    %166 = arith.truncf %165 : vector<32x128xf32> to vector<32x128xbf16>
    %c0_85 = arith.constant 0 : index
    %c896 = arith.constant 896 : index
    %167 = vector.load %arg2[%c0_85, %c896] : memref<128x1024xbf16, #tpu.memory_space<vmem>>, vector<128x128xbf16>
    %cst_86 = arith.constant dense<0.000000e+00> : vector<32x128xf32>
    %168 = tpu.matmul %166, %167, %cst_86 {dimension_numbers = #tpu.dot_dimension_numbers<[1], [0], [0], [1], [0, 0, 1, 1], [], []>} : vector<32x128xbf16>, vector<128x128xbf16>, vector<32x128xf32> -> vector<32x128xf32>
    %169 = arith.addf %163, %168 : vector<32x128xf32>
    %c6_87 = arith.constant 6 : index
    %170 = memref.load %arg9[%c6_87] : memref<8xf32, #tpu.memory_space<smem>>
    %171 = vector.shape_cast %161 : vector<32x128xf32> to vector<4x8x128xf32>
    %cst_88 = arith.constant dense<0.000000e+00> : vector<8x128xf32>
    %172 = vector.multi_reduction <add>, %171, %cst_88 [0] : vector<4x8x128xf32> to vector<8x128xf32>
    %c8_i32_89 = arith.constant 8 : i32
    %173 = tpu.dynamic_rotate %172 by %c8_i32_89 dim 1 : vector<8x128xf32>, i32 -> vector<8x128xf32>
    %174 = arith.addf %172, %173 : vector<8x128xf32>
    %c16_i32_90 = arith.constant 16 : i32
    %175 = tpu.dynamic_rotate %174 by %c16_i32_90 dim 1 : vector<8x128xf32>, i32 -> vector<8x128xf32>
    %176 = arith.addf %174, %175 : vector<8x128xf32>
    %c32_i32_91 = arith.constant 32 : i32
    %177 = tpu.dynamic_rotate %176 by %c32_i32_91 dim 1 : vector<8x128xf32>, i32 -> vector<8x128xf32>
    %178 = arith.addf %176, %177 : vector<8x128xf32>
    %c64_i32_92 = arith.constant 64 : i32
    %179 = tpu.dynamic_rotate %178 by %c64_i32_92 dim 1 : vector<8x128xf32>, i32 -> vector<8x128xf32>
    %180 = arith.addf %178, %179 : vector<8x128xf32>
    %cst_93 = arith.constant dense<0.000000e+00> : vector<128xf32>
    %181 = vector.multi_reduction <add>, %180, %cst_93 [0] : vector<8x128xf32> to vector<128xf32>
    %182 = vector.shape_cast %181 : vector<128xf32> to vector<1x128xf32>
    %183 = arith.mulf %171, %171 : vector<4x8x128xf32>
    %cst_94 = arith.constant dense<0.000000e+00> : vector<8x128xf32>
    %184 = vector.multi_reduction <add>, %183, %cst_94 [0] : vector<4x8x128xf32> to vector<8x128xf32>
    %c8_i32_95 = arith.constant 8 : i32
    %185 = tpu.dynamic_rotate %184 by %c8_i32_95 dim 1 : vector<8x128xf32>, i32 -> vector<8x128xf32>
    %186 = arith.addf %184, %185 : vector<8x128xf32>
    %c16_i32_96 = arith.constant 16 : i32
    %187 = tpu.dynamic_rotate %186 by %c16_i32_96 dim 1 : vector<8x128xf32>, i32 -> vector<8x128xf32>
    %188 = arith.addf %186, %187 : vector<8x128xf32>
    %c32_i32_97 = arith.constant 32 : i32
    %189 = tpu.dynamic_rotate %188 by %c32_i32_97 dim 1 : vector<8x128xf32>, i32 -> vector<8x128xf32>
    %190 = arith.addf %188, %189 : vector<8x128xf32>
    %c64_i32_98 = arith.constant 64 : i32
    %191 = tpu.dynamic_rotate %190 by %c64_i32_98 dim 1 : vector<8x128xf32>, i32 -> vector<8x128xf32>
    %192 = arith.addf %190, %191 : vector<8x128xf32>
    %cst_99 = arith.constant dense<0.000000e+00> : vector<128xf32>
    %193 = vector.multi_reduction <add>, %192, %cst_99 [0] : vector<8x128xf32> to vector<128xf32>
    %194 = vector.shape_cast %193 : vector<128xf32> to vector<1x128xf32>
    %cst_100 = arith.constant 0.001953125 : f32
    %195 = vector.broadcast %cst_100 : f32 to vector<1x128xf32>
    %196 = arith.mulf %182, %195 : vector<1x128xf32>
    %cst_101 = arith.constant 0.001953125 : f32
    %197 = vector.broadcast %cst_101 : f32 to vector<1x128xf32>
    %198 = arith.mulf %194, %197 : vector<1x128xf32>
    %199 = arith.mulf %196, %196 : vector<1x128xf32>
    %200 = arith.subf %198, %199 : vector<1x128xf32>
    %cst_102 = arith.constant 9.99999974E-6 : f32
    %201 = vector.broadcast %cst_102 : f32 to vector<1x128xf32>
    %202 = arith.addf %200, %201 : vector<1x128xf32>
    %203 = math.rsqrt %202 : vector<1x128xf32>
    %204 = vector.broadcast %196 : vector<1x128xf32> to vector<32x128xf32>
    %205 = arith.subf %161, %204 : vector<32x128xf32>
    %206 = vector.broadcast %170 : f32 to vector<1x128xf32>
    %207 = arith.mulf %206, %203 : vector<1x128xf32>
    %208 = vector.broadcast %207 : vector<1x128xf32> to vector<32x128xf32>
    %209 = arith.mulf %205, %208 : vector<32x128xf32>
    %210 = arith.addf %125, %209 : vector<32x128xf32>
    %c7 = arith.constant 7 : index
    %211 = memref.load %arg9[%c7] : memref<8xf32, #tpu.memory_space<smem>>
    %212 = vector.shape_cast %169 : vector<32x128xf32> to vector<4x8x128xf32>
    %cst_103 = arith.constant dense<0.000000e+00> : vector<8x128xf32>
    %213 = vector.multi_reduction <add>, %212, %cst_103 [0] : vector<4x8x128xf32> to vector<8x128xf32>
    %c8_i32_104 = arith.constant 8 : i32
    %214 = tpu.dynamic_rotate %213 by %c8_i32_104 dim 1 : vector<8x128xf32>, i32 -> vector<8x128xf32>
    %215 = arith.addf %213, %214 : vector<8x128xf32>
    %c16_i32_105 = arith.constant 16 : i32
    %216 = tpu.dynamic_rotate %215 by %c16_i32_105 dim 1 : vector<8x128xf32>, i32 -> vector<8x128xf32>
    %217 = arith.addf %215, %216 : vector<8x128xf32>
    %c32_i32_106 = arith.constant 32 : i32
    %218 = tpu.dynamic_rotate %217 by %c32_i32_106 dim 1 : vector<8x128xf32>, i32 -> vector<8x128xf32>
    %219 = arith.addf %217, %218 : vector<8x128xf32>
    %c64_i32_107 = arith.constant 64 : i32
    %220 = tpu.dynamic_rotate %219 by %c64_i32_107 dim 1 : vector<8x128xf32>, i32 -> vector<8x128xf32>
    %221 = arith.addf %219, %220 : vector<8x128xf32>
    %cst_108 = arith.constant dense<0.000000e+00> : vector<128xf32>
    %222 = vector.multi_reduction <add>, %221, %cst_108 [0] : vector<8x128xf32> to vector<128xf32>
    %223 = vector.shape_cast %222 : vector<128xf32> to vector<1x128xf32>
    %224 = arith.mulf %212, %212 : vector<4x8x128xf32>
    %cst_109 = arith.constant dense<0.000000e+00> : vector<8x128xf32>
    %225 = vector.multi_reduction <add>, %224, %cst_109 [0] : vector<4x8x128xf32> to vector<8x128xf32>
    %c8_i32_110 = arith.constant 8 : i32
    %226 = tpu.dynamic_rotate %225 by %c8_i32_110 dim 1 : vector<8x128xf32>, i32 -> vector<8x128xf32>
    %227 = arith.addf %225, %226 : vector<8x128xf32>
    %c16_i32_111 = arith.constant 16 : i32
    %228 = tpu.dynamic_rotate %227 by %c16_i32_111 dim 1 : vector<8x128xf32>, i32 -> vector<8x128xf32>
    %229 = arith.addf %227, %228 : vector<8x128xf32>
    %c32_i32_112 = arith.constant 32 : i32
    %230 = tpu.dynamic_rotate %229 by %c32_i32_112 dim 1 : vector<8x128xf32>, i32 -> vector<8x128xf32>
    %231 = arith.addf %229, %230 : vector<8x128xf32>
    %c64_i32_113 = arith.constant 64 : i32
    %232 = tpu.dynamic_rotate %231 by %c64_i32_113 dim 1 : vector<8x128xf32>, i32 -> vector<8x128xf32>
    %233 = arith.addf %231, %232 : vector<8x128xf32>
    %cst_114 = arith.constant dense<0.000000e+00> : vector<128xf32>
    %234 = vector.multi_reduction <add>, %233, %cst_114 [0] : vector<8x128xf32> to vector<128xf32>
    %235 = vector.shape_cast %234 : vector<128xf32> to vector<1x128xf32>
    %cst_115 = arith.constant 0.001953125 : f32
    %236 = vector.broadcast %cst_115 : f32 to vector<1x128xf32>
    %237 = arith.mulf %223, %236 : vector<1x128xf32>
    %cst_116 = arith.constant 0.001953125 : f32
    %238 = vector.broadcast %cst_116 : f32 to vector<1x128xf32>
    %239 = arith.mulf %235, %238 : vector<1x128xf32>
    %240 = arith.mulf %237, %237 : vector<1x128xf32>
    %241 = arith.subf %239, %240 : vector<1x128xf32>
    %cst_117 = arith.constant 9.99999974E-6 : f32
    %242 = vector.broadcast %cst_117 : f32 to vector<1x128xf32>
    %243 = arith.addf %241, %242 : vector<1x128xf32>
    %244 = math.rsqrt %243 : vector<1x128xf32>
    %245 = vector.broadcast %237 : vector<1x128xf32> to vector<32x128xf32>
    %246 = arith.subf %169, %245 : vector<32x128xf32>
    %247 = vector.broadcast %211 : f32 to vector<1x128xf32>
    %248 = arith.mulf %247, %244 : vector<1x128xf32>
    %249 = vector.broadcast %248 : vector<1x128xf32> to vector<32x128xf32>
    %250 = arith.mulf %246, %249 : vector<32x128xf32>
    %251 = arith.addf %210, %250 : vector<32x128xf32>
    %cst_118 = arith.constant 0.000000e+00 : f32
    %252 = vector.broadcast %cst_118 : f32 to vector<32x128xf32>
    %cst_119 = arith.constant 0.000000e+00 : f32
    %253 = vector.broadcast %cst_119 : f32 to vector<32x128xf32>
    %c0_120 = arith.constant 0 : index
    %c2_121 = arith.constant 2 : index
    %c0_122 = arith.constant 0 : index
    %254 = vector.load %arg11[%c0_120, %c2_121, %c0_122] : memref<2x24x128xf32, #tpu.memory_space<vmem>>, vector<2x16x128xf32>
    %255 = vector.shape_cast %254 : vector<2x16x128xf32> to vector<32x128xf32>
    %256 = arith.truncf %255 : vector<32x128xf32> to vector<32x128xbf16>
    %c0_123 = arith.constant 0 : index
    %c0_124 = arith.constant 0 : index
    %257 = vector.load %arg1[%c0_123, %c0_124] : memref<128x1024xbf16, #tpu.memory_space<vmem>>, vector<128x128xbf16>
    %cst_125 = arith.constant dense<0.000000e+00> : vector<32x128xf32>
    %258 = tpu.matmul %256, %257, %cst_125 {dimension_numbers = #tpu.dot_dimension_numbers<[1], [0], [0], [1], [0, 0, 1, 1], [], []>} : vector<32x128xbf16>, vector<128x128xbf16>, vector<32x128xf32> -> vector<32x128xf32>
    %259 = arith.addf %253, %258 : vector<32x128xf32>
    %c0_126 = arith.constant 0 : index
    %c3_127 = arith.constant 3 : index
    %c0_128 = arith.constant 0 : index
    %260 = vector.load %arg11[%c0_126, %c3_127, %c0_128] : memref<2x24x128xf32, #tpu.memory_space<vmem>>, vector<2x16x128xf32>
    %261 = vector.shape_cast %260 : vector<2x16x128xf32> to vector<32x128xf32>
    %262 = arith.truncf %261 : vector<32x128xf32> to vector<32x128xbf16>
    %c0_129 = arith.constant 0 : index
    %c128_130 = arith.constant 128 : index
    %263 = vector.load %arg1[%c0_129, %c128_130] : memref<128x1024xbf16, #tpu.memory_space<vmem>>, vector<128x256xbf16>
    %cst_131 = arith.constant dense<0.000000e+00> : vector<32x256xf32>
    %264 = tpu.matmul %262, %263, %cst_131 {dimension_numbers = #tpu.dot_dimension_numbers<[1], [0], [0], [1], [0, 0, 1, 1], [], []>} : vector<32x128xbf16>, vector<128x256xbf16>, vector<32x256xf32> -> vector<32x256xf32>
    %265 = vector.extract_strided_slice %264 {offsets = [0, 0], sizes = [32, 128], strides = [1, 1]} : vector<32x256xf32> to vector<32x128xf32>
    %266 = arith.addf %252, %265 : vector<32x128xf32>
    %267 = vector.extract_strided_slice %264 {offsets = [0, 128], sizes = [32, 128], strides = [1, 1]} : vector<32x256xf32> to vector<32x128xf32>
    %268 = arith.addf %259, %267 : vector<32x128xf32>
    %c0_132 = arith.constant 0 : index
    %c4_133 = arith.constant 4 : index
    %c0_134 = arith.constant 0 : index
    %269 = vector.load %arg11[%c0_132, %c4_133, %c0_134] : memref<2x24x128xf32, #tpu.memory_space<vmem>>, vector<2x16x128xf32>
    %270 = vector.shape_cast %269 : vector<2x16x128xf32> to vector<32x128xf32>
    %271 = arith.truncf %270 : vector<32x128xf32> to vector<32x128xbf16>
    %c0_135 = arith.constant 0 : index
    %c384_136 = arith.constant 384 : index
    %272 = vector.load %arg1[%c0_135, %c384_136] : memref<128x1024xbf16, #tpu.memory_space<vmem>>, vector<128x256xbf16>
    %cst_137 = arith.constant dense<0.000000e+00> : vector<32x256xf32>
    %273 = tpu.matmul %271, %272, %cst_137 {dimension_numbers = #tpu.dot_dimension_numbers<[1], [0], [0], [1], [0, 0, 1, 1], [], []>} : vector<32x128xbf16>, vector<128x256xbf16>, vector<32x256xf32> -> vector<32x256xf32>
    %274 = vector.extract_strided_slice %273 {offsets = [0, 0], sizes = [32, 128], strides = [1, 1]} : vector<32x256xf32> to vector<32x128xf32>
    %275 = arith.addf %266, %274 : vector<32x128xf32>
    %276 = vector.extract_strided_slice %273 {offsets = [0, 128], sizes = [32, 128], strides = [1, 1]} : vector<32x256xf32> to vector<32x128xf32>
    %277 = arith.addf %268, %276 : vector<32x128xf32>
    %c0_138 = arith.constant 0 : index
    %c5_139 = arith.constant 5 : index
    %c0_140 = arith.constant 0 : index
    %278 = vector.load %arg11[%c0_138, %c5_139, %c0_140] : memref<2x24x128xf32, #tpu.memory_space<vmem>>, vector<2x16x128xf32>
    %279 = vector.shape_cast %278 : vector<2x16x128xf32> to vector<32x128xf32>
    %280 = arith.truncf %279 : vector<32x128xf32> to vector<32x128xbf16>
    %c0_141 = arith.constant 0 : index
    %c640_142 = arith.constant 640 : index
    %281 = vector.load %arg1[%c0_141, %c640_142] : memref<128x1024xbf16, #tpu.memory_space<vmem>>, vector<128x256xbf16>
    %cst_143 = arith.constant dense<0.000000e+00> : vector<32x256xf32>
    %282 = tpu.matmul %280, %281, %cst_143 {dimension_numbers = #tpu.dot_dimension_numbers<[1], [0], [0], [1], [0, 0, 1, 1], [], []>} : vector<32x128xbf16>, vector<128x256xbf16>, vector<32x256xf32> -> vector<32x256xf32>
    %283 = vector.extract_strided_slice %282 {offsets = [0, 0], sizes = [32, 128], strides = [1, 1]} : vector<32x256xf32> to vector<32x128xf32>
    %284 = arith.addf %275, %283 : vector<32x128xf32>
    %285 = vector.extract_strided_slice %282 {offsets = [0, 128], sizes = [32, 128], strides = [1, 1]} : vector<32x256xf32> to vector<32x128xf32>
    %286 = arith.addf %277, %285 : vector<32x128xf32>
    %c0_144 = arith.constant 0 : index
    %c6_145 = arith.constant 6 : index
    %c0_146 = arith.constant 0 : index
    %287 = vector.load %arg11[%c0_144, %c6_145, %c0_146] : memref<2x24x128xf32, #tpu.memory_space<vmem>>, vector<2x16x128xf32>
    %288 = vector.shape_cast %287 : vector<2x16x128xf32> to vector<32x128xf32>
    %289 = arith.truncf %288 : vector<32x128xf32> to vector<32x128xbf16>
    %c0_147 = arith.constant 0 : index
    %c896_148 = arith.constant 896 : index
    %290 = vector.load %arg1[%c0_147, %c896_148] : memref<128x1024xbf16, #tpu.memory_space<vmem>>, vector<128x128xbf16>
    %cst_149 = arith.constant dense<0.000000e+00> : vector<32x128xf32>
    %291 = tpu.matmul %289, %290, %cst_149 {dimension_numbers = #tpu.dot_dimension_numbers<[1], [0], [0], [1], [0, 0, 1, 1], [], []>} : vector<32x128xbf16>, vector<128x128xbf16>, vector<32x128xf32> -> vector<32x128xf32>
    %292 = arith.addf %286, %291 : vector<32x128xf32>
    %cst_150 = arith.constant 0.000000e+00 : f32
    %293 = vector.broadcast %cst_150 : f32 to vector<2x20x128xf32>
    %c0_151 = arith.constant 0 : index
    %c0_152 = arith.constant 0 : index
    %c0_153 = arith.constant 0 : index
    %294 = vector.load %arg12[%c0_151, %c0_152, %c0_153] : memref<2x20x128xf32, #tpu.memory_space<vmem>>, vector<2x20x128xf32>
    tpu.vector_store %arg12[%c0_151, %c0_152, %c0_153], %293 {strides = array<i32>} : memref<2x20x128xf32, #tpu.memory_space<vmem>>, vector<2x20x128xf32>,
    %295 = vector.shape_cast %284 : vector<32x128xf32> to vector<4x8x128xf32>
    %cst_154 = arith.constant dense<0.000000e+00> : vector<8x128xf32>
    %296 = vector.multi_reduction <add>, %295, %cst_154 [0] : vector<4x8x128xf32> to vector<8x128xf32>
    %c8_i32_155 = arith.constant 8 : i32
    %297 = tpu.dynamic_rotate %296 by %c8_i32_155 dim 1 : vector<8x128xf32>, i32 -> vector<8x128xf32>
    %298 = arith.addf %296, %297 : vector<8x128xf32>
    %c16_i32_156 = arith.constant 16 : i32
    %299 = tpu.dynamic_rotate %298 by %c16_i32_156 dim 1 : vector<8x128xf32>, i32 -> vector<8x128xf32>
    %300 = arith.addf %298, %299 : vector<8x128xf32>
    %c32_i32_157 = arith.constant 32 : i32
    %301 = tpu.dynamic_rotate %300 by %c32_i32_157 dim 1 : vector<8x128xf32>, i32 -> vector<8x128xf32>
    %302 = arith.addf %300, %301 : vector<8x128xf32>
    %c64_i32_158 = arith.constant 64 : i32
    %303 = tpu.dynamic_rotate %302 by %c64_i32_158 dim 1 : vector<8x128xf32>, i32 -> vector<8x128xf32>
    %304 = arith.addf %302, %303 : vector<8x128xf32>
    %cst_159 = arith.constant dense<0.000000e+00> : vector<128xf32>
    %305 = vector.multi_reduction <add>, %304, %cst_159 [0] : vector<8x128xf32> to vector<128xf32>
    %306 = vector.shape_cast %305 : vector<128xf32> to vector<1x128xf32>
    %307 = arith.mulf %295, %295 : vector<4x8x128xf32>
    %cst_160 = arith.constant dense<0.000000e+00> : vector<8x128xf32>
    %308 = vector.multi_reduction <add>, %307, %cst_160 [0] : vector<4x8x128xf32> to vector<8x128xf32>
    %c8_i32_161 = arith.constant 8 : i32
    %309 = tpu.dynamic_rotate %308 by %c8_i32_161 dim 1 : vector<8x128xf32>, i32 -> vector<8x128xf32>
    %310 = arith.addf %308, %309 : vector<8x128xf32>
    %c16_i32_162 = arith.constant 16 : i32
    %311 = tpu.dynamic_rotate %310 by %c16_i32_162 dim 1 : vector<8x128xf32>, i32 -> vector<8x128xf32>
    %312 = arith.addf %310, %311 : vector<8x128xf32>
    %c32_i32_163 = arith.constant 32 : i32
    %313 = tpu.dynamic_rotate %312 by %c32_i32_163 dim 1 : vector<8x128xf32>, i32 -> vector<8x128xf32>
    %314 = arith.addf %312, %313 : vector<8x128xf32>
    %c64_i32_164 = arith.constant 64 : i32
    %315 = tpu.dynamic_rotate %314 by %c64_i32_164 dim 1 : vector<8x128xf32>, i32 -> vector<8x128xf32>
    %316 = arith.addf %314, %315 : vector<8x128xf32>
    %cst_165 = arith.constant dense<0.000000e+00> : vector<128xf32>
    %317 = vector.multi_reduction <add>, %316, %cst_165 [0] : vector<8x128xf32> to vector<128xf32>
    %318 = vector.shape_cast %317 : vector<128xf32> to vector<1x128xf32>
    %cst_166 = arith.constant 0.001953125 : f32
    %319 = vector.broadcast %cst_166 : f32 to vector<1x128xf32>
    %320 = arith.mulf %306, %319 : vector<1x128xf32>
    %cst_167 = arith.constant 0.001953125 : f32
    %321 = vector.broadcast %cst_167 : f32 to vector<1x128xf32>
    %322 = arith.mulf %318, %321 : vector<1x128xf32>
    %323 = arith.mulf %320, %320 : vector<1x128xf32>
    %324 = arith.subf %322, %323 : vector<1x128xf32>
    %cst_168 = arith.constant 9.99999974E-6 : f32
    %325 = vector.broadcast %cst_168 : f32 to vector<1x128xf32>
    %326 = arith.addf %324, %325 : vector<1x128xf32>
    %327 = math.rsqrt %326 : vector<1x128xf32>
    %328 = vector.broadcast %320 : vector<1x128xf32> to vector<32x128xf32>
    %329 = arith.subf %284, %328 : vector<32x128xf32>
    %330 = vector.broadcast %327 : vector<1x128xf32> to vector<32x128xf32>
    %331 = arith.mulf %329, %330 : vector<32x128xf32>
    %cst_169 = arith.constant 0.000000e+00 : f32
    %332 = vector.broadcast %cst_169 : f32 to vector<32x128xf32>
    %333 = arith.maximumf %331, %332 : vector<32x128xf32>
    %334 = vector.shape_cast %333 : vector<32x128xf32> to vector<2x16x128xf32>
    %c0_170 = arith.constant 0 : index
    %c2_171 = arith.constant 2 : index
    %c0_172 = arith.constant 0 : index
    %335 = vector.load %arg12[%c0_170, %c2_171, %c0_172] : memref<2x20x128xf32, #tpu.memory_space<vmem>>, vector<2x16x128xf32>
    tpu.vector_store %arg12[%c0_170, %c2_171, %c0_172], %334 {strides = array<i32>} : memref<2x20x128xf32, #tpu.memory_space<vmem>>, vector<2x16x128xf32>,
    %cst_173 = arith.constant 0.000000e+00 : f32
    %336 = vector.broadcast %cst_173 : f32 to vector<32x128xf32>
    %c0_174 = arith.constant 0 : index
    %c1_175 = arith.constant 1 : index
    %c0_176 = arith.constant 0 : index
    %337 = vector.load %arg12[%c0_174, %c1_175, %c0_176] : memref<2x20x128xf32, #tpu.memory_space<vmem>>, vector<2x16x128xf32>
    %338 = vector.shape_cast %337 : vector<2x16x128xf32> to vector<32x128xf32>
    %339 = arith.truncf %338 : vector<32x128xf32> to vector<32x128xbf16>
    %c0_177 = arith.constant 0 : index
    %c0_178 = arith.constant 0 : index
    %340 = vector.load %arg3[%c0_177, %c0_178] : memref<128x384xbf16, #tpu.memory_space<vmem>>, vector<128x128xbf16>
    %cst_179 = arith.constant dense<0.000000e+00> : vector<32x128xf32>
    %341 = tpu.matmul %339, %340, %cst_179 {dimension_numbers = #tpu.dot_dimension_numbers<[1], [0], [0], [1], [0, 0, 1, 1], [], []>} : vector<32x128xbf16>, vector<128x128xbf16>, vector<32x128xf32> -> vector<32x128xf32>
    %342 = arith.addf %336, %341 : vector<32x128xf32>
    %c0_180 = arith.constant 0 : index
    %c2_181 = arith.constant 2 : index
    %c0_182 = arith.constant 0 : index
    %343 = vector.load %arg12[%c0_180, %c2_181, %c0_182] : memref<2x20x128xf32, #tpu.memory_space<vmem>>, vector<2x16x128xf32>
    %344 = vector.shape_cast %343 : vector<2x16x128xf32> to vector<32x128xf32>
    %345 = arith.truncf %344 : vector<32x128xf32> to vector<32x128xbf16>
    %c0_183 = arith.constant 0 : index
    %c128_184 = arith.constant 128 : index
    %346 = vector.load %arg3[%c0_183, %c128_184] : memref<128x384xbf16, #tpu.memory_space<vmem>>, vector<128x128xbf16>
    %cst_185 = arith.constant dense<0.000000e+00> : vector<32x128xf32>
    %347 = tpu.matmul %345, %346, %cst_185 {dimension_numbers = #tpu.dot_dimension_numbers<[1], [0], [0], [1], [0, 0, 1, 1], [], []>} : vector<32x128xbf16>, vector<128x128xbf16>, vector<32x128xf32> -> vector<32x128xf32>
    %348 = arith.addf %342, %347 : vector<32x128xf32>
    %c0_186 = arith.constant 0 : index
    %c3_187 = arith.constant 3 : index
    %c0_188 = arith.constant 0 : index
    %349 = vector.load %arg12[%c0_186, %c3_187, %c0_188] : memref<2x20x128xf32, #tpu.memory_space<vmem>>, vector<2x16x128xf32>
    %350 = vector.shape_cast %349 : vector<2x16x128xf32> to vector<32x128xf32>
    %351 = arith.truncf %350 : vector<32x128xf32> to vector<32x128xbf16>
    %c0_189 = arith.constant 0 : index
    %c256 = arith.constant 256 : index
    %352 = vector.load %arg3[%c0_189, %c256] : memref<128x384xbf16, #tpu.memory_space<vmem>>, vector<128x128xbf16>
    %cst_190 = arith.constant dense<0.000000e+00> : vector<32x128xf32>
    %353 = tpu.matmul %351, %352, %cst_190 {dimension_numbers = #tpu.dot_dimension_numbers<[1], [0], [0], [1], [0, 0, 1, 1], [], []>} : vector<32x128xbf16>, vector<128x128xbf16>, vector<32x128xf32> -> vector<32x128xf32>
    %354 = arith.addf %348, %353 : vector<32x128xf32>
    %c4_191 = arith.constant 4 : index
    %355 = memref.load %arg9[%c4_191] : memref<8xf32, #tpu.memory_space<smem>>
    %356 = vector.shape_cast %354 : vector<32x128xf32> to vector<4x8x128xf32>
    %cst_192 = arith.constant dense<0.000000e+00> : vector<8x128xf32>
    %357 = vector.multi_reduction <add>, %356, %cst_192 [0] : vector<4x8x128xf32> to vector<8x128xf32>
    %c8_i32_193 = arith.constant 8 : i32
    %358 = tpu.dynamic_rotate %357 by %c8_i32_193 dim 1 : vector<8x128xf32>, i32 -> vector<8x128xf32>
    %359 = arith.addf %357, %358 : vector<8x128xf32>
    %c16_i32_194 = arith.constant 16 : i32
    %360 = tpu.dynamic_rotate %359 by %c16_i32_194 dim 1 : vector<8x128xf32>, i32 -> vector<8x128xf32>
    %361 = arith.addf %359, %360 : vector<8x128xf32>
    %c32_i32_195 = arith.constant 32 : i32
    %362 = tpu.dynamic_rotate %361 by %c32_i32_195 dim 1 : vector<8x128xf32>, i32 -> vector<8x128xf32>
    %363 = arith.addf %361, %362 : vector<8x128xf32>
    %c64_i32_196 = arith.constant 64 : i32
    %364 = tpu.dynamic_rotate %363 by %c64_i32_196 dim 1 : vector<8x128xf32>, i32 -> vector<8x128xf32>
    %365 = arith.addf %363, %364 : vector<8x128xf32>
    %cst_197 = arith.constant dense<0.000000e+00> : vector<128xf32>
    %366 = vector.multi_reduction <add>, %365, %cst_197 [0] : vector<8x128xf32> to vector<128xf32>
    %367 = vector.shape_cast %366 : vector<128xf32> to vector<1x128xf32>
    %368 = arith.mulf %356, %356 : vector<4x8x128xf32>
    %cst_198 = arith.constant dense<0.000000e+00> : vector<8x128xf32>
    %369 = vector.multi_reduction <add>, %368, %cst_198 [0] : vector<4x8x128xf32> to vector<8x128xf32>
    %c8_i32_199 = arith.constant 8 : i32
    %370 = tpu.dynamic_rotate %369 by %c8_i32_199 dim 1 : vector<8x128xf32>, i32 -> vector<8x128xf32>
    %371 = arith.addf %369, %370 : vector<8x128xf32>
    %c16_i32_200 = arith.constant 16 : i32
    %372 = tpu.dynamic_rotate %371 by %c16_i32_200 dim 1 : vector<8x128xf32>, i32 -> vector<8x128xf32>
    %373 = arith.addf %371, %372 : vector<8x128xf32>
    %c32_i32_201 = arith.constant 32 : i32
    %374 = tpu.dynamic_rotate %373 by %c32_i32_201 dim 1 : vector<8x128xf32>, i32 -> vector<8x128xf32>
    %375 = arith.addf %373, %374 : vector<8x128xf32>
    %c64_i32_202 = arith.constant 64 : i32
    %376 = tpu.dynamic_rotate %375 by %c64_i32_202 dim 1 : vector<8x128xf32>, i32 -> vector<8x128xf32>
    %377 = arith.addf %375, %376 : vector<8x128xf32>
    %cst_203 = arith.constant dense<0.000000e+00> : vector<128xf32>
    %378 = vector.multi_reduction <add>, %377, %cst_203 [0] : vector<8x128xf32> to vector<128xf32>
    %379 = vector.shape_cast %378 : vector<128xf32> to vector<1x128xf32>
    %cst_204 = arith.constant 0.001953125 : f32
    %380 = vector.broadcast %cst_204 : f32 to vector<1x128xf32>
    %381 = arith.mulf %367, %380 : vector<1x128xf32>
    %cst_205 = arith.constant 0.001953125 : f32
    %382 = vector.broadcast %cst_205 : f32 to vector<1x128xf32>
    %383 = arith.mulf %379, %382 : vector<1x128xf32>
    %384 = arith.mulf %381, %381 : vector<1x128xf32>
    %385 = arith.subf %383, %384 : vector<1x128xf32>
    %cst_206 = arith.constant 9.99999974E-6 : f32
    %386 = vector.broadcast %cst_206 : f32 to vector<1x128xf32>
    %387 = arith.addf %385, %386 : vector<1x128xf32>
    %388 = math.rsqrt %387 : vector<1x128xf32>
    %389 = vector.broadcast %381 : vector<1x128xf32> to vector<32x128xf32>
    %390 = arith.subf %354, %389 : vector<32x128xf32>
    %391 = vector.broadcast %355 : f32 to vector<1x128xf32>
    %392 = arith.mulf %391, %388 : vector<1x128xf32>
    %393 = vector.broadcast %392 : vector<1x128xf32> to vector<32x128xf32>
    %394 = arith.mulf %390, %393 : vector<32x128xf32>
    %395 = arith.addf %251, %394 : vector<32x128xf32>
    %396 = vector.shape_cast %292 : vector<32x128xf32> to vector<4x8x128xf32>
    %cst_207 = arith.constant dense<0.000000e+00> : vector<8x128xf32>
    %397 = vector.multi_reduction <add>, %396, %cst_207 [0] : vector<4x8x128xf32> to vector<8x128xf32>
    %c8_i32_208 = arith.constant 8 : i32
    %398 = tpu.dynamic_rotate %397 by %c8_i32_208 dim 1 : vector<8x128xf32>, i32 -> vector<8x128xf32>
    %399 = arith.addf %397, %398 : vector<8x128xf32>
    %c16_i32_209 = arith.constant 16 : i32
    %400 = tpu.dynamic_rotate %399 by %c16_i32_209 dim 1 : vector<8x128xf32>, i32 -> vector<8x128xf32>
    %401 = arith.addf %399, %400 : vector<8x128xf32>
    %c32_i32_210 = arith.constant 32 : i32
    %402 = tpu.dynamic_rotate %401 by %c32_i32_210 dim 1 : vector<8x128xf32>, i32 -> vector<8x128xf32>
    %403 = arith.addf %401, %402 : vector<8x128xf32>
    %c64_i32_211 = arith.constant 64 : i32
    %404 = tpu.dynamic_rotate %403 by %c64_i32_211 dim 1 : vector<8x128xf32>, i32 -> vector<8x128xf32>
    %405 = arith.addf %403, %404 : vector<8x128xf32>
    %cst_212 = arith.constant dense<0.000000e+00> : vector<128xf32>
    %406 = vector.multi_reduction <add>, %405, %cst_212 [0] : vector<8x128xf32> to vector<128xf32>
    %407 = vector.shape_cast %406 : vector<128xf32> to vector<1x128xf32>
    %408 = arith.mulf %396, %396 : vector<4x8x128xf32>
    %cst_213 = arith.constant dense<0.000000e+00> : vector<8x128xf32>
    %409 = vector.multi_reduction <add>, %408, %cst_213 [0] : vector<4x8x128xf32> to vector<8x128xf32>
    %c8_i32_214 = arith.constant 8 : i32
    %410 = tpu.dynamic_rotate %409 by %c8_i32_214 dim 1 : vector<8x128xf32>, i32 -> vector<8x128xf32>
    %411 = arith.addf %409, %410 : vector<8x128xf32>
    %c16_i32_215 = arith.constant 16 : i32
    %412 = tpu.dynamic_rotate %411 by %c16_i32_215 dim 1 : vector<8x128xf32>, i32 -> vector<8x128xf32>
    %413 = arith.addf %411, %412 : vector<8x128xf32>
    %c32_i32_216 = arith.constant 32 : i32
    %414 = tpu.dynamic_rotate %413 by %c32_i32_216 dim 1 : vector<8x128xf32>, i32 -> vector<8x128xf32>
    %415 = arith.addf %413, %414 : vector<8x128xf32>
    %c64_i32_217 = arith.constant 64 : i32
    %416 = tpu.dynamic_rotate %415 by %c64_i32_217 dim 1 : vector<8x128xf32>, i32 -> vector<8x128xf32>
    %417 = arith.addf %415, %416 : vector<8x128xf32>
    %cst_218 = arith.constant dense<0.000000e+00> : vector<128xf32>
    %418 = vector.multi_reduction <add>, %417, %cst_218 [0] : vector<8x128xf32> to vector<128xf32>
    %419 = vector.shape_cast %418 : vector<128xf32> to vector<1x128xf32>
    %cst_219 = arith.constant 0.001953125 : f32
    %420 = vector.broadcast %cst_219 : f32 to vector<1x128xf32>
    %421 = arith.mulf %407, %420 : vector<1x128xf32>
    %cst_220 = arith.constant 0.001953125 : f32
    %422 = vector.broadcast %cst_220 : f32 to vector<1x128xf32>
    %423 = arith.mulf %419, %422 : vector<1x128xf32>
    %424 = arith.mulf %421, %421 : vector<1x128xf32>
    %425 = arith.subf %423, %424 : vector<1x128xf32>
    %cst_221 = arith.constant 9.99999974E-6 : f32
    %426 = vector.broadcast %cst_221 : f32 to vector<1x128xf32>
    %427 = arith.addf %425, %426 : vector<1x128xf32>
    %428 = math.rsqrt %427 : vector<1x128xf32>
    %429 = vector.broadcast %421 : vector<1x128xf32> to vector<32x128xf32>
    %430 = arith.subf %292, %429 : vector<32x128xf32>
    %431 = vector.broadcast %428 : vector<1x128xf32> to vector<32x128xf32>
    %432 = arith.mulf %430, %431 : vector<32x128xf32>
    %cst_222 = arith.constant 0.000000e+00 : f32
    %433 = vector.broadcast %cst_222 : f32 to vector<32x128xf32>
    %434 = arith.maximumf %432, %433 : vector<32x128xf32>
    %435 = vector.shape_cast %434 : vector<32x128xf32> to vector<2x16x128xf32>
    %c0_223 = arith.constant 0 : index
    %c2_224 = arith.constant 2 : index
    %c0_225 = arith.constant 0 : index
    %436 = vector.load %arg12[%c0_223, %c2_224, %c0_225] : memref<2x20x128xf32, #tpu.memory_space<vmem>>, vector<2x16x128xf32>
    tpu.vector_store %arg12[%c0_223, %c2_224, %c0_225], %435 {strides = array<i32>} : memref<2x20x128xf32, #tpu.memory_space<vmem>>, vector<2x16x128xf32>,
    %cst_226 = arith.constant 0.000000e+00 : f32
    %437 = vector.broadcast %cst_226 : f32 to vector<32x128xf32>
    %c0_227 = arith.constant 0 : index
    %c0_228 = arith.constant 0 : index
    %c0_229 = arith.constant 0 : index
    %438 = vector.load %arg12[%c0_227, %c0_228, %c0_229] : memref<2x20x128xf32, #tpu.memory_space<vmem>>, vector<2x16x128xf32>
    %439 = vector.shape_cast %438 : vector<2x16x128xf32> to vector<32x128xf32>
    %440 = arith.truncf %439 : vector<32x128xf32> to vector<32x128xbf16>
    %c0_230 = arith.constant 0 : index
    %c0_231 = arith.constant 0 : index
    %441 = vector.load %arg4[%c0_230, %c0_231] : memref<128x640xbf16, #tpu.memory_space<vmem>>, vector<128x128xbf16>
    %cst_232 = arith.constant dense<0.000000e+00> : vector<32x128xf32>
    %442 = tpu.matmul %440, %441, %cst_232 {dimension_numbers = #tpu.dot_dimension_numbers<[1], [0], [0], [1], [0, 0, 1, 1], [], []>} : vector<32x128xbf16>, vector<128x128xbf16>, vector<32x128xf32> -> vector<32x128xf32>
    %443 = arith.addf %437, %442 : vector<32x128xf32>
    %c0_233 = arith.constant 0 : index
    %c1_234 = arith.constant 1 : index
    %c0_235 = arith.constant 0 : index
    %444 = vector.load %arg12[%c0_233, %c1_234, %c0_235] : memref<2x20x128xf32, #tpu.memory_space<vmem>>, vector<2x16x128xf32>
    %445 = vector.shape_cast %444 : vector<2x16x128xf32> to vector<32x128xf32>
    %446 = arith.truncf %445 : vector<32x128xf32> to vector<32x128xbf16>
    %c0_236 = arith.constant 0 : index
    %c128_237 = arith.constant 128 : index
    %447 = vector.load %arg4[%c0_236, %c128_237] : memref<128x640xbf16, #tpu.memory_space<vmem>>, vector<128x128xbf16>
    %cst_238 = arith.constant dense<0.000000e+00> : vector<32x128xf32>
    %448 = tpu.matmul %446, %447, %cst_238 {dimension_numbers = #tpu.dot_dimension_numbers<[1], [0], [0], [1], [0, 0, 1, 1], [], []>} : vector<32x128xbf16>, vector<128x128xbf16>, vector<32x128xf32> -> vector<32x128xf32>
    %449 = arith.addf %443, %448 : vector<32x128xf32>
    %c0_239 = arith.constant 0 : index
    %c2_240 = arith.constant 2 : index
    %c0_241 = arith.constant 0 : index
    %450 = vector.load %arg12[%c0_239, %c2_240, %c0_241] : memref<2x20x128xf32, #tpu.memory_space<vmem>>, vector<2x16x128xf32>
    %451 = vector.shape_cast %450 : vector<2x16x128xf32> to vector<32x128xf32>
    %452 = arith.truncf %451 : vector<32x128xf32> to vector<32x128xbf16>
    %c0_242 = arith.constant 0 : index
    %c256_243 = arith.constant 256 : index
    %453 = vector.load %arg4[%c0_242, %c256_243] : memref<128x640xbf16, #tpu.memory_space<vmem>>, vector<128x128xbf16>
    %cst_244 = arith.constant dense<0.000000e+00> : vector<32x128xf32>
    %454 = tpu.matmul %452, %453, %cst_244 {dimension_numbers = #tpu.dot_dimension_numbers<[1], [0], [0], [1], [0, 0, 1, 1], [], []>} : vector<32x128xbf16>, vector<128x128xbf16>, vector<32x128xf32> -> vector<32x128xf32>
    %455 = arith.addf %449, %454 : vector<32x128xf32>
    %c0_245 = arith.constant 0 : index
    %c3_246 = arith.constant 3 : index
    %c0_247 = arith.constant 0 : index
    %456 = vector.load %arg12[%c0_245, %c3_246, %c0_247] : memref<2x20x128xf32, #tpu.memory_space<vmem>>, vector<2x16x128xf32>
    %457 = vector.shape_cast %456 : vector<2x16x128xf32> to vector<32x128xf32>
    %458 = arith.truncf %457 : vector<32x128xf32> to vector<32x128xbf16>
    %c0_248 = arith.constant 0 : index
    %c384_249 = arith.constant 384 : index
    %459 = vector.load %arg4[%c0_248, %c384_249] : memref<128x640xbf16, #tpu.memory_space<vmem>>, vector<128x128xbf16>
    %cst_250 = arith.constant dense<0.000000e+00> : vector<32x128xf32>
    %460 = tpu.matmul %458, %459, %cst_250 {dimension_numbers = #tpu.dot_dimension_numbers<[1], [0], [0], [1], [0, 0, 1, 1], [], []>} : vector<32x128xbf16>, vector<128x128xbf16>, vector<32x128xf32> -> vector<32x128xf32>
    %461 = arith.addf %455, %460 : vector<32x128xf32>
    %c0_251 = arith.constant 0 : index
    %c4_252 = arith.constant 4 : index
    %c0_253 = arith.constant 0 : index
    %462 = vector.load %arg12[%c0_251, %c4_252, %c0_253] : memref<2x20x128xf32, #tpu.memory_space<vmem>>, vector<2x16x128xf32>
    %463 = vector.shape_cast %462 : vector<2x16x128xf32> to vector<32x128xf32>
    %464 = arith.truncf %463 : vector<32x128xf32> to vector<32x128xbf16>
    %c0_254 = arith.constant 0 : index
    %c512 = arith.constant 512 : index
    %465 = vector.load %arg4[%c0_254, %c512] : memref<128x640xbf16, #tpu.memory_space<vmem>>, vector<128x128xbf16>
    %cst_255 = arith.constant dense<0.000000e+00> : vector<32x128xf32>
    %466 = tpu.matmul %464, %465, %cst_255 {dimension_numbers = #tpu.dot_dimension_numbers<[1], [0], [0], [1], [0, 0, 1, 1], [], []>} : vector<32x128xbf16>, vector<128x128xbf16>, vector<32x128xf32> -> vector<32x128xf32>
    %467 = arith.addf %461, %466 : vector<32x128xf32>
    %c5_256 = arith.constant 5 : index
    %468 = memref.load %arg9[%c5_256] : memref<8xf32, #tpu.memory_space<smem>>
    %469 = vector.shape_cast %467 : vector<32x128xf32> to vector<4x8x128xf32>
    %cst_257 = arith.constant dense<0.000000e+00> : vector<8x128xf32>
    %470 = vector.multi_reduction <add>, %469, %cst_257 [0] : vector<4x8x128xf32> to vector<8x128xf32>
    %c8_i32_258 = arith.constant 8 : i32
    %471 = tpu.dynamic_rotate %470 by %c8_i32_258 dim 1 : vector<8x128xf32>, i32 -> vector<8x128xf32>
    %472 = arith.addf %470, %471 : vector<8x128xf32>
    %c16_i32_259 = arith.constant 16 : i32
    %473 = tpu.dynamic_rotate %472 by %c16_i32_259 dim 1 : vector<8x128xf32>, i32 -> vector<8x128xf32>
    %474 = arith.addf %472, %473 : vector<8x128xf32>
    %c32_i32_260 = arith.constant 32 : i32
    %475 = tpu.dynamic_rotate %474 by %c32_i32_260 dim 1 : vector<8x128xf32>, i32 -> vector<8x128xf32>
    %476 = arith.addf %474, %475 : vector<8x128xf32>
    %c64_i32_261 = arith.constant 64 : i32
    %477 = tpu.dynamic_rotate %476 by %c64_i32_261 dim 1 : vector<8x128xf32>, i32 -> vector<8x128xf32>
    %478 = arith.addf %476, %477 : vector<8x128xf32>
    %cst_262 = arith.constant dense<0.000000e+00> : vector<128xf32>
    %479 = vector.multi_reduction <add>, %478, %cst_262 [0] : vector<8x128xf32> to vector<128xf32>
    %480 = vector.shape_cast %479 : vector<128xf32> to vector<1x128xf32>
    %481 = arith.mulf %469, %469 : vector<4x8x128xf32>
    %cst_263 = arith.constant dense<0.000000e+00> : vector<8x128xf32>
    %482 = vector.multi_reduction <add>, %481, %cst_263 [0] : vector<4x8x128xf32> to vector<8x128xf32>
    %c8_i32_264 = arith.constant 8 : i32
    %483 = tpu.dynamic_rotate %482 by %c8_i32_264 dim 1 : vector<8x128xf32>, i32 -> vector<8x128xf32>
    %484 = arith.addf %482, %483 : vector<8x128xf32>
    %c16_i32_265 = arith.constant 16 : i32
    %485 = tpu.dynamic_rotate %484 by %c16_i32_265 dim 1 : vector<8x128xf32>, i32 -> vector<8x128xf32>
    %486 = arith.addf %484, %485 : vector<8x128xf32>
    %c32_i32_266 = arith.constant 32 : i32
    %487 = tpu.dynamic_rotate %486 by %c32_i32_266 dim 1 : vector<8x128xf32>, i32 -> vector<8x128xf32>
    %488 = arith.addf %486, %487 : vector<8x128xf32>
    %c64_i32_267 = arith.constant 64 : i32
    %489 = tpu.dynamic_rotate %488 by %c64_i32_267 dim 1 : vector<8x128xf32>, i32 -> vector<8x128xf32>
    %490 = arith.addf %488, %489 : vector<8x128xf32>
    %cst_268 = arith.constant dense<0.000000e+00> : vector<128xf32>
    %491 = vector.multi_reduction <add>, %490, %cst_268 [0] : vector<8x128xf32> to vector<128xf32>
    %492 = vector.shape_cast %491 : vector<128xf32> to vector<1x128xf32>
    %cst_269 = arith.constant 0.001953125 : f32
    %493 = vector.broadcast %cst_269 : f32 to vector<1x128xf32>
    %494 = arith.mulf %480, %493 : vector<1x128xf32>
    %cst_270 = arith.constant 0.001953125 : f32
    %495 = vector.broadcast %cst_270 : f32 to vector<1x128xf32>
    %496 = arith.mulf %492, %495 : vector<1x128xf32>
    %497 = arith.mulf %494, %494 : vector<1x128xf32>
    %498 = arith.subf %496, %497 : vector<1x128xf32>
    %cst_271 = arith.constant 9.99999974E-6 : f32
    %499 = vector.broadcast %cst_271 : f32 to vector<1x128xf32>
    %500 = arith.addf %498, %499 : vector<1x128xf32>
    %501 = math.rsqrt %500 : vector<1x128xf32>
    %502 = vector.broadcast %494 : vector<1x128xf32> to vector<32x128xf32>
    %503 = arith.subf %467, %502 : vector<32x128xf32>
    %504 = vector.broadcast %468 : f32 to vector<1x128xf32>
    %505 = arith.mulf %504, %501 : vector<1x128xf32>
    %506 = vector.broadcast %505 : vector<1x128xf32> to vector<32x128xf32>
    %507 = arith.mulf %503, %506 : vector<32x128xf32>
    %508 = arith.addf %395, %507 : vector<32x128xf32>
    %509 = vector.shape_cast %508 : vector<32x128xf32> to vector<2x16x128xf32>
    %c0_272 = arith.constant 0 : index
    %c0_273 = arith.constant 0 : index
    %c0_274 = arith.constant 0 : index
    %510 = vector.load %arg10[%c0_272, %c0_273, %c0_274] : memref<2x16x128xf32, #tpu.memory_space<vmem>>, vector<2x16x128xf32>
    tpu.vector_store %arg10[%c0_272, %c0_273, %c0_274], %509 {strides = array<i32>} : memref<2x16x128xf32, #tpu.memory_space<vmem>>, vector<2x16x128xf32>,
    return
  }
}

</mosaic_0001>

<bundles_post_ra>
// kernel: mixed_op_forward.1
= control target key start
LH: loop header
LB: loop body
LE: loop exit
PB: predicated region body
PF: predicated region fallthrough
CT: control target
= control target key end

     0   :  { %15 = vsyncpa [#allocation5], 0  ;;  %s5160_s0 = inlined_call_operand.vmem [shape: f32[2,16,128], index: 0, kind: input, shape index: {}]   ;;  %s5161_s1 = inlined_call_operand.vmem [shape: bf16[128,1024], index: 1, kind: input, shape index: {}]   ;;  %s5162_s2 = inlined_call_operand.hbm [shape: bf16[128,1024], index: 2, kind: input, shape index: {}]   ;;  %s5163_s3 = inlined_call_operand.hbm [shape: bf16[128,384], index: 3, kind: input, shape index: {}]   ;;  %s5164_s4 = inlined_call_operand.vmem [shape: bf16[128,640], index: 4, kind: input, shape index: {}]   ;;  %s5165_s5 = inlined_call_operand.hbm [shape: f32[2,32,128], index: 5, kind: input, shape index: {}]   ;;  %s5166_s6 = inlined_call_operand.vmem [shape: f32[2,128], index: 6, kind: input, shape index: {}]   ;;  %s5167_s7 = inlined_call_operand.vmem [shape: f32[2,128], index: 7, kind: input, shape index: {}]   ;;  %s5168_s8 = inlined_call_operand.hbm [shape: f32[32,128], index: 8, kind: input, shape index: {}]   ;;  %s5169_s9 = inlined_call_operand.hbm [shape: f32[8], index: 9, kind: input, shape index: {}]   ;;  %s5170_s10 = inlined_call_operand.vmem [shape: f32[2,16,128], index: 10, kind: output, shape index: {}]  }
   0x1   :  { %16 = vsyncpa [#allocation8], 0 }
   0x2   :  { %17 = vsyncpa [#allocation11], 0 }
   0x3   :  { %18 = vsyncpa [#allocation6], 0  ;;  %s4012_s13 = smov [#allocation7]   ;;  %s3906_s17 = scalar_lea.hbm %s5163_s3, 3072 }
   0x4   :  { %s40_s14 = sshll.u32 %s4012_s13, 4  ;;  %p3907_p0 = scmp.ne.s32.totalorder %s5163_s3, %s3906_s17  ;;  %s41_s14 = int_to_ptr.vmem [resolvable:$true] %s40_s14 }
   0x5   :  { %p3910_p1 = scmp.lt.u32.totalorder %s3906_s17, %s5163_s3 }
   0x7   :  { %p3912_p2 = pnand %p3910_p1, %p3907_p0 }
   0x9   :  { %3915 = shalt.err (!%p3912_p2)
}
   0xa   :  { %s3916_s22 = scalar_lea.vmem %s41_s14, 3072  ;;  %p3921_p4 = scmp.lt.s32.totalorder %s41_s14, %s41_s14 }
   0xb   :  { %p3917_p3 = scmp.ne.s32.totalorder %s41_s14, %s3916_s22  ;;  %p3922_p5 = scmp.lt.s32.totalorder %s3916_s22, %s3916_s22 }
   0xd   :  { %p3923_p6 = por %p3922_p5, %p3921_p4 }
   0xf   :  { %p3924_p7 = pnand %p3923_p6, %p3917_p3 }
  0x11   :  { %3927 = shalt.err (!%p3924_p7)
}
  0x12   :  { %s4013_s23 = smov 192   ;;  %s4014_s24 = smov 12  }
  0x13   :  { %46 = dma.hbm_to_vmem [thread:$0]  %s5163_s3, 3072, %s41_s14, [#allocation8], %s4013_s23, %s4013_s23, %s4014_s24  }
  0x14   :  { %s4015_s27 = smov [#allocation4]   ;;  %s3928_s11 = scalar_lea.hbm %s5162_s2, 8192 }
  0x15   :  { %s28_s28 = sshll.u32 %s4015_s27, 4  ;;  %p3929_p8 = scmp.ne.s32.totalorder %s5162_s2, %s3928_s11  ;;  %s29_s28 = int_to_ptr.vmem [resolvable:$true] %s28_s28 }
  0x16   :  { %p3932_p9 = scmp.lt.u32.totalorder %s3928_s11, %s5162_s2 }
  0x18   :  { %p3934_p10 = pnand %p3932_p9, %p3929_p8 }
  0x1a   :  { %3937 = shalt.err (!%p3934_p10)
}
  0x1b   :  { %s3938_s17 = scalar_lea.vmem %s29_s28, 8192  ;;  %p3943_p12 = scmp.lt.s32.totalorder %s29_s28, %s29_s28 }
  0x1c   :  { %p3939_p11 = scmp.ne.s32.totalorder %s29_s28, %s3938_s17  ;;  %p3944_p13 = scmp.lt.s32.totalorder %s3938_s17, %s3938_s17 }
  0x1e   :  { %p3945_p0 = por %p3944_p13, %p3943_p12 }
  0x20   :  { %p3946_p1 = pnand %p3945_p0, %p3939_p11 }
  0x22   :  { %3949 = shalt.err (!%p3946_p1)
}
  0x23   :  { %s4016_s3 = smov 512   ;;  %s4017_s14 = smov 32  }
  0x24   :  { %34 = dma.hbm_to_vmem [thread:$0]  %s5162_s2, 8192, %s29_s28, [#allocation5], %s4016_s3, %s4016_s3, %s4017_s14  }
  0x25   :  { %s4018_s20 = smov [#allocation9]   ;;  %s3950_s24 = scalar_lea.hbm %s5165_s5, 1024 }
  0x26   :  { %s54_s21 = sshll.u32 %s4018_s20, 4  ;;  %p3951_p2 = scmp.ne.s32.totalorder %s5165_s5, %s3950_s24  ;;  %s55_s21 = int_to_ptr.vmem [resolvable:$true] %s54_s21 }
  0x27   :  { %p3954_p3 = scmp.lt.u32.totalorder %s3950_s24, %s5165_s5 }
  0x29   :  { %p3956_p4 = pnand %p3954_p3, %p3951_p2 }
  0x2b   :  { %3959 = shalt.err (!%p3956_p4)
}
  0x2c   :  { %s3960_s30 = scalar_lea.vmem %s55_s21, 1024  ;;  %p3965_p6 = scmp.lt.s32.totalorder %s55_s21, %s55_s21 }
  0x2d   :  { %p3961_p5 = scmp.ne.s32.totalorder %s55_s21, %s3960_s30  ;;  %p3966_p7 = scmp.lt.s32.totalorder %s3960_s30, %s3960_s30 }
  0x2f   :  { %p3967_p8 = por %p3966_p7, %p3965_p6 }
  0x31   :  { %p3968_p9 = pnand %p3967_p8, %p3961_p5 }
  0x33   :  { %3971 = shalt.err (!%p3968_p9)
}
  0x34   :  { %s4019_s2 = smov 128   ;;  %s4020_s28 = smov 8  }
  0x35   :  { %60 = dma.hbm_to_vmem [thread:$0]  %s5165_s5, 1024, %s55_s21, [#allocation8], %s4019_s2, %s4019_s2, %s4020_s28  }
  0x36   :  { %s4021_s13 = smov [#allocation10]   ;;  %s3972_s3 = scalar_lea.hbm %s5168_s8, 512 }
  0x37   :  { %s70_s15 = sshll.u32 %s4021_s13, 4  ;;  %p3973_p10 = scmp.ne.s32.totalorder %s5168_s8, %s3972_s3  ;;  %s71_s15 = int_to_ptr.vmem [resolvable:$true] %s70_s15 }
  0x38   :  { %p3976_p11 = scmp.lt.u32.totalorder %s3972_s3, %s5168_s8 }
  0x3a   :  { %p3978_p12 = pnand %p3976_p11, %p3973_p10 }
  0x3c   :  { %3981 = shalt.err (!%p3978_p12)
}
  0x3d   :  { %s3982_s23 = scalar_lea.vmem %s71_s15, 512  ;;  %p3987_p0 = scmp.lt.s32.totalorder %s71_s15, %s71_s15 }
  0x3e   :  { %p3983_p13 = scmp.ne.s32.totalorder %s71_s15, %s3982_s23  ;;  %p3988_p1 = scmp.lt.s32.totalorder %s3982_s23, %s3982_s23 }
  0x40   :  { %p3989_p2 = por %p3988_p1, %p3987_p0 }
  0x42   :  { %p3990_p3 = pnand %p3989_p2, %p3983_p13 }
  0x44   :  { %3993 = shalt.err (!%p3990_p3)
}
  0x45   :  { %76 = dma.hbm_to_vmem [thread:$0]  %s5168_s8, 512, %s71_s15, [#allocation11], %s4019_s2, %s4019_s2, %s4020_s28  }
  0x46   :  { %s3994_s26 = scalar_lea.hbm %s5169_s9, 16 }
  0x47   :  { %p3995_p4 = scmp.ne.s32.totalorder %s5169_s9, %s3994_s26  ;;  %p3998_p5 = scmp.lt.u32.totalorder %s3994_s26, %s5169_s9 }
  0x49   :  { %p4000_p6 = pnand %p3998_p5, %p3995_p4 }
  0x4b   :  { %4003 = shalt.err (!%p4000_p6)
}
  0x4c   :  { %s4022_s12 = smov [#allocation12]  }
  0x4d   :  { %84 = dma.hbm_to_smem %s5169_s9, 16, %s4022_s12, [#allocation6]  }
  0x4e   :  { %4004 = dma.done.wait [#allocation5], 8192  }
  0x4f   :  { %4005 = vsyncadd [#allocation5], 4294959104 }
  0x50   :  { %4006 = dma.done.wait [#allocation8], 4096  }
  0x51   :  { %4007 = vsyncadd [#allocation8], 4294963200 }
  0x52   :  { %4008 = dma.done.wait [#allocation11], 512  }
  0x53   :  { %4009 = vsyncadd [#allocation11], 4294966784 }
  0x54   :  { %4010 = dma.done.wait [#allocation6], 16  }
  0x55   :  { %4011 = vsyncadd [#allocation6], 4294967280 }
  0x56   :  { %100 = sfence }
  0x57   :  { %v425_v0 = vld [vmem:[#allocation4 + $0x4] sm:$0xff]  ;;  %v4023_v6 = vmov 0   ;;  %v4024_v7 = vmov 0.0   ;;  %v844_v20 = vld [vmem:[#allocation4 + $0x14] sm:$0xff]  ;;  %s4026_s8 = smov 64   ;;  %s4027_s3 = smov 120  }
  0x58   :  { %v426_v1 = vld [vmem:[#allocation4 + $0x24] sm:$0xff]  ;;  %553 = vmatprep.mubr.bf16.mxu0 %v4023_v6  ;;  %106 = vst [vmem:[#allocation2] sm:$0xff] %v4024_v7  ;;  %107 = vst [vmem:[#allocation2 + $0x8] sm:$0xff] %v4024_v7  ;;  %972 = vmatprep.mubr.bf16.mxu1 %v4023_v6  ;;  %v845_v21 = vld [vmem:[#allocation4 + $0x34] sm:$0xff]  ;;  %s5088_s25 = sld [smem:[#allocation12 + $0x4]]  ;;  %s5100_s26 = sld [smem:[#allocation12 + $0x5]] }
  0x59   :  { %v427_v2 = vld [vmem:[#allocation4 + $0x44] sm:$0xff]  ;;  %v3231_v3 = vcombine.high %v425_v0, %v426_v1  ;;  %v3230_v4 = vcombine.low %v425_v0, %v426_v1  ;;  %108 = vst [vmem:[#allocation2 + $0x10] sm:$0xff] %v4024_v7  ;;  %109 = vst [vmem:[#allocation2 + $0x18] sm:$0xff] %v4024_v7  ;;  %v3271_v24 = vcombine.high %v844_v20, %v845_v21  ;;  %v846_v26 = vld [vmem:[#allocation4 + $0x54] sm:$0xff] }
  0x5a   :  { %v428_v5 = vld [vmem:[#allocation4 + $0x64] sm:$0xff]  ;;  %110 = vst [vmem:[#allocation2 + $0x20] sm:$0xff] %v4024_v7  ;;  %111 = vst [vmem:[#allocation2 + $0x28] sm:$0xff] %v4024_v7  ;;  %v3270_v25 = vcombine.low %v844_v20, %v845_v21  ;;  %v847_v29 = vld [vmem:[#allocation4 + $0x74] sm:$0xff] }
  0x5b   :  { %1967 = vst [vmem:[#allocation3] sm:$0xff] %v4024_v7  ;;  %1968 = vst [vmem:[#allocation3 + $0x8] sm:$0xff] %v4024_v7  ;;  %v3233_v8 = vcombine.high %v427_v2, %v428_v5  ;;  %v429_v9 = vld [vmem:[#allocation4 + $0x84] sm:$0xff]  ;;  %521 = vmatprep.subr.bf16.mxu0 %v3231_v3  ;;  %v3232_v11 = vcombine.low %v427_v2, %v428_v5  ;;  %940 = vmatprep.subr.bf16.mxu1 %v3271_v24  ;;  %v848_v31 = vld [vmem:[#allocation4 + $0x94] sm:$0xff] }
  0x5c   :  { %1969 = vst [vmem:[#allocation3 + $0x10] sm:$0xf] %v4024_v7  ;;  %1970 = vst [vmem:[#allocation3 + $0x18] sm:$0xff] %v4024_v7  ;;  %v430_v10 = vld [vmem:[#allocation4 + $0xa4] sm:$0xff]  ;;  %522 = vmatpush1.bf16.msra.mxu0 %v3230_v4  ;;  %v3273_v30 = vcombine.high %v846_v26, %v847_v29  ;;  %v849_v32 = vld [vmem:[#allocation4 + $0xb4] sm:$0xff]  ;;  %941 = vmatpush1.bf16.msra.mxu1 %v3270_v25  ;;  %v3272_v36 = vcombine.low %v846_v26, %v847_v29 }
  0x5d   :  { %1971 = vst [vmem:[#allocation3 + $0x20] sm:$0xff] %v4024_v7  ;;  %1972 = vst [vmem:[#allocation3 + $0x28] sm:$0xf] %v4024_v7  ;;  %523 = vmatprep.subr.bf16.mxu0 %v3233_v8  ;;  %v3235_v12 = vcombine.high %v429_v9, %v430_v10  ;;  %v4151_v13 = vld [vmem:[%s5160_s0] sm:$0xff]  ;;  %v4156_v14 = vld [vmem:[%s5160_s0 + $0x8] sm:$0xff]  ;;  %v3234_v19 = vcombine.low %v429_v9, %v430_v10  ;;  %v3275_v43 = vcombine.high %v848_v31, %v849_v32 }
  0x5e   :  { %v431_v15 = vld [vmem:[#allocation4 + $0xc4] sm:$0xff]  ;;  %112 = vst [vmem:[#allocation2 + $0x4] sm:$0xff] %v4151_v13  ;;  %113 = vst [vmem:[#allocation2 + $0xc] sm:$0xff] %v4156_v14  ;;  %v389_v17 = vmax.f32 %v4151_v13, 0.0  ;;  %v390_v18 = vmax.f32 %v4156_v14, 0.0  ;;  %v4167_v37 = vld [vmem:[%s5160_s0 + $0x10] sm:$0xff]  ;;  %942 = vmatprep.subr.bf16.mxu1 %v3273_v30  ;;  %v3274_v51 = vcombine.low %v848_v31, %v849_v32 }
  0x5f   :  { %v432_v16 = vld [vmem:[#allocation4 + $0xe4] sm:$0xff]  ;;  %v4172_v38 = vld [vmem:[%s5160_s0 + $0x18] sm:$0xff]  ;;  %114 = vst [vmem:[#allocation2 + $0x1c] sm:$0xff] %v4167_v37  ;;  %v391_v44 = vmax.f32 %v4167_v37, 0.0  ;;  %v403_v10 = vld [vmem:[#allocation4] sm:$0xf] }
  0x60   :  { %524 = vmatpush1.bf16.msra.mxu0 %v3232_v11  ;;  %v4162_v22 = vpack.c.bf16 %v390_v18, %v389_v17  ;;  %v3237_v23 = vcombine.high %v431_v15, %v432_v16  ;;  %v433_v27 = vld [vmem:[#allocation4 + $0x104] sm:$0xff]  ;;  %v3236_v33 = vcombine.low %v431_v15, %v432_v16  ;;  %115 = vst [vmem:[#allocation2 + $0x24] sm:$0xff] %v4172_v38  ;;  %v392_v45 = vmax.f32 %v4172_v38, 0.0  ;;  %v850_v47 = vld [vmem:[#allocation4 + $0xd4] sm:$0xff]  ;;  %v405_v24 = vld [vmem:[#allocation4 + $0x40] sm:$0xf] }
  0x61   :  { %525 = vmatprep.subr.bf16.mxu0 %v3235_v12  ;;  %v434_v28 = vld [vmem:[#allocation4 + $0x124] sm:$0xff]  ;;  %v851_v48 = vld [vmem:[#allocation4 + $0xf4] sm:$0xff]  ;;  %943 = vmatpush1.bf16.msra.mxu1 %v3272_v36  ;;  %v404_v12 = vld [vmem:[#allocation4 + $0x20] sm:$0xf] }
  0x62   :  { %v435_v34 = vld [vmem:[#allocation4 + $0x144] sm:$0xff]  ;;  %v3239_v39 = vcombine.high %v433_v27, %v434_v28  ;;  %v4186_v49 = vpack.c.bf16 %v392_v45, %v391_v44  ;;  %v3238_v50 = vcombine.low %v433_v27, %v434_v28  ;;  %944 = vmatprep.subr.bf16.mxu1 %v3275_v43  ;;  %v3277_v54 = vcombine.high %v850_v47, %v851_v48  ;;  %v852_v56 = vld [vmem:[#allocation4 + $0x114] sm:$0xff]  ;;  %v406_v25 = vld [vmem:[#allocation4 + $0x60] sm:$0xf] }
  0x63   :  { %v436_v35 = vld [vmem:[#allocation4 + $0x164] sm:$0xff]  ;;  %v853_v57 = vld [vmem:[#allocation4 + $0x134] sm:$0xff]  ;;  %v3276_v62 = vcombine.low %v850_v47, %v851_v48  ;;  %v3246_v21 = vcombine.low %v403_v10, %v404_v12  ;;  %v3247_v29 = vcombine.low %v405_v24, %v406_v25  ;;  %v407_v31 = vld [vmem:[#allocation4 + $0x80] sm:$0xf] }
  0x64   :  { %526 = vmatpush1.bf16.msra.mxu0 %v3234_v19  ;;  %v3241_v52 = vcombine.high %v435_v34, %v436_v35  ;;  %v437_v53 = vld [vmem:[#allocation4 + $0x184] sm:$0xff]  ;;  %v3240_v58 = vcombine.low %v435_v34, %v436_v35  ;;  %v3279_v2 = vcombine.high %v852_v56, %v853_v57  ;;  %v854_v4 = vld [vmem:[#allocation4 + $0x154] sm:$0xff]  ;;  %v3278_v8 = vcombine.low %v852_v56, %v853_v57  ;;  %v408_v32 = vld [vmem:[#allocation4 + $0xa0] sm:$0xf] }
  0x65   :  { %527 = vmatprep.subr.bf16.mxu0 %v3237_v23  ;;  %v4174_v40 = vld [vmem:[#allocation2 + $0x3] sm:$0xff]  ;;  %v4176_v41 = vld [vmem:[#allocation2 + $0xb] sm:$0xff]  ;;  %945 = vmatpush1.bf16.msra.mxu1 %v3274_v51  ;;  %v855_v5 = vld [vmem:[#allocation4 + $0x174] sm:$0xff]  ;;  %v3248_v43 = vcombine.low %v407_v31, %v408_v32 }
  0x66   :  { %v4178_v42 = vld [vmem:[#allocation2 + $0x5] sm:$0xff]  ;;  %v4184_v46 = vld [vmem:[#allocation2 + $0xd] sm:$0xff]  ;;  %v4188_v59 = vld [vmem:[#allocation2 + $0x1b] sm:$0xff]  ;;  %946 = vmatprep.subr.bf16.mxu1 %v3277_v54  ;;  %v3281_v11 = vcombine.high %v854_v4, %v855_v5  ;;  %v3280_v20 = vcombine.low %v854_v4, %v855_v5 }
  0x67   :  { %393 = vst [vmem:[#allocation2 + $0x4] sm:$0xff] %v389_v17  ;;  %394 = vst [vmem:[#allocation2 + $0xc] sm:$0xff] %v390_v18  ;;  %v438_v55 = vld [vmem:[#allocation4 + $0x1a4] sm:$0xff]  ;;  %v856_v15 = vld [vmem:[#allocation4 + $0x194] sm:$0xff] }
  0x68   :  { %528 = vmatpush1.bf16.msra.mxu0 %v3236_v33  ;;  %v4190_v60 = vld [vmem:[#allocation2 + $0x23] sm:$0xff]  ;;  %v3243_v63 = vcombine.high %v437_v53, %v438_v55  ;;  %v3242_v7 = vcombine.low %v437_v53, %v438_v55  ;;  %v857_v16 = vld [vmem:[#allocation4 + $0x1b4] sm:$0xff] }
  0x69   :  { %529 = vmatprep.subr.bf16.mxu0 %v3239_v39  ;;  %v4192_v61 = vld [vmem:[#allocation2 + $0x1d] sm:$0xff]  ;;  %v4194_v1 = vld [vmem:[#allocation2 + $0x25] sm:$0xff]  ;;  %947 = vmatpush1.bf16.msra.mxu1 %v3276_v62  ;;  %v3283_v23 = vcombine.high %v856_v15, %v857_v16  ;;  %v858_v27 = vld [vmem:[#allocation4 + $0x1d4] sm:$0xff]  ;;  %v3282_v30 = vcombine.low %v856_v15, %v857_v16 }
  0x6a   :  { %v439_v0 = vld [vmem:[#allocation4 + $0x1c4] sm:$0xff]  ;;  %395 = vst [vmem:[#allocation2 + $0x1c] sm:$0xff] %v391_v44  ;;  %396 = vst [vmem:[#allocation2 + $0x24] sm:$0xff] %v392_v45  ;;  %948 = vmatprep.subr.bf16.mxu1 %v3279_v2  ;;  %v859_v28 = vld [vmem:[#allocation4 + $0x1f4] sm:$0xff] }
  0x6b   :  { %v440_v3 = vld [vmem:[#allocation4 + $0x1e4] sm:$0xff]  ;;  %v3285_v33 = vcombine.high %v858_v27, %v859_v28  ;;  %v409_v44 = vld [vmem:[#allocation4 + $0xc0] sm:$0xf]  ;;  %v3284_v48 = vcombine.low %v858_v27, %v859_v28 }
  0x6c   :  { %530 = vmatpush1.bf16.msra.mxu0 %v3238_v50  ;;  %v3245_v9 = vcombine.high %v439_v0, %v440_v3  ;;  %v3244_v17 = vcombine.low %v439_v0, %v440_v3  ;;  %v1280_v34 = vld [vmem:[%s5161_s1 + $0x4] sm:$0xff]  ;;  %v410_v50 = vld [vmem:[#allocation4 + $0xe0] sm:$0xf] }
  0x6d   :  { %531 = vmatprep.subr.bf16.mxu0 %v3241_v52  ;;  %949 = vmatpush1.bf16.msra.mxu1 %v3278_v8  ;;  %v1281_v35 = vld [vmem:[%s5161_s1 + $0x24] sm:$0xff]  ;;  %v412_v0 = vld [vmem:[#allocation4 + $0x120] sm:$0xf] }
  0x6e   :  { %v419_v18 = vld [vmem:[#allocation2 + $0x2] sm:$0xff]  ;;  %v420_v19 = vld [vmem:[#allocation2 + $0xa] sm:$0xff]  ;;  %950 = vmatprep.subr.bf16.mxu1 %v3281_v11  ;;  %v3297_v51 = vcombine.high %v1280_v34, %v1281_v35  ;;  %v3296_v2 = vcombine.low %v1280_v34, %v1281_v35 }
  0x6f   :  { %v4196_v26 = vpack.c.bf16 %v420_v19, %v419_v18  ;;  %v397_v45 = vld [vmem:[#allocation2] sm:$0xff]  ;;  %v4206_v47 = vld [vmem:[#allocation2 + $0x8] sm:$0xff] }
  0x70   :  { %532 = vmatpush1.bf16.msra.mxu0 %v3240_v58  ;;  %v838_v52 = vld [vmem:[#allocation2 + $0x6] sm:$0xff]  ;;  %v839_v53 = vld [vmem:[#allocation2 + $0xe] sm:$0xff]  ;;  %v401_v55 = vpack.c.bf16 %v4206_v47, %v397_v45  ;;  %v3249_v58 = vcombine.low %v409_v44, %v410_v50  ;;  %v413_v8 = vld [vmem:[#allocation4 + $0x140] sm:$0xf] }
  0x71   :  { %533 = vmatprep.subr.bf16.mxu0 %v3243_v63  ;;  %951 = vmatpush1.bf16.msra.mxu1 %v3280_v20  ;;  %v421_v36 = vld [vmem:[#allocation2 + $0x1a] sm:$0xff]  ;;  %v422_v39 = vld [vmem:[#allocation2 + $0x22] sm:$0xff]  ;;  %v4217_v62 = vpack.c.bf16 %v839_v53, %v838_v52  ;;  %v683_v53 = vld [vmem:[#allocation4 + $0x4c] sm:$0xff] }
  0x72   :  { %952 = vmatprep.subr.bf16.mxu1 %v3283_v23  ;;  %v4208_v54 = vpack.c.bf16 %v422_v39, %v421_v36  ;;  %v1282_v56 = vld [vmem:[%s5161_s1 + $0x44] sm:$0xff]  ;;  %v411_v63 = vld [vmem:[#allocation4 + $0x100] sm:$0xf]  ;;  %v681_v36 = vld [vmem:[#allocation4 + $0xc] sm:$0xff] }
  0x73   :  { %v1283_v57 = vld [vmem:[%s5161_s1 + $0x64] sm:$0xff]  ;;  %v415_v20 = vld [vmem:[#allocation4 + $0x180] sm:$0xf]  ;;  %v682_v39 = vld [vmem:[#allocation4 + $0x2c] sm:$0xff] }
  0x74   :  { %534 = vmatpush1.bf16.msra.mxu0 %v3242_v7  ;;  %v3299_v3 = vcombine.high %v1282_v56, %v1283_v57  ;;  %v1284_v4 = vld [vmem:[%s5161_s1 + $0x84] sm:$0xff]  ;;  %v3250_v7 = vcombine.low %v411_v63, %v412_v0  ;;  %v3298_v10 = vcombine.low %v1282_v56, %v1283_v57  ;;  %v399_v44 = vld [vmem:[#allocation2 + $0x18] sm:$0xff]  ;;  %v3255_v52 = vcombine.high %v681_v36, %v682_v39  ;;  %v685_v0 = vld [vmem:[#allocation4 + $0x8c] sm:$0xff] }
  0x75   :  { %535 = vmatprep.subr.bf16.mxu0 %v3245_v9  ;;  %953 = vmatpush1.bf16.msra.mxu1 %v3282_v30  ;;  %v1285_v5 = vld [vmem:[%s5161_s1 + $0xa4] sm:$0xff]  ;;  %v414_v9 = vld [vmem:[#allocation4 + $0x160] sm:$0xf]  ;;  %v3254_v63 = vcombine.low %v681_v36, %v682_v39  ;;  %v691_v36 = vld [vmem:[#allocation4 + $0x14c] sm:$0xff] }
  0x76   :  { %954 = vmatprep.subr.bf16.mxu1 %v3285_v33  ;;  %v840_v11 = vld [vmem:[#allocation2 + $0x1e] sm:$0xff]  ;;  %v841_v12 = vld [vmem:[#allocation2 + $0x26] sm:$0xff]  ;;  %v3301_v15 = vcombine.high %v1284_v4, %v1285_v5  ;;  %v3251_v18 = vcombine.low %v413_v8, %v414_v9  ;;  %v3300_v23 = vcombine.low %v1284_v4, %v1285_v5 }
  0x77   :  { %v1286_v16 = vld [vmem:[%s5161_s1 + $0xc4] sm:$0xff]  ;;  %v4234_v19 = vpack.c.bf16 %v841_v12, %v840_v11  ;;  %v418_v30 = vld [vmem:[#allocation4 + $0x1e0] sm:$0xf]  ;;  %v1530_v8 = vld [vmem:[%s5161_s1 + $0xc] sm:$0xff] }
  0x78   :  { %536 = vmatpush1.bf16.msra.mxu0 %v3244_v17  ;;  %v1287_v17 = vld [vmem:[%s5161_s1 + $0xe4] sm:$0xff]  ;;  %v1531_v9 = vld [vmem:[%s5161_s1 + $0x2c] sm:$0xff] }
  0x79   :  { %3546 = vmatprep.subr.bf16.mxu0 %v3246_v21  ;;  %955 = vmatpush1.bf16.msra.mxu1 %v3284_v48  ;;  %v3303_v24 = vcombine.high %v1286_v16, %v1287_v17  ;;  %v1288_v25 = vld [vmem:[%s5161_s1 + $0x104] sm:$0xff]  ;;  %v3302_v31 = vcombine.low %v1286_v16, %v1287_v17  ;;  %v687_v12 = vld [vmem:[#allocation4 + $0xcc] sm:$0xff] }
  0x7a   :  { %1376 = vmatprep.subr.bf16.mxu1 %v3297_v51  ;;  %v1289_v27 = vld [vmem:[%s5161_s1 + $0x124] sm:$0xff]  ;;  %v692_v39 = vld [vmem:[#allocation4 + $0x16c] sm:$0xff] }
  0x7b   :  { %554 = vmatmul.mubr.bf16.vlgmr.msra.gmra.mrb[0].mxu0 %v4196_v26  ;;  %v3305_v32 = vcombine.high %v1288_v25, %v1289_v27  ;;  %v1290_v33 = vld [vmem:[%s5161_s1 + $0x144] sm:$0xff] }
  0x7c   :  { %3547 = vmatpush3.bf16.msra.mxu0 %v3246_v21  ;;  %563 = vmatprep.mubr.bf16.mxu0 %v4023_v6  ;;  %v416_v21 = vld [vmem:[#allocation4 + $0x1a0] sm:$0xf]  ;;  %v1291_v34 = vld [vmem:[%s5161_s1 + $0x164] sm:$0xff] }
  0x7d   :  { %3548 = vmatprep.subr.bf16.mxu0 %v3247_v29  ;;  %973 = vmatmul.mubr.bf16.vlgmr.msra.gmra.mrb[0].mxu1 %v4217_v62  ;;  %v3252_v28 = vcombine.low %v415_v20, %v416_v21  ;;  %v3307_v45 = vcombine.high %v1290_v33, %v1291_v34  ;;  %v4250_v48 = vld [vmem:[#allocation2 + $0x20] sm:$0xff]  ;;  %v3306_v56 = vcombine.low %v1290_v33, %v1291_v34  ;;  %v1275_v17 = vld [vmem:[#allocation2 + $0xb] sm:$0xff] }
  0x7e   :  { %1377 = vmatpush1.bf16.msra.mxu1 %v3296_v2  ;;  %982 = vmatprep.mubr.bf16.mxu1 %v4023_v6  ;;  %v1292_v50 = vld [vmem:[%s5161_s1 + $0x184] sm:$0xff]  ;;  %v402_v57 = vpack.c.bf16 %v4250_v48, %v399_v44  ;;  %v686_v2 = vld [vmem:[#allocation4 + $0xac] sm:$0xff] }
  0x7f   :  { %1378 = vmatprep.subr.bf16.mxu1 %v3299_v3  ;;  %v1293_v51 = vld [vmem:[%s5161_s1 + $0x1a4] sm:$0xff]  ;;  %v1532_v21 = vld [vmem:[%s5161_s1 + $0x4c] sm:$0xff] }
  0x80   :  { %3549 = vmatpush3.bf16.msra.mxu0 %v3247_v29  ;;  %v417_v29 = vld [vmem:[#allocation4 + $0x1c0] sm:$0xf]  ;;  %v1294_v3 = vld [vmem:[%s5161_s1 + $0x1c4] sm:$0xff]  ;;  %v1535_v33 = vld [vmem:[%s5161_s1 + $0xac] sm:$0xff] }
  0x81   :  { %3550 = vmatprep.subr.bf16.mxu0 %v3248_v43  ;;  %v3253_v35 = vcombine.low %v417_v29, %v418_v30  ;;  %v1295_v4 = vld [vmem:[%s5161_s1 + $0x1e4] sm:$0xff] }
  0x82   :  { %1379 = vmatpush1.bf16.msra.mxu1 %v3298_v10  ;;  %v3311_v10 = vcombine.high %v1294_v3, %v1295_v4  ;;  %v1274_v16 = vld [vmem:[#allocation2 + $0x3] sm:$0xff]  ;;  %v3310_v20 = vcombine.low %v1294_v3, %v1295_v4  ;;  %v1539_v3 = vld [vmem:[%s5161_s1 + $0x12c] sm:$0xff] }
  0x83   :  { %564 = vmatmul.mubr.bf16.gmra.mrb[4].mxu0 %v4208_v54  ;;  %1380 = vmatprep.subr.bf16.mxu1 %v3301_v15  ;;  %v688_v15 = vld [vmem:[#allocation4 + $0xec] sm:$0xff]  ;;  %v1278_v30 = vpack.c.bf16 %v1275_v17, %v1274_v16  ;;  %v1277_v44 = vld [vmem:[#allocation2 + $0x23] sm:$0xff]  ;;  %v1007_v17 = vld [vmem:[#allocation4 + $0x1c] sm:$0xf] }
  0x84   :  { %3551 = vmatpush3.bf16.msra.mxu0 %v3248_v43  ;;  %3562 = vmatprep.mubr.bf16.mxu0 %v401_v55  ;;  %v3304_v43 = vcombine.low %v1288_v25, %v1289_v27  ;;  %v684_v55 = vld [vmem:[#allocation4 + $0x6c] sm:$0xff]  ;;  %v3258_v25 = vcombine.low %v685_v0, %v686_v2  ;;  %v3261_v29 = vcombine.high %v687_v12, %v688_v15 }
  0x85   :  { %3552 = vmatprep.subr.bf16.mxu0 %v3249_v58  ;;  %983 = vmatmul.mubr.bf16.gmra.mrb[4].mxu1 %v4234_v19  ;;  %v3257_v5 = vcombine.high %v683_v53, %v684_v55  ;;  %v3256_v11 = vcombine.low %v683_v53, %v684_v55  ;;  %v689_v27 = vld [vmem:[#allocation4 + $0x10c] sm:$0xff] }
  0x86   :  { %1381 = vmatpush1.bf16.msra.mxu1 %v3300_v23  ;;  %1408 = vmatprep.mubr.bf16.mxu1 %v4023_v6  ;;  %v1533_v23 = vld [vmem:[%s5161_s1 + $0x6c] sm:$0xff] }
  0x87   :  { %1382 = vmatprep.subr.bf16.mxu1 %v3303_v24  ;;  %v3321_v24 = vcombine.high %v1530_v8, %v1531_v9  ;;  %v3323_v34 = vcombine.high %v1532_v21, %v1533_v23 }
  0x88   :  { %3553 = vmatpush3.bf16.msra.mxu0 %v3249_v58  ;;  %v3309_v58 = vcombine.high %v1292_v50, %v1293_v51 }
  0x89   :  { %3554 = vmatprep.subr.bf16.mxu0 %v3250_v7 }
  0x8a   :  { %1383 = vmatpush1.bf16.msra.mxu1 %v3302_v31  ;;  %v3320_v31 = vcombine.low %v1530_v8, %v1531_v9  ;;  %v696_v8 = vld [vmem:[#allocation4 + $0x1ec] sm:$0xff] }
  0x8b   :  { %1384 = vmatprep.subr.bf16.mxu1 %v3305_v32  ;;  %v1534_v32 = vld [vmem:[%s5161_s1 + $0x8c] sm:$0xff] }
  0x8c   :  { %3555 = vmatpush3.bf16.msra.mxu0 %v3250_v7  ;;  %v3308_v7 = vcombine.low %v1292_v50, %v1293_v51  ;;  %v3322_v50 = vcombine.low %v1532_v21, %v1533_v23  ;;  %v1536_v51 = vld [vmem:[%s5161_s1 + $0xcc] sm:$0xff]  ;;  %v3325_v53 = vcombine.high %v1534_v32, %v1535_v33 }
  0x8d   :  { %3556 = vmatprep.subr.bf16.mxu0 %v3251_v18  ;;  %v1542_v23 = vld [vmem:[%s5161_s1 + $0x18c] sm:$0xff] }
  0x8e   :  { %1385 = vmatpush1.bf16.msra.mxu1 %v3304_v43  ;;  %v1276_v43 = vld [vmem:[#allocation2 + $0x1b] sm:$0xff] }
  0x8f   :  { %1386 = vmatprep.subr.bf16.mxu1 %v3307_v45 }
  0x90   :  { %3557 = vmatpush3.bf16.msra.mxu0 %v3251_v18  ;;  %v3259_v18 = vcombine.high %v685_v0, %v686_v2  ;;  %v3324_v0 = vcombine.low %v1534_v32, %v1535_v33  ;;  %v1538_v2 = vld [vmem:[%s5161_s1 + $0x10c] sm:$0xff] }
  0x91   :  { %3558 = vmatprep.subr.bf16.mxu0 %v3252_v28  ;;  %v3328_v21 = vcombine.low %v1538_v2, %v1539_v3  ;;  %v1544_v32 = vld [vmem:[%s5161_s1 + $0x1cc] sm:$0xff] }
  0x92   :  { %1387 = vmatpush1.bf16.msra.mxu1 %v3306_v56  ;;  %v693_v56 = vld [vmem:[#allocation4 + $0x18c] sm:$0xff] }
  0x93   :  { %1388 = vmatprep.subr.bf16.mxu1 %v3309_v58  ;;  %v3265_v58 = vcombine.high %v691_v36, %v692_v39  ;;  %v1545_v33 = vld [vmem:[%s5161_s1 + $0x1ec] sm:$0xff] }
  0x94   :  { %3559 = vmatpush3.bf16.msra.mxu0 %v3252_v28  ;;  %v690_v28 = vld [vmem:[#allocation4 + $0x12c] sm:$0xff] }
  0x95   :  { %3560 = vmatprep.subr.bf16.mxu0 %v3253_v35  ;;  %v3263_v45 = vcombine.high %v689_v27, %v690_v28  ;;  %v3262_v55 = vcombine.low %v689_v27, %v690_v28  ;;  %v1009_v28 = vld [vmem:[#allocation4 + $0x5c] sm:$0xf] }
  0x96   :  { %1389 = vmatpush1.bf16.msra.mxu1 %v3308_v7  ;;  %v695_v7 = vld [vmem:[#allocation4 + $0x1cc] sm:$0xff] }
  0x97   :  { %1390 = vmatprep.subr.bf16.mxu1 %v3311_v10  ;;  %v3268_v27 = vcombine.low %v695_v7, %v696_v8 }
  0x98   :  { %3561 = vmatpush3.bf16.msra.mxu0 %v3253_v35  ;;  %v3260_v35 = vcombine.low %v687_v12, %v688_v15  ;;  %v1541_v12 = vld [vmem:[%s5161_s1 + $0x16c] sm:$0xff]  ;;  %v3329_v15 = vcombine.high %v1538_v2, %v1539_v3  ;;  %v1016_v2 = vld [vmem:[#allocation4 + $0x13c] sm:$0xf] }
  0x99   :  { %777 = vmatprep.subr.bf16.mxu0 %v3255_v52  ;;  %v1537_v52 = vld [vmem:[%s5161_s1 + $0xec] sm:$0xff] }
  0x9a   :  { %1391 = vmatpush1.bf16.msra.mxu1 %v3310_v20  ;;  %v3327_v4 = vcombine.high %v1536_v51, %v1537_v52  ;;  %v3326_v10 = vcombine.low %v1536_v51, %v1537_v52  ;;  %v3269_v20 = vcombine.high %v695_v7, %v696_v8  ;;  %v3335_v51 = vcombine.high %v1544_v32, %v1545_v33  ;;  %v1013_v52 = vld [vmem:[#allocation4 + $0xdc] sm:$0xf] }
  0x9b   :  { %3563 = vmatmul.mubr.bf16.vlgmr.msra.gmra.mrb[8].mxu0 %v402_v57  ;;  %1626 = vmatprep.subr.bf16.mxu1 %v3321_v24  ;;  %v694_v57 = vld [vmem:[#allocation4 + $0x1ac] sm:$0xff]  ;;  %v1854_v7 = vld [vmem:[%s5161_s1 + $0x9c] sm:$0xf] }
  0x9c   :  { %778 = vmatpush1.bf16.msra.mxu0 %v3254_v63  ;;  %809 = vmatprep.mubr.bf16.mxu0 %v4023_v6  ;;  %v1279_v63 = vpack.c.bf16 %v1277_v44, %v1276_v43  ;;  %v3267_v9 = vcombine.high %v693_v56, %v694_v57  ;;  %v3266_v16 = vcombine.low %v693_v56, %v694_v57  ;;  %v1543_v24 = vld [vmem:[%s5161_s1 + $0x1ac] sm:$0xff]  ;;  %v1850_v44 = vld [vmem:[%s5161_s1 + $0x1c] sm:$0xf] }
  0x9d   :  { %779 = vmatprep.subr.bf16.mxu0 %v3257_v5  ;;  %1409 = vmatmul.mubr.bf16.vlgmr.msra.gmra.mrb[8].mxu1 %v1278_v30  ;;  %v3264_v5 = vcombine.low %v691_v36, %v692_v39  ;;  %v1012_v36 = vld [vmem:[#allocation4 + $0xbc] sm:$0xf]  ;;  %v3332_v43 = vcombine.low %v1542_v23, %v1543_v24  ;;  %v3334_v56 = vcombine.low %v1544_v32, %v1545_v33  ;;  %v1004_v32 = vld [vmem:[#allocation2 + $0x28] sm:$0xff] }
  0x9e   :  { %1627 = vmatpush1.bf16.msra.mxu1 %v3320_v31  ;;  %1418 = vmatprep.mubr.bf16.mxu1 %v4023_v6  ;;  %v1852_v57 = vld [vmem:[%s5161_s1 + $0x5c] sm:$0xf] }
  0x9f   :  { %1628 = vmatprep.subr.bf16.mxu1 %v3323_v34  ;;  %v3333_v34 = vcombine.high %v1542_v23, %v1543_v24  ;;  %v1855_v8 = vld [vmem:[%s5161_s1 + $0xbc] sm:$0xf] }
  0xa0   :  { %780 = vmatpush1.bf16.msra.mxu0 %v3256_v11  ;;  %v1540_v11 = vld [vmem:[%s5161_s1 + $0x14c] sm:$0xff]  ;;  %v1021_v24 = vld [vmem:[#allocation4 + $0x1dc] sm:$0xf] }
  0xa1   :  { %781 = vmatprep.subr.bf16.mxu0 %v3259_v18  ;;  %v1008_v18 = vld [vmem:[#allocation4 + $0x3c] sm:$0xf]  ;;  %v3330_v31 = vcombine.low %v1540_v11, %v1541_v12 }
  0xa2   :  { %1629 = vmatpush1.bf16.msra.mxu1 %v3322_v50  ;;  %v3286_v30 = vcombine.low %v1007_v17, %v1008_v18  ;;  %v1002_v50 = vld [vmem:[#allocation2 + $0x10] sm:$0xff]  ;;  %v1019_v17 = vld [vmem:[#allocation4 + $0x19c] sm:$0xf] }
  0xa3   :  { %1630 = vmatprep.subr.bf16.mxu1 %v3325_v53  ;;  %v1014_v53 = vld [vmem:[#allocation4 + $0xfc] sm:$0xf]  ;;  %v1005_v3 = vpack.c.bf16 %v1002_v50, %v4206_v47 }
  0xa4   :  { %782 = vmatpush1.bf16.msra.mxu0 %v3258_v25  ;;  %v3331_v25 = vcombine.high %v1540_v11, %v1541_v12  ;;  %v1017_v47 = vld [vmem:[#allocation4 + $0x15c] sm:$0xf]  ;;  %v3354_v11 = vcombine.low %v1854_v7, %v1855_v8  ;;  %v1271_v7 = vld [vmem:[%s5161_s1 + $0x1a0] sm:$0xf] }
  0xa5   :  { %783 = vmatprep.subr.bf16.mxu0 %v3261_v29  ;;  %1419 = vmatmul.mubr.bf16.gmra.mrb[12].mxu1 %v1279_v63  ;;  %v1010_v29 = vld [vmem:[#allocation4 + $0x7c] sm:$0xf]  ;;  %v1272_v8 = vld [vmem:[%s5161_s1 + $0x1c0] sm:$0xf] }
  0xa6   :  { %1631 = vmatpush1.bf16.msra.mxu1 %v3324_v0  ;;  %1658 = vmatprep.mubr.bf16.mxu1 %v4023_v6  ;;  %v3287_v39 = vcombine.low %v1009_v28, %v1010_v29  ;;  %v1015_v0 = vld [vmem:[#allocation4 + $0x11c] sm:$0xf] }
  0xa7   :  { %1632 = vmatprep.subr.bf16.mxu1 %v3327_v4  ;;  %v3289_v4 = vcombine.low %v1013_v52, %v1014_v53  ;;  %v1856_v12 = vld [vmem:[%s5161_s1 + $0xdc] sm:$0xf]  ;;  %v1262_v52 = vld [vmem:[%s5161_s1 + $0x80] sm:$0xf] }
  0xa8   :  { %784 = vmatpush1.bf16.msra.mxu0 %v3260_v35  ;;  %v1011_v35 = vld [vmem:[#allocation4 + $0x9c] sm:$0xf] }
  0xa9   :  { %785 = vmatprep.subr.bf16.mxu0 %v3263_v45  ;;  %v1851_v45 = vld [vmem:[%s5161_s1 + $0x3c] sm:$0xf] }
  0xaa   :  { %1633 = vmatpush1.bf16.msra.mxu1 %v3326_v10  ;;  %v3352_v63 = vcombine.low %v1850_v44, %v1851_v45  ;;  %v1018_v10 = vld [vmem:[#allocation4 + $0x17c] sm:$0xf] }
  0xab   :  { %1634 = vmatprep.subr.bf16.mxu1 %v3329_v15  ;;  %v1857_v15 = vld [vmem:[%s5161_s1 + $0xfc] sm:$0xf] }
  0xac   :  { %786 = vmatpush1.bf16.msra.mxu0 %v3262_v55  ;;  %v3288_v55 = vcombine.low %v1011_v35, %v1012_v36  ;;  %v3355_v18 = vcombine.low %v1856_v12, %v1857_v15  ;;  %v1860_v28 = vld [vmem:[%s5161_s1 + $0x15c] sm:$0xf]  ;;  %v1260_v36 = vld [vmem:[%s5161_s1 + $0x40] sm:$0xf]  ;;  %v1695_v15 = vld [vmem:[%s5161_s1 + $0x54] sm:$0xff] }
  0xad   :  { %787 = vmatprep.subr.bf16.mxu0 %v3265_v58  ;;  %v1853_v58 = vld [vmem:[%s5161_s1 + $0x7c] sm:$0xf] }
  0xae   :  { %1635 = vmatpush1.bf16.msra.mxu1 %v3328_v21  ;;  %v1859_v21 = vld [vmem:[%s5161_s1 + $0x13c] sm:$0xf] }
  0xaf   :  { %1636 = vmatprep.subr.bf16.mxu1 %v3331_v25  ;;  %v1022_v25 = vld [vmem:[#allocation4 + $0x1fc] sm:$0xf] }
  0xb0   :  { %788 = vmatpush1.bf16.msra.mxu0 %v3264_v5  ;;  %v3353_v5 = vcombine.low %v1852_v57, %v1853_v58  ;;  %v1861_v29 = vld [vmem:[%s5161_s1 + $0x17c] sm:$0xf]  ;;  %v1265_v57 = vld [vmem:[%s5161_s1 + $0xe0] sm:$0xf] }
  0xb1   :  { %789 = vmatprep.subr.bf16.mxu0 %v3267_v9  ;;  %v3290_v9 = vcombine.low %v1015_v0, %v1016_v2  ;;  %v1862_v33 = vld [vmem:[%s5161_s1 + $0x19c] sm:$0xf]  ;;  %v1268_v2 = vld [vmem:[%s5161_s1 + $0x140] sm:$0xf] }
  0xb2   :  { %1637 = vmatpush1.bf16.msra.mxu1 %v3330_v31  ;;  %v3357_v31 = vcombine.low %v1860_v28, %v1861_v29  ;;  %v1864_v45 = vld [vmem:[%s5161_s1 + $0x1dc] sm:$0xf]  ;;  %v1702_v29 = vld [vmem:[%s5161_s1 + $0x134] sm:$0xff] }
  0xb3   :  { %1638 = vmatprep.subr.bf16.mxu1 %v3333_v34  ;;  %v1863_v34 = vld [vmem:[%s5161_s1 + $0x1bc] sm:$0xf] }
  0xb4   :  { %790 = vmatpush1.bf16.msra.mxu0 %v3266_v16  ;;  %v3291_v16 = vcombine.low %v1017_v47, %v1018_v10  ;;  %v3358_v44 = vcombine.low %v1862_v33, %v1863_v34  ;;  %v1865_v50 = vld [vmem:[%s5161_s1 + $0x1fc] sm:$0xf]  ;;  %v1693_v10 = vld [vmem:[%s5161_s1 + $0x14] sm:$0xff] }
  0xb5   :  { %791 = vmatprep.subr.bf16.mxu0 %v3269_v20  ;;  %v1858_v20 = vld [vmem:[%s5161_s1 + $0x11c] sm:$0xf]  ;;  %v3359_v53 = vcombine.low %v1864_v45, %v1865_v50  ;;  %v1705_v34 = vld [vmem:[%s5161_s1 + $0x194] sm:$0xff] }
  0xb6   :  { %1639 = vmatpush1.bf16.msra.mxu1 %v3332_v43  ;;  %v1006_v43 = vpack.c.bf16 %v1004_v32, %v4250_v48  ;;  %v1263_v48 = vld [vmem:[%s5161_s1 + $0xa0] sm:$0xf] }
  0xb7   :  { %1640 = vmatprep.subr.bf16.mxu1 %v3335_v51 }
  0xb8   :  { %792 = vmatpush1.bf16.msra.mxu0 %v3268_v27  ;;  %v3356_v27 = vcombine.low %v1858_v20, %v1859_v21  ;;  %v1698_v20 = vld [vmem:[%s5161_s1 + $0xb4] sm:$0xff] }
  0xb9   :  { %3566 = vmatprep.subr.bf16.mxu0 %v3286_v30 }
  0xba   :  { %1641 = vmatpush1.bf16.msra.mxu1 %v3334_v56  ;;  %v1264_v56 = vld [vmem:[%s5161_s1 + $0xc0] sm:$0xf] }
  0xbb   :  { %810 = vmatmul.mubr.bf16.vlgmr.msra.gmra.mrb[12].mxu0 %v4162_v22  ;;  %3606 = vmatprep.subr.bf16.mxu1 %v3352_v63  ;;  %v3315_v58 = vcombine.low %v1264_v56, %v1265_v57  ;;  %v1690_v56 = vld [vmem:[#allocation2 + $0x25] sm:$0xff] }
  0xbc   :  { %3567 = vmatpush3.bf16.msra.mxu0 %v3286_v30  ;;  %819 = vmatprep.mubr.bf16.mxu0 %v4023_v6  ;;  %v3293_v30 = vcombine.low %v1021_v24, %v1022_v25  ;;  %v1699_v24 = vld [vmem:[%s5161_s1 + $0xd4] sm:$0xff] }
  0xbd   :  { %3568 = vmatprep.subr.bf16.mxu0 %v3287_v39  ;;  %1659 = vmatmul.mubr.bf16.vlgmr.msra.gmra.mrb[16].mxu1 %v4162_v22  ;;  %v1020_v22 = vld [vmem:[#allocation4 + $0x1bc] sm:$0xf]  ;;  %v1700_v25 = vld [vmem:[%s5161_s1 + $0xf4] sm:$0xff] }
  0xbe   :  { %1668 = vmatprep.mubr.bf16.mxu1 %v4023_v6  ;;  %3607 = vmatpush3.bf16.msra.mxu1 %v3352_v63  ;;  %v3292_v23 = vcombine.low %v1019_v17, %v1020_v22  ;;  %v1266_v63 = vld [vmem:[%s5161_s1 + $0x100] sm:$0xf]  ;;  %v3343_v28 = vcombine.high %v1699_v24, %v1700_v25 }
  0xbf   :  { %3608 = vmatprep.subr.bf16.mxu1 %v3353_v5 }
  0xc0   :  { %3569 = vmatpush3.bf16.msra.mxu0 %v3287_v39  ;;  %v1261_v39 = vld [vmem:[%s5161_s1 + $0x60] sm:$0xf] }
  0xc1   :  { %3570 = vmatprep.subr.bf16.mxu0 %v3288_v55  ;;  %v3313_v51 = vcombine.low %v1260_v36, %v1261_v39 }
  0xc2   :  { %3609 = vmatpush3.bf16.msra.mxu1 %v3353_v5  ;;  %v1270_v5 = vld [vmem:[%s5161_s1 + $0x180] sm:$0xf] }
  0xc3   :  { %820 = vmatmul.mubr.bf16.gmra.mrb[16].mxu0 %v4186_v49  ;;  %3610 = vmatprep.subr.bf16.mxu1 %v3354_v11 }
  0xc4   :  { %3571 = vmatpush3.bf16.msra.mxu0 %v3288_v55  ;;  %3582 = vmatprep.mubr.bf16.mxu0 %v1005_v3  ;;  %v3314_v55 = vcombine.low %v1262_v52, %v1263_v48  ;;  %v1269_v3 = vld [vmem:[%s5161_s1 + $0x160] sm:$0xf]  ;;  %v1687_v52 = vld [vmem:[#allocation2 + $0x5] sm:$0xff]  ;;  %v1688_v48 = vld [vmem:[#allocation2 + $0xd] sm:$0xff] }
  0xc5   :  { %3572 = vmatprep.subr.bf16.mxu0 %v3289_v4  ;;  %1669 = vmatmul.mubr.bf16.gmra.mrb[20].mxu1 %v4186_v49  ;;  %v1258_v49 = vld [vmem:[%s5161_s1] sm:$0xf] }
  0xc6   :  { %3611 = vmatpush3.bf16.msra.mxu1 %v3354_v11  ;;  %3622 = vmatprep.mubr.bf16.mxu1 %v4217_v62  ;;  %v1259_v62 = vld [vmem:[%s5161_s1 + $0x20] sm:$0xf]  ;;  %v1694_v11 = vld [vmem:[%s5161_s1 + $0x34] sm:$0xff] }
  0xc7   :  { %3612 = vmatprep.subr.bf16.mxu1 %v3355_v18  ;;  %v3312_v35 = vcombine.low %v1258_v49, %v1259_v62  ;;  %v3337_v12 = vcombine.high %v1693_v10, %v1694_v11  ;;  %v3336_v17 = vcombine.low %v1693_v10, %v1694_v11  ;;  %v1703_v62 = vld [vmem:[%s5161_s1 + $0x154] sm:$0xff] }
  0xc8   :  { %3573 = vmatpush3.bf16.msra.mxu0 %v3289_v4  ;;  %v3317_v4 = vcombine.low %v1268_v2, %v1269_v3 }
  0xc9   :  { %3574 = vmatprep.subr.bf16.mxu0 %v3290_v9 }
  0xca   :  { %3613 = vmatpush3.bf16.msra.mxu1 %v3355_v18  ;;  %v1697_v18 = vld [vmem:[%s5161_s1 + $0x94] sm:$0xff] }
  0xcb   :  { %3614 = vmatprep.subr.bf16.mxu1 %v3356_v27 }
  0xcc   :  { %3575 = vmatpush3.bf16.msra.mxu0 %v3290_v9  ;;  %v1273_v9 = vld [vmem:[%s5161_s1 + $0x1e0] sm:$0xf] }
  0xcd   :  { %3576 = vmatprep.subr.bf16.mxu0 %v3291_v16  ;;  %v3319_v47 = vcombine.low %v1272_v8, %v1273_v9 }
  0xce   :  { %3615 = vmatpush3.bf16.msra.mxu1 %v3356_v27  ;;  %v3340_v27 = vcombine.low %v1697_v18, %v1698_v20 }
  0xcf   :  { %3616 = vmatprep.subr.bf16.mxu1 %v3357_v31 }
  0xd0   :  { %3577 = vmatpush3.bf16.msra.mxu0 %v3291_v16  ;;  %v1696_v16 = vld [vmem:[%s5161_s1 + $0x74] sm:$0xff] }
  0xd1   :  { %3578 = vmatprep.subr.bf16.mxu0 %v3292_v23  ;;  %v3339_v22 = vcombine.high %v1695_v15, %v1696_v16  ;;  %v3338_v21 = vcombine.low %v1695_v15, %v1696_v16 }
  0xd2   :  { %3617 = vmatpush3.bf16.msra.mxu1 %v3357_v31  ;;  %v1704_v31 = vld [vmem:[%s5161_s1 + $0x174] sm:$0xff] }
  0xd3   :  { %3618 = vmatprep.subr.bf16.mxu1 %v3358_v44  ;;  %v3347_v33 = vcombine.high %v1703_v62, %v1704_v31  ;;  %v3346_v36 = vcombine.low %v1703_v62, %v1704_v31 }
  0xd4   :  { %3579 = vmatpush3.bf16.msra.mxu0 %v3292_v23  ;;  %v3341_v23 = vcombine.high %v1697_v18, %v1698_v20 }
  0xd5   :  { %3580 = vmatprep.subr.bf16.mxu0 %v3293_v30 }
  0xd6   :  { %3619 = vmatpush3.bf16.msra.mxu1 %v3358_v44  ;;  %v1708_v44 = vld [vmem:[%s5161_s1 + $0x1f4] sm:$0xff] }
  0xd7   :  { %3620 = vmatprep.subr.bf16.mxu1 %v3359_v53 }
  0xd8   :  { %3581 = vmatpush3.bf16.msra.mxu0 %v3293_v30  ;;  %v3342_v30 = vcombine.low %v1699_v24, %v1700_v25 }
  0xd9   :  { %3586 = vmatprep.subr.bf16.mxu0 %v3312_v35 }
  0xda   :  { %3621 = vmatpush3.bf16.msra.mxu1 %v3359_v53  ;;  %v1691_v53 = vpack.c.bf16 %v1688_v48, %v1687_v52 }
  0xdb   :  { %3583 = vmatmul.mubr.bf16.vlgmr.msra.gmra.mrb[20].mxu0 %v1006_v43  ;;  %v1707_v43 = vld [vmem:[%s5161_s1 + $0x1d4] sm:$0xff] }
  0xdc   :  { %3587 = vmatpush3.bf16.msra.mxu0 %v3312_v35  ;;  %3602 = vmatprep.mubr.bf16.mxu0 %v4196_v26  ;;  %v1267_v26 = vld [vmem:[%s5161_s1 + $0x120] sm:$0xf]  ;;  %v1706_v35 = vld [vmem:[%s5161_s1 + $0x1b4] sm:$0xff]  ;;  %v3351_v50 = vcombine.high %v1707_v43, %v1708_v44 }
  0xdd   :  { %3588 = vmatprep.subr.bf16.mxu0 %v3313_v51  ;;  %v3316_v0 = vcombine.low %v1266_v63, %v1267_v26  ;;  %3623 = vmatmul.mubr.bf16.vlgmr.msra.gmra.mrb[24].mxu1 %v4234_v19  ;;  %v3318_v19 = vcombine.low %v1270_v5, %v1271_v7  ;;  %v3349_v39 = vcombine.high %v1705_v34, %v1706_v35 }
  0xde   :  { %v3348_v45 = vcombine.low %v1705_v34, %v1706_v35 }
  0xe0   :  { %3589 = vmatpush3.bf16.msra.mxu0 %v3313_v51  ;;  %v3350_v51 = vcombine.low %v1707_v43, %v1708_v44 }
  0xe1   :  { %3590 = vmatprep.subr.bf16.mxu0 %v3314_v55 }
  0xe4   :  { %3591 = vmatpush3.bf16.msra.mxu0 %v3314_v55  ;;  %v1689_v55 = vld [vmem:[#allocation2 + $0x1d] sm:$0xff] }
  0xe5   :  { %3592 = vmatprep.subr.bf16.mxu0 %v3315_v58  ;;  %v1692_v57 = vpack.c.bf16 %v1690_v56, %v1689_v55 }
  0xe8   :  { %3593 = vmatpush3.bf16.msra.mxu0 %v3315_v58 }
  0xe9   :  { %3594 = vmatprep.subr.bf16.mxu0 %v3316_v0 }
  0xec   :  { %3595 = vmatpush3.bf16.msra.mxu0 %v3316_v0 }
  0xed   :  { %3596 = vmatprep.subr.bf16.mxu0 %v3317_v4 }
  0xf0   :  { %3597 = vmatpush3.bf16.msra.mxu0 %v3317_v4 }
  0xf1   :  { %3598 = vmatprep.subr.bf16.mxu0 %v3318_v19 }
  0xf4   :  { %3599 = vmatpush3.bf16.msra.mxu0 %v3318_v19 }
  0xf5   :  { %3600 = vmatprep.subr.bf16.mxu0 %v3319_v47 }
  0xf8   :  { %3601 = vmatpush3.bf16.msra.mxu0 %v3319_v47 }
  0xf9   :  { %1789 = vmatprep.subr.bf16.mxu0 %v3337_v12 }
  0xfb   :  { %3603 = vmatmul.mubr.bf16.vlgmr.msra.gmra.mrb[24].mxu0 %v4208_v54  ;;  %v1701_v54 = vld [vmem:[%s5161_s1 + $0x114] sm:$0xff]  ;;  %s4025_s1 = smov 16  }
  0xfc   :  { %1790 = vmatpush1.bf16.msra.mxu0 %v3336_v17  ;;  %1821 = vmatprep.mubr.bf16.mxu0 %v4023_v6  ;;  %v3345_v49 = vcombine.high %v1701_v54, %v1702_v29  ;;  %v3344_v32 = vcombine.low %v1701_v54, %v1702_v29 }
  0xfd   :  { %1791 = vmatprep.subr.bf16.mxu0 %v3339_v22 }
 0x100   :  { %1792 = vmatpush1.bf16.msra.mxu0 %v3338_v21 }
 0x101   :  { %1793 = vmatprep.subr.bf16.mxu0 %v3341_v23 }
 0x104   :  { %1794 = vmatpush1.bf16.msra.mxu0 %v3340_v27 }
 0x105   :  { %1795 = vmatprep.subr.bf16.mxu0 %v3343_v28 }
 0x108   :  { %1796 = vmatpush1.bf16.msra.mxu0 %v3342_v30 }
 0x109   :  { %1797 = vmatprep.subr.bf16.mxu0 %v3345_v49 }
 0x10c   :  { %1798 = vmatpush1.bf16.msra.mxu0 %v3344_v32 }
 0x10d   :  { %1799 = vmatprep.subr.bf16.mxu0 %v3347_v33 }
 0x110   :  { %1800 = vmatpush1.bf16.msra.mxu0 %v3346_v36 }
 0x111   :  { %1801 = vmatprep.subr.bf16.mxu0 %v3349_v39 }
 0x114   :  { %1802 = vmatpush1.bf16.msra.mxu0 %v3348_v45 }
 0x115   :  { %1803 = vmatprep.subr.bf16.mxu0 %v3351_v50 }
 0x118   :  { %1804 = vmatpush1.bf16.msra.mxu0 %v3350_v51 }
 0x11b   :  { %1822 = vmatmul.mubr.bf16.vlgmr.msra.gmra.mrb[28].mxu0 %v1691_v53 }
 0x11c   :  { %1831 = vmatprep.mubr.bf16.mxu0 %v4023_v6 }
 0x123   :  { %1832 = vmatmul.mubr.bf16.gmra.mrb[32].mxu0 %v1692_v57 }
 0x14e   :  { %v555_v58 = vpop.f32.mrb[0].mxu0 }
 0x14f   :  { %v557_v63 = vpop.f32.mrb[1].mxu0 }
 0x150   :  { %v559_v26 = vpop.f32.mrb[2].mxu0  ;;  %v974_v5 = vpop.f32.mrb[0].mxu1 }
 0x151   :  { %v561_v0 = vpop.f32.mrb[3].mxu0  ;;  %v976_v19 = vpop.f32.mrb[1].mxu1 }
 0x152   :  { %v978_v8 = vpop.f32.mrb[2].mxu1 }
 0x153   :  { %v980_v9 = vpop.f32.mrb[3].mxu1 }
 0x156   :  { %v565_v2 = vpop.f32.mrb[4].mxu0 }
 0x157   :  { %v567_v3 = vpop.f32.mrb[5].mxu0 }
 0x158   :  { %v569_v4 = vpop.f32.mrb[6].mxu0  ;;  %v984_v47 = vpop.f32.mrb[4].mxu1 }
 0x159   :  { %v571_v7 = vpop.f32.mrb[7].mxu0  ;;  %v986_v10 = vpop.f32.mrb[5].mxu1 }
 0x15a   :  { %v988_v11 = vpop.f32.mrb[6].mxu1 }
 0x15b   :  { %v990_v6 = vpop.f32.mrb[7].mxu1 }
 0x16e   :  { %v3564_v12 = vpop.f32.mrb[8].mxu0 }
 0x16f   :  { %v669_v15 = vadd.f32 %v3564_v12, %v567_v3  ;;  %v660_v16 = vpop.f32.mrb[9].mxu0 }
 0x170   :  { %v661_v17 = vadd.f32 %v660_v16, %v557_v63  ;;  %v3565_v22 = vpop.f32.mrb[10].mxu0  ;;  %v1410_v23 = vpop.f32.mrb[8].mxu1 }
 0x171   :  { %v672_v18 = vadd.f32 %v3565_v22, %v571_v7  ;;  %v663_v20 = vpop.f32.mrb[11].mxu0  ;;  %v1412_v24 = vpop.f32.mrb[9].mxu1 }
 0x172   :  { %v664_v21 = vadd.f32 %v663_v20, %v561_v0  ;;  %v1414_v25 = vpop.f32.mrb[10].mxu1 }
 0x173   :  { %v1416_v27 = vpop.f32.mrb[11].mxu1 }
 0x178   :  { %v1420_v28 = vpop.f32.mrb[12].mxu1 }
 0x179   :  { %v1422_v54 = vpop.f32.mrb[13].mxu1 }
 0x17a   :  { %v1424_v29 = vpop.f32.mrb[14].mxu1 }
 0x17b   :  { %v1426_v30 = vpop.f32.mrb[15].mxu1 }
 0x18e   :  { %v811_v49 = vpop.f32.mrb[12].mxu0 }
 0x18f   :  { %v830_v62 = vadd.f32 %v811_v49, %v555_v58  ;;  %v813_v31 = vpop.f32.mrb[13].mxu0 }
 0x190   :  { %v834_v32 = vadd.f32 %v813_v31, %v661_v17  ;;  %v815_v33 = vpop.f32.mrb[14].mxu0  ;;  %v1660_v55 = vpop.f32.mrb[16].mxu1 }
 0x191   :  { %v831_v34 = vadd.f32 %v815_v33, %v559_v26  ;;  %v4474_v35 = vadd.f32 %v974_v5, %v830_v62  ;;  %v817_v36 = vpop.f32.mrb[15].mxu0  ;;  %v1679_v63 = vadd.f32 %v1660_v55, %v1410_v23  ;;  %v1662_v26 = vpop.f32.mrb[17].mxu1 }
 0x192   :  { %v835_v39 = vadd.f32 %v817_v36, %v664_v21  ;;  %v997_v43 = vadd.f32 %v976_v19, %v834_v32  ;;  %v1664_v5 = vpop.f32.mrb[18].mxu1 }
 0x193   :  { %v4476_v44 = vadd.f32 %v978_v8, %v831_v34  ;;  %v1680_v19 = vadd.f32 %v1664_v5, %v1414_v25  ;;  %v1666_v8 = vpop.f32.mrb[19].mxu1 }
 0x194   :  { %v998_v45 = vadd.f32 %v980_v9, %v835_v39 }
 0x196   :  { %v821_v50 = vpop.f32.mrb[16].mxu0 }
 0x197   :  { %v832_v51 = vadd.f32 %v821_v50, %v565_v2  ;;  %v823_v52 = vpop.f32.mrb[17].mxu0 }
 0x198   :  { %v836_v48 = vadd.f32 %v823_v52, %v669_v15  ;;  %v825_v53 = vpop.f32.mrb[18].mxu0  ;;  %v1670_v12 = vpop.f32.mrb[20].mxu1 }
 0x199   :  { %v833_v56 = vadd.f32 %v825_v53, %v569_v4  ;;  %v4478_v57 = vadd.f32 %v984_v47, %v832_v51  ;;  %v827_v58 = vpop.f32.mrb[19].mxu0  ;;  %v1681_v2 = vadd.f32 %v1670_v12, %v1420_v28  ;;  %v1672_v16 = vpop.f32.mrb[21].mxu1 }
 0x19a   :  { %v837_v0 = vadd.f32 %v827_v58, %v672_v18  ;;  %v999_v3 = vadd.f32 %v986_v10, %v836_v48  ;;  %v1674_v15 = vpop.f32.mrb[22].mxu1 }
 0x19b   :  { %v4480_v7 = vadd.f32 %v988_v11, %v833_v56  ;;  %v1682_v17 = vadd.f32 %v1674_v15, %v1424_v29  ;;  %v1676_v22 = vpop.f32.mrb[23].mxu1 }
 0x19c   :  { %v1000_v9 = vadd.f32 %v990_v6, %v837_v0 }
 0x1ae   :  { %v3584_v4 = vpop.f32.mrb[20].mxu0 }
 0x1af   :  { %v4482_v47 = vadd.f32 %v3584_v4, %v999_v3  ;;  %v1105_v20 = vpop.f32.mrb[21].mxu0 }
 0x1b0   :  { %v4484_v21 = vadd.f32 %v1105_v20, %v997_v43  ;;  %v3585_v18 = vpop.f32.mrb[22].mxu0  ;;  %v3624_v25 = vpop.f32.mrb[24].mxu1 }
 0x1b1   :  { %v4486_v10 = vadd.f32 %v3585_v18, %v1000_v9  ;;  %v1108_v11 = vpop.f32.mrb[23].mxu0  ;;  %v1948_v6 = vpop.f32.mrb[25].mxu1 }
 0x1b2   :  { %v4488_v23 = vadd.f32 %v1108_v11, %v998_v45  ;;  %v3625_v49 = vpop.f32.mrb[26].mxu1 }
 0x1b3   :  { %v1951_v28 = vpop.f32.mrb[27].mxu1 }
 0x1ce   :  { %v3604_v62 = vpop.f32.mrb[24].mxu0 }
 0x1cf   :  { %v1524_v31 = vadd.f32 %v3604_v62, %v1422_v54  ;;  %v1515_v29 = vpop.f32.mrb[25].mxu0 }
 0x1d0   :  { %v1516_v32 = vadd.f32 %v1515_v29, %v1412_v24  ;;  %v3605_v33 = vpop.f32.mrb[26].mxu0 }
 0x1d1   :  { %v1527_v34 = vadd.f32 %v3605_v33, %v1426_v30  ;;  %v1685_v36 = vadd.f32 %v1672_v16, %v1524_v31  ;;  %v1518_v39 = vpop.f32.mrb[27].mxu0 }
 0x1d2   :  { %v1519_v43 = vadd.f32 %v1518_v39, %v1416_v27  ;;  %v1683_v50 = vadd.f32 %v1662_v26, %v1516_v32 }
 0x1d3   :  { %v1686_v51 = vadd.f32 %v1676_v22, %v1527_v34 }
 0x1d4   :  { %v1684_v52 = vadd.f32 %v1666_v8, %v1519_v43 }
 0x1ee   :  { %v1823_v48 = vpop.f32.mrb[28].mxu0 }
 0x1ef   :  { %v4490_v53 = vadd.f32 %v1823_v48, %v1679_v63  ;;  %v1825_v45 = vpop.f32.mrb[29].mxu0 }
 0x1f0   :  { %v1846_v55 = vadd.f32 %v1825_v45, %v1683_v50  ;;  %v1827_v56 = vpop.f32.mrb[30].mxu0 }
 0x1f1   :  { %v4492_v58 = vadd.f32 %v1827_v56, %v1680_v19  ;;  %v1829_v0 = vpop.f32.mrb[31].mxu0  ;;  %v1994_v26 = vmul.f32 %v4490_v53, %v4490_v53 }
 0x1f2   :  { %v1847_v54 = vadd.f32 %v1829_v0, %v1684_v52  ;;  %v4494_v3 = vadd.f32 %v1948_v6, %v1846_v55 }
 0x1f3   :  { %v1995_v27 = vmul.f32 %v4492_v58, %v4492_v58  ;;  %v1973_v63 = vadd.f32 %v4492_v58, %v4490_v53 }
 0x1f4   :  { %v4496_v24 = vadd.f32 %v1951_v28, %v1847_v54  ;;  %v2490_v18 = vmul.f32 %v4494_v3, %v4494_v3 }
 0x1f5   :  { %v1998_v20 = vadd.f32 %v1995_v27, %v1994_v26 }
 0x1f6   :  { %v1833_v30 = vpop.f32.mrb[32].mxu0  ;;  %v2491_v8 = vmul.f32 %v4496_v24, %v4496_v24 }
 0x1f7   :  { %v4504_v5 = vadd.f32 %v1833_v30, %v1681_v2  ;;  %v1835_v19 = vpop.f32.mrb[33].mxu0  ;;  %v2469_v2 = vadd.f32 %v4496_v24, %v4494_v3 }
 0x1f8   :  { %v1848_v9 = vadd.f32 %v1835_v19, %v1685_v36  ;;  %v1837_v12 = vpop.f32.mrb[34].mxu0  ;;  %v2494_v33 = vadd.f32 %v2491_v8, %v2490_v18 }
 0x1f9   :  { %v1996_v16 = vmul.f32 %v4504_v5, %v4504_v5  ;;  %v4510_v15 = vadd.f32 %v1837_v12, %v1682_v17  ;;  %v1839_v22 = vpop.f32.mrb[35].mxu0  ;;  %v1974_v4 = vadd.f32 %v1973_v63, %v4504_v5 }
 0x1fa   :  { %v4517_v11 = vadd.f32 %v3624_v25, %v1848_v9  ;;  %v1849_v6 = vadd.f32 %v1839_v22, %v1686_v51  ;;  %v3826_v9 = vld [vmem:[#allocation7 + $0x4] ss:$12 sps:$4 sm:$0xff]   ;;  %v124_v22 = vadd.f32 %v4174_v40, %v4151_v13 }
 0x1fb   :  { %v1975_v28 = vadd.f32 %v1974_v4, %v4510_v15  ;;  %v1997_v62 = vmul.f32 %v4510_v15, %v4510_v15  ;;  %v1999_v17 = vadd.f32 %v1998_v20, %v1996_v16  ;;  %3626 = vmatprep.subr.bf16.mxu0 %v3826_v9  ;;  %v132_v4 = vld [vmem:[#allocation9] sm:$0xff]  ;;  %v3827_v20 = vld [vmem:[#allocation7 + $0x1c] ss:$12 sps:$4 sm:$0xff]  }
 0x1fc   :  { %v4522_v31 = vadd.f32 %v3625_v49, %v1849_v6  ;;  %v2470_v29 = vadd.f32 %v2469_v2, %v4517_v11  ;;  %v2492_v32 = vmul.f32 %v4517_v11, %v4517_v11  ;;  %3627 = vmatpush3.bf16.msra.mxu0 %v3826_v9  ;;  %v133_v6 = vld [vmem:[#allocation9 + $0x8] sm:$0xff] }
 0x1fd   :  { %1976 = vrot.lane.b32.xlu0 %v1975_v28, %s4020_s28  ;;  %v2000_v39 = vadd.f32 %v1999_v17, %v1997_v62  ;;  %3628 = vmatprep.subr.bf16.mxu0 %v3827_v20  ;;  %v125_v17 = vadd.f32 %v4176_v41, %v4156_v14 }
 0x1fe   :  { %v2471_v25 = vadd.f32 %v2470_v29, %v4522_v31  ;;  %v2493_v34 = vmul.f32 %v4522_v31, %v4522_v31  ;;  %v2495_v36 = vadd.f32 %v2494_v33, %v2492_v32  ;;  %v126_v29 = vadd.f32 %v4188_v59, %v4167_v37 }
 0x1ff   :  { %v136_v32 = vadd.f32 %v132_v4, %v4174_v40  ;;  %v4562_v33 = vadd.f32 %v124_v22, %v4178_v42  ;;  %v4568_v40 = vadd.f32 %v125_v17, %v4184_v46  ;;  %v3833_v22 = vld [vmem:[%s5164_s4 + $0x54] ss:$20 sps:$4 sm:$0xff]  }
 0x200   :  { %2472 = vrot.lane.b32.xlu1 %v2471_v25, %s4020_s28  ;;  %v2496_v49 = vadd.f32 %v2495_v36, %v2493_v34  ;;  %3629 = vmatpush3.bf16.msra.mxu0 %v3827_v20  ;;  %v3828_v34 = vld [vmem:[#allocation7 + $0x34] ss:$12 sps:$4 sm:$0xff]   ;;  %v148_v20 = vld [vmem:[#allocation9 + $0x38] sm:$0xff] }
 0x201   :  { %2001 = vrot.lane.b32.xlu0 %v2000_v39, %s4020_s28  ;;  %3630 = vmatprep.subr.bf16.mxu0 %v3828_v34  ;;  %v3836_v4 = vld [vmem:[#allocation7 + $0x94] ss:$12 sps:$4 sm:$0xff]  }
 0x204   :  { %2497 = vrot.lane.b32.xlu1 %v2496_v49, %s4020_s28  ;;  %3631 = vmatpush3.bf16.msra.mxu0 %v3828_v34  ;;  %v3843_v34 = vld [vmem:[%s5164_s4 + $0x11c] ss:$20 sps:$4 sm:$0xff]  }
 0x26f   :  { %v1977_v43 = vpop.permute.xlu0 %1976 }
 0x270   :  { %v1978_v50 = vadd.f32 %v1977_v43, %v1975_v28 }
 0x272   :  { %1979 = vrot.lane.b32.xlu0 %v1978_v50, %s4025_s1  ;;  %v2473_v51 = vpop.permute.xlu1 %2472 }
 0x273   :  { %v2474_v52 = vadd.f32 %v2473_v51, %v2471_v25  ;;  %v2002_v48 = vpop.permute.xlu0 %2001  ;;  %v137_v25 = vadd.f32 %v133_v6, %v4176_v41  ;;  %v140_v51 = vmax.f32 %v136_v32, %v4151_v13  ;;  %v3838_v6 = vld [vmem:[#allocation7 + $0xac] ss:$12 sps:$4 sm:$0xff]  }
 0x274   :  { %v2003_v45 = vadd.f32 %v2002_v48, %v2000_v39  ;;  %v145_v39 = vld [vmem:[#allocation9 + $0x20] sm:$0xff] }
 0x275   :  { %v149_v41 = vadd.f32 %v145_v39, %v4178_v42  ;;  %v3839_v32 = vld [vmem:[%s5164_s4 + $0xcc] ss:$20 sps:$4 sm:$0xff]  }
 0x276   :  { %2004 = vrot.lane.b32.xlu1 %v2003_v45, %s4025_s1  ;;  %2475 = vrot.lane.b32.xlu0 %v2474_v52, %s4025_s1  ;;  %v2498_v55 = vpop.permute.xlu1 %2497 }
 0x277   :  { %v2499_v56 = vadd.f32 %v2498_v55, %v2496_v49  ;;  %v146_v49 = vld [vmem:[#allocation9 + $0x28] sm:$0xff]  ;;  %v134_v55 = vld [vmem:[#allocation9 + $0x10] sm:$0xff] }
 0x278   :  { %v150_v48 = vadd.f32 %v146_v49, %v4184_v46  ;;  %v138_v42 = vadd.f32 %v134_v55, %v4188_v59  ;;  %v3829_v46 = vld [vmem:[%s5164_s4 + $0x4] ss:$20 sps:$4 sm:$0xff]  }
 0x279   :  { %3686 = vmatprep.subr.bf16.mxu1 %v3829_v46 }
 0x27a   :  { %2500 = vrot.lane.b32.xlu1 %v2499_v56, %s4025_s1  ;;  %3687 = vmatpush3.bf16.msra.mxu1 %v3829_v46  ;;  %v142_v59 = vmax.f32 %v138_v42, %v4167_v37 }
 0x2e4   :  { %v1980_v0 = vpop.permute.xlu0 %1979 }
 0x2e5   :  { %v1981_v54 = vadd.f32 %v1980_v0, %v1978_v50  ;;  %v4571_v50 = vadd.f32 %v126_v29, %v4192_v61  ;;  %v4635_v29 = vld [vmem:[#allocation7] ss:$12 sps:$4 sm:$0xff]  }
 0x2e7   :  { %1982 = vrot.lane.b32.xlu0 %v1981_v54, %s4017_s14 }
 0x2e8   :  { %v2476_v27 = vpop.permute.xlu0 %2475  ;;  %v2005_v30 = vpop.permute.xlu1 %2004 }
 0x2e9   :  { %v2477_v26 = vadd.f32 %v2476_v27, %v2474_v52  ;;  %v2006_v63 = vadd.f32 %v2005_v30, %v2003_v45  ;;  %v141_v52 = vmax.f32 %v137_v25, %v4156_v14  ;;  %v3830_v45 = vld [vmem:[#allocation7 + $0x4c] ss:$12 sps:$4 sm:$0xff]   ;;  %v147_v27 = vld [vmem:[#allocation9 + $0x30] sm:$0xff]  ;;  %v127_v30 = vadd.f32 %v4190_v60, %v4172_v38 }
 0x2ea   :  { %3632 = vmatprep.subr.bf16.mxu0 %v3830_v45  ;;  %v3841_v25 = vld [vmem:[%s5164_s4 + $0xf4] ss:$20 sps:$4 sm:$0xff]  }
 0x2eb   :  { %2478 = vrot.lane.b32.xlu0 %v2477_v26, %s4017_s14  ;;  %2007 = vrot.lane.b32.xlu1 %v2006_v63, %s4017_s14  ;;  %v4587_v0 = vmax.f32 %v141_v52, %v150_v48  ;;  %v4609_v9 = vadd.f32 %v127_v30, %v4194_v1 }
 0x2ec   :  { %v2501_v19 = vpop.permute.xlu1 %2500  ;;  %3633 = vmatpush3.bf16.msra.mxu0 %v3830_v45 }
 0x2ed   :  { %v2502_v8 = vadd.f32 %v2501_v19, %v2499_v56  ;;  %v4585_v56 = vmax.f32 %v140_v51, %v149_v41  ;;  %v3834_v19 = vld [vmem:[#allocation7 + $0x7c] ss:$12 sps:$4 sm:$0xff]  }
 0x2ef   :  { %2503 = vrot.lane.b32.xlu1 %v2502_v8, %s4017_s14 }
 0x359   :  { %v1983_v12 = vpop.permute.xlu0 %1982 }
 0x35a   :  { %v4542_v16 = vadd.f32 %v1983_v12, %v1981_v54  ;;  %v3832_v54 = vld [vmem:[#allocation7 + $0x64] ss:$12 sps:$4 sm:$0xff]  }
 0x35b   :  { %3634 = vmatprep.subr.bf16.mxu0 %v3832_v54 }
 0x35c   :  { %1985 = vrot.lane.b32.xlu0 %v4542_v16, %s4026_s8  ;;  %3635 = vmatpush3.bf16.msra.mxu0 %v3832_v54 }
 0x35d   :  { %v2479_v18 = vpop.permute.xlu0 %2478  ;;  %v2008_v2 = vpop.permute.xlu1 %2007  ;;  %3636 = vmatprep.subr.bf16.mxu0 %v3834_v19 }
 0x35e   :  { %v4548_v28 = vadd.f32 %v2479_v18, %v2477_v26  ;;  %v4550_v62 = vadd.f32 %v2008_v2, %v2006_v63  ;;  %v151_v26 = vadd.f32 %v147_v27, %v4192_v61  ;;  %v3831_v63 = vld [vmem:[%s5164_s4 + $0x2c] ss:$20 sps:$4 sm:$0xff]   ;;  %v3835_v2 = vld [vmem:[%s5164_s4 + $0x7c] ss:$20 sps:$4 sm:$0xff]  }
 0x35f   :  { %3688 = vmatprep.subr.bf16.mxu1 %v3831_v63 }
 0x360   :  { %2481 = vrot.lane.b32.xlu0 %v4548_v28, %s4026_s8  ;;  %2010 = vrot.lane.b32.xlu1 %v4550_v62, %s4026_s8  ;;  %v4611_v61 = vmax.f32 %v142_v59, %v151_v26 }
 0x361   :  { %v2504_v36 = vpop.permute.xlu1 %2503  ;;  %3689 = vmatpush3.bf16.msra.mxu1 %v3831_v63  ;;  %3637 = vmatpush3.bf16.msra.mxu0 %v3834_v19 }
 0x362   :  { %v4565_v43 = vadd.f32 %v2504_v36, %v2502_v8  ;;  %v135_v8 = vld [vmem:[#allocation9 + $0x18] sm:$0xff]  ;;  %3690 = vmatprep.subr.bf16.mxu1 %v3833_v22  ;;  %3638 = vmatprep.subr.bf16.mxu0 %v3836_v4  ;;  %v4660_v36 = vld [vmem:[%s5164_s4] ss:$20 sps:$4 sm:$0xff]  }
 0x363   :  { %v139_v12 = vadd.f32 %v135_v8, %v4190_v60  ;;  %v152_v60 = vadd.f32 %v148_v20, %v4194_v1  ;;  %v3837_v1 = vld [vmem:[%s5164_s4 + $0xa4] ss:$20 sps:$4 sm:$0xff]  }
 0x364   :  { %2506 = vrot.lane.b32.xlu1 %v4565_v43, %s4026_s8  ;;  %157 = vrot.lane.b32.xlu0 %v4562_v33, %s4020_s28 }
 0x365   :  { %3691 = vmatpush3.bf16.msra.mxu1 %v3833_v22  ;;  %3639 = vmatpush3.bf16.msra.mxu0 %v3836_v4  ;;  %v143_v18 = vmax.f32 %v139_v12, %v4172_v38 }
 0x366   :  { %3692 = vmatprep.subr.bf16.mxu1 %v3835_v2  ;;  %3640 = vmatprep.subr.bf16.mxu0 %v3838_v6 }
 0x367   :  { %v4630_v17 = vmax.f32 %v143_v18, %v152_v60 }
 0x368   :  { %159 = vrot.lane.b32.xlu1 %v4568_v40, %s4020_s28  ;;  %161 = vrot.lane.b32.xlu0 %v4571_v50, %s4020_s28 }
 0x369   :  { %3693 = vmatpush3.bf16.msra.mxu1 %v3835_v2  ;;  %3641 = vmatpush3.bf16.msra.mxu0 %v3838_v6  ;;  %v3223_v2 = vld [vmem:[%s5166_s6] ss:$0 sm:$0xff] }
 0x36a   :  { %3694 = vmatprep.subr.bf16.mxu1 %v3837_v1  ;;  %3646 = vmatprep.subr.bf16.mxu0 %v4635_v29 }
 0x36c   :  { %178 = vrot.lane.b32.xlu1 %v4585_v56, %s4020_s28  ;;  %180 = vrot.lane.b32.xlu0 %v4587_v0, %s4020_s28 }
 0x36d   :  { %3695 = vmatpush3.bf16.msra.mxu1 %v3837_v1 }
 0x36e   :  { %3696 = vmatprep.subr.bf16.mxu1 %v3839_v32 }
 0x370   :  { %199 = vrot.lane.b32.xlu1 %v4562_v33, %s4027_s3  ;;  %201 = vrot.lane.b32.xlu0 %v4568_v40, %s4027_s3 }
 0x371   :  { %3697 = vmatpush3.bf16.msra.mxu1 %v3839_v32 }
 0x372   :  { %3698 = vmatprep.subr.bf16.mxu1 %v3841_v25 }
 0x374   :  { %163 = vrot.lane.b32.xlu1 %v4609_v9, %s4020_s28  ;;  %182 = vrot.lane.b32.xlu0 %v4611_v61, %s4020_s28 }
 0x375   :  { %3699 = vmatpush3.bf16.msra.mxu1 %v3841_v25 }
 0x376   :  { %3700 = vmatprep.subr.bf16.mxu1 %v3843_v34 }
 0x378   :  { %203 = vrot.lane.b32.xlu1 %v4571_v50, %s4027_s3  ;;  %220 = vrot.lane.b32.xlu0 %v4585_v56, %s4027_s3 }
 0x379   :  { %3701 = vmatpush3.bf16.msra.mxu1 %v3843_v34 }
 0x37a   :  { %3706 = vmatprep.subr.bf16.mxu1 %v4660_v36 }
 0x37c   :  { %222 = vrot.lane.b32.xlu1 %v4587_v0, %s4027_s3  ;;  %184 = vrot.lane.b32.xlu0 %v4630_v17, %s4020_s28 }
 0x380   :  { %205 = vrot.lane.b32.xlu1 %v4609_v9, %s4027_s3  ;;  %224 = vrot.lane.b32.xlu0 %v4611_v61, %s4027_s3 }
 0x384   :  { %226 = vrot.lane.b32.xlu1 %v4630_v17, %s4027_s3 }
 0x3ce   :  { %v1986_v39 = vpop.permute.xlu0 %1985 }
 0x3cf   :  { %v1987_v49 = vadd.f32 %v1986_v39, %v4542_v16 }
 0x3d1   :  { %v1988_v51 = vrot.slane %v1987_v49, 4 }
 0x3d2   :  { %v2482_v41 = vpop.permute.xlu0 %2481  ;;  %v2011_v52 = vpop.permute.xlu1 %2010 }
 0x3d3   :  { %v1989_v48 = vadd.f32 %v1988_v51, %v1987_v49  ;;  %v2483_v45 = vadd.f32 %v2482_v41, %v4548_v28  ;;  %v2012_v55 = vadd.f32 %v2011_v52, %v4550_v62 }
 0x3d5   :  { %v1990_v42 = vrot.slane %v1989_v48, 2  ;;  %v2484_v46 = vrot.slane %v2483_v45, 4  ;;  %v2013_v54 = vrot.slane %v2012_v55, 4 }
 0x3d6   :  { %v2507_v27 = vpop.permute.xlu1 %2506  ;;  %v158_v30 = vpop.permute.xlu0 %157 }
 0x3d7   :  { %v1991_v59 = vadd.f32 %v1990_v42, %v1989_v48  ;;  %v2485_v26 = vadd.f32 %v2484_v46, %v2483_v45  ;;  %v2014_v63 = vadd.f32 %v2013_v54, %v2012_v55  ;;  %v2508_v19 = vadd.f32 %v2507_v27, %v4565_v43  ;;  %v4675_v48 = vld [vmem:[%s5166_s6 + $0x1] ss:$0 sm:$0xff] }
 0x3d8   :  { %v170_v25 = vmul.f32 %v3223_v2, %v158_v30 }
 0x3d9   :  { %v1992_v8 = vrot.slane %v1991_v59, 1  ;;  %v2486_v16 = vrot.slane %v2485_v26, 2  ;;  %v2015_v12 = vrot.slane %v2014_v63, 2  ;;  %v2509_v22 = vrot.slane %v2508_v19, 4 }
 0x3da   :  { %v160_v4 = vpop.permute.xlu1 %159  ;;  %v162_v20 = vpop.permute.xlu0 %161  ;;  %v174_v42 = vadd.f32 %v170_v25, %v4562_v33 }
 0x3db   :  { %v1993_v18 = vadd.f32 %v1992_v8, %v1991_v59  ;;  %v2487_v28 = vadd.f32 %v2486_v16, %v2485_v26  ;;  %v2016_v60 = vadd.f32 %v2015_v12, %v2014_v63  ;;  %v2510_v62 = vadd.f32 %v2509_v22, %v2508_v19  ;;  %v3224_v26 = vld [vmem:[%s5167_s7] ss:$0 sm:$0xff] }
 0x3dc   :  { %v171_v34 = vmul.f32 %v3223_v2, %v160_v4  ;;  %v172_v33 = vmul.f32 %v3223_v2, %v162_v20  ;;  %v4697_v20 = vld [vmem:[%s5167_s7 + $0x1] ss:$0 sm:$0xff] }
 0x3dd   :  { %v2488_v6 = vrot.slane %v2487_v28, 1  ;;  %v2017_v1 = vrot.slane %v2016_v60, 1  ;;  %v2511_v32 = vrot.slane %v2510_v62, 2  ;;  %v4670_v49 = vmul.f32 0.001953125, %v1993_v18 }
 0x3de   :  { %v179_v43 = vpop.permute.xlu1 %178  ;;  %v181_v39 = vpop.permute.xlu0 %180  ;;  %v175_v46 = vadd.f32 %v171_v34, %v4568_v40  ;;  %v1147_v40 = vmul.f32 %v4476_v44, %v4476_v44  ;;  %v242_v34 = vld [vmem:[#allocation10 + $0x8] sm:$0xff] }
 0x3df   :  { %v2489_v51 = vadd.f32 %v2488_v6, %v2487_v28  ;;  %v2018_v41 = vadd.f32 %v2017_v1, %v2016_v60  ;;  %v2512_v52 = vadd.f32 %v2511_v32, %v2510_v62  ;;  %v2021_v59 = vmul.f32 %v4670_v49, %v4670_v49  ;;  %v241_v6 = vld [vmem:[#allocation10] sm:$0xff] }
 0x3e0   :  { %v191_v12 = vadd.f32 %v3224_v26, %v179_v43  ;;  %v1146_v32 = vmul.f32 %v4474_v35, %v4474_v35  ;;  %v192_v25 = vadd.f32 %v3224_v26, %v181_v39  ;;  %v4701_v43 = vadd.f32 %v4476_v44, %v4474_v35 }
 0x3e1   :  { %v2020_v45 = vmul.f32 0.001953125, %v2018_v41  ;;  %v2513_v55 = vrot.slane %v2512_v52, 1  ;;  %v4679_v30 = vmul.f32 0.001953125, %v2489_v51  ;;  %v176_v41 = vadd.f32 %v172_v33, %v4571_v50 }
 0x3e2   :  { %v200_v54 = vpop.permute.xlu1 %199  ;;  %v202_v27 = vpop.permute.xlu0 %201  ;;  %v195_v39 = vmax.f32 %v4585_v56, %v191_v12  ;;  %v4719_v50 = vmul.f32 %v4484_v21, %v4484_v21 }
 0x3e3   :  { %v212_v63 = vmul.f32 %v4675_v48, %v200_v54  ;;  %v213_v19 = vmul.f32 %v4675_v48, %v202_v27  ;;  %v2022_v8 = vsub.f32 %v2020_v45, %v2021_v59  ;;  %v2514_v16 = vadd.f32 %v2513_v55, %v2512_v52 }
 0x3e4   :  { %v2517_v60 = vmul.f32 %v4679_v30, %v4679_v30  ;;  %v4706_v52 = vmul.f32 %v4478_v57, %v4478_v57 }
 0x3e5   :  { %v216_v22 = vadd.f32 %v212_v63, %v174_v42  ;;  %v2023_v28 = vadd.f32 1e-05, %v2022_v8  ;;  %v2516_v62 = vmul.f32 0.001953125, %v2514_v16  ;;  %v217_v1 = vadd.f32 %v213_v19, %v175_v46  ;;  %v243_v16 = vld [vmem:[#allocation10 + $0x10] sm:$0xff] }
 0x3e6   :  { %v164_v4 = vpop.permute.xlu1 %163  ;;  %v183_v18 = vpop.permute.xlu0 %182  ;;  %v4711_v46 = vadd.f32 %v1147_v40, %v1146_v32  ;;  %v196_v19 = vmax.f32 %v4587_v0, %v192_v25  ;;  %v2026_v0 = vsub.f32 %v4492_v58, %v4670_v49  ;;  %v2028_v32 = vsub.f32 %v4510_v15, %v4670_v49 }
 0x3e7   :  { %3890 = vrsqrt.f32 %v2023_v28  ;;  %v2518_v51 = vsub.f32 %v2516_v62, %v2517_v60  ;;  %v4709_v45 = vmul.f32 %v241_v6, %v216_v22  ;;  %v4713_v27 = vmul.f32 %v242_v34, %v217_v1 }
 0x3e8   :  { %v173_v56 = vmul.f32 %v3223_v2, %v164_v4  ;;  %v193_v8 = vadd.f32 %v3224_v26, %v183_v18  ;;  %v4728_v22 = vmul.f32 %v4488_v23, %v4488_v23  ;;  %v2025_v28 = vsub.f32 %v4490_v53, %v4670_v49 }
 0x3e9   :  { %v2519_v54 = vadd.f32 1e-05, %v2518_v51  ;;  %v334_v40 = vmul.f32 %v4709_v45, %v4709_v45  ;;  %v335_v12 = vmul.f32 %v4713_v27, %v4713_v27  ;;  %v2027_v2 = vsub.f32 %v4504_v5, %v4670_v49 }
 0x3ea   :  { %v204_v55 = vpop.permute.xlu1 %203  ;;  %v221_v42 = vpop.permute.xlu0 %220  ;;  %v2521_v53 = vsub.f32 %v4494_v3, %v4679_v30  ;;  %v177_v58 = vadd.f32 %v173_v56, %v4609_v9  ;;  %v313_v5 = vadd.f32 %v4713_v27, %v4709_v45  ;;  %v197_v25 = vmax.f32 %v4611_v61, %v193_v8 }
 0x3eb   :  { %v214_v59 = vmul.f32 %v4675_v48, %v204_v55  ;;  %v233_v63 = vadd.f32 %v4697_v20, %v221_v42  ;;  %3892 = vrsqrt.f32 %v2519_v54  ;;  %v2524_v15 = vsub.f32 %v4522_v31, %v4679_v30 }
 0x3ed   :  { %v218_v33 = vadd.f32 %v214_v59, %v176_v41  ;;  %v4738_v62 = vmax.f32 %v195_v39, %v233_v63  ;;  %v338_v41 = vadd.f32 %v335_v12, %v334_v40  ;;  %v244_v59 = vld [vmem:[#allocation10 + $0x18] sm:$0xff] }
 0x3ee   :  { %v223_v4 = vpop.permute.xlu1 %222  ;;  %v185_v18 = vpop.permute.xlu0 %184 }
 0x3ef   :  { %v4736_v60 = vmul.f32 %v243_v16, %v218_v33  ;;  %v234_v6 = vadd.f32 %v4697_v20, %v223_v4  ;;  %v194_v1 = vadd.f32 %v3224_v26, %v185_v18  ;;  %v2523_v26 = vsub.f32 %v4517_v11, %v4679_v30 }
 0x3f0   :  { %v271_v3 = vmul.f32 %v4738_v62, %v4738_v62 }
 0x3f1   :  { %v4749_v34 = vmax.f32 %v196_v19, %v234_v6  ;;  %v336_v51 = vmul.f32 %v4736_v60, %v4736_v60  ;;  %v198_v9 = vmax.f32 %v4630_v17, %v194_v1  ;;  %v3891_v61 = vpop.eup %3890  ;;  %v314_v31 = vadd.f32 %v313_v5, %v4736_v60 }
 0x3f2   :  { %v206_v49 = vpop.permute.xlu1 %205  ;;  %v225_v39 = vpop.permute.xlu0 %224  ;;  %v2029_v63 = vmul.f32 %v3891_v61, %v2025_v28  ;;  %v2030_v19 = vmul.f32 %v3891_v61, %v2026_v0  ;;  %v2031_v56 = vmul.f32 %v3891_v61, %v2027_v2  ;;  %v2032_v33 = vmul.f32 %v3891_v61, %v2028_v32 }
 0x3f3   :  { %v272_v55 = vmul.f32 %v4749_v34, %v4749_v34  ;;  %v215_v42 = vmul.f32 %v4675_v48, %v206_v49  ;;  %v235_v54 = vadd.f32 %v4697_v20, %v225_v39  ;;  %v250_v11 = vadd.f32 %v4749_v34, %v4738_v62 }
 0x3f4   :  { %v339_v16 = vadd.f32 %v338_v41, %v336_v51  ;;  %v2033_v12 = vmax.f32 %v2029_v63, 0.0  ;;  %v2034_v4 = vmax.f32 %v2030_v19, 0.0  ;;  %v2035_v48 = vmax.f32 %v2031_v56, 0.0 }
 0x3f5   :  { %v219_v17 = vadd.f32 %v215_v42, %v177_v58  ;;  %v4767_v8 = vmax.f32 %v197_v25, %v235_v54  ;;  %v275_v18 = vadd.f32 %v272_v55, %v271_v3  ;;  %v3893_v6 = vpop.eup %3892  ;;  %v2036_v28 = vmax.f32 %v2032_v33, 0.0  ;;  %v3842_v3 = vld [vmem:[#allocation7 + $0x18] ss:$12 sps:$4 sm:$0xff]  }
 0x3f6   :  { %v227_v40 = vpop.permute.xlu1 %226  ;;  %2037 = vst [vmem:[#allocation3 + $0x2] sm:$0xff] %v2033_v12  ;;  %2038 = vst [vmem:[#allocation3 + $0xa] sm:$0xff] %v2034_v4  ;;  %v2067_v0 = vpack.c.bf16 %v2034_v4, %v2033_v12  ;;  %v2527_v2 = vmul.f32 %v3893_v6, %v2523_v26  ;;  %v2528_v58 = vmul.f32 %v3893_v6, %v2524_v15 }
 0x3f7   :  { %v4769_v1 = vmul.f32 %v244_v59, %v219_v17  ;;  %v236_v49 = vadd.f32 %v4697_v20, %v227_v40  ;;  %v251_v5 = vadd.f32 %v250_v11, %v4767_v8  ;;  %2039 = vst [vmem:[#allocation3 + $0x1a] sm:$0xff] %v2035_v48  ;;  %v273_v32 = vmul.f32 %v4767_v8, %v4767_v8 }
 0x3f8   :  { %2040 = vst [vmem:[#allocation3 + $0x22] sm:$0xff] %v2036_v28  ;;  %v2068_v41 = vpack.c.bf16 %v2036_v28, %v2035_v48  ;;  %v2522_v39 = vsub.f32 %v4496_v24, %v4679_v30  ;;  %3642 = vmatprep.mubr.bf16.mxu0 %v2067_v0  ;;  %v2531_v26 = vmax.f32 %v2527_v2, 0.0  ;;  %v2532_v15 = vmax.f32 %v2528_v58, 0.0  ;;  %v3848_v2 = vld [vmem:[#allocation7 + $0x60] ss:$12 sps:$4 sm:$0xff]  }
 0x3f9   :  { %v4775_v25 = vmax.f32 %v198_v9, %v236_v49  ;;  %v4778_v51 = vadd.f32 %v314_v31, %v4769_v1  ;;  %v337_v20 = vmul.f32 %v4769_v1, %v4769_v1  ;;  %v276_v61 = vadd.f32 %v275_v18, %v273_v32 }
 0x3fa   :  { %3643 = vmatmul.mubr.bf16.vlgmr.msra.gmra.mrb[36].mxu0 %v2068_v41  ;;  %v4794_v54 = vmul.f32 %v3893_v6, %v2521_v53  ;;  %v4796_v24 = vmul.f32 %v3893_v6, %v2522_v39  ;;  %v1149_v30 = vmul.f32 %v4480_v7, %v4480_v7  ;;  %v4800_v11 = vpack.c.bf16 %v2532_v15, %v2531_v26  ;;  %v3844_v53 = vld [vmem:[#allocation7 + $0x30] ss:$12 sps:$4 sm:$0xff]   ;;  %v3846_v6 = vld [vmem:[#allocation7 + $0x48] ss:$12 sps:$4 sm:$0xff]   ;;  %v3850_v41 = vld [vmem:[#allocation7 + $0x78] ss:$12 sps:$4 sm:$0xff]  }
 0x3fb   :  { %316 = vrot.lane.b32.xlu1 %v4778_v51, %s4020_s28  ;;  %v4787_v9 = vadd.f32 %v251_v5, %v4775_v25  ;;  %v4789_v55 = vadd.f32 %v339_v16, %v337_v20  ;;  %v274_v42 = vmul.f32 %v4775_v25, %v4775_v25  ;;  %3647 = vmatpush3.bf16.msra.mxu0 %v4635_v29 }
 0x3fc   :  { %v1151_v31 = vadd.f32 %v4711_v46, %v4706_v52  ;;  %3648 = vmatprep.subr.bf16.mxu0 %v3842_v3  ;;  %v1217_v29 = vadd.f32 %v4728_v22, %v4719_v50  ;;  %v1215_v63 = vmul.f32 %v4482_v47, %v4482_v47  ;;  %v1192_v19 = vadd.f32 %v4488_v23, %v4484_v21 }
 0x3fd   :  { %253 = vrot.lane.b32.xlu0 %v4787_v9, %s4020_s28  ;;  %v4804_v59 = vadd.f32 %v276_v61, %v274_v42  ;;  %v2041_v17 = vld [vmem:[#allocation3 + $0x1] sm:$0xff]  ;;  %v2042_v16 = vld [vmem:[#allocation3 + $0x9] sm:$0xff]  ;;  %v1126_v52 = vadd.f32 %v4701_v43, %v4478_v57  ;;  %v2529_v40 = vmax.f32 %v4794_v54, 0.0  ;;  %v2530_v12 = vmax.f32 %v4796_v24, 0.0 }
 0x3fe   :  { %v4816_v56 = vld [vmem:[#allocation3 + $0x19] sm:$0xff]  ;;  %v2045_v33 = vpack.c.bf16 %v2042_v16, %v2041_v17  ;;  %v4830_v4 = vld [vmem:[#allocation3 + $0x3] sm:$0xff]  ;;  %v4832_v43 = vld [vmem:[#allocation3 + $0xb] sm:$0xff]  ;;  %v4834_v48 = vadd.f32 %v1151_v31, %v1149_v30  ;;  %v1218_v18 = vadd.f32 %v1217_v29, %v1215_v63  ;;  %v1216_v5 = vmul.f32 %v4486_v10, %v4486_v10 }
 0x3ff   :  { %341 = vrot.lane.b32.xlu1 %v4789_v55, %s4020_s28  ;;  %v4820_v46 = vld [vmem:[#allocation3 + $0x21] sm:$0xff]  ;;  %3649 = vmatpush3.bf16.msra.mxu0 %v3842_v3  ;;  %2533 = vst [vmem:[#allocation3 + $0x2] sm:$0xff] %v2529_v40  ;;  %2534 = vst [vmem:[#allocation3 + $0xa] sm:$0xff] %v2530_v12  ;;  %v4843_v49 = vadd.f32 %v1126_v52, %v4480_v7  ;;  %v1193_v28 = vadd.f32 %v1192_v19, %v4482_v47  ;;  %v3847_v30 = vld [vmem:[%s5164_s4 + $0x28] ss:$20 sps:$4 sm:$0xff]  }
 0x400   :  { %v4822_v50 = vld [vmem:[#allocation3 + $0x1b] sm:$0xff]  ;;  %v4824_v22 = vld [vmem:[#allocation3 + $0x23] sm:$0xff]  ;;  %3650 = vmatprep.subr.bf16.mxu0 %v3844_v53  ;;  %3662 = vmatprep.mubr.bf16.mxu0 %v2045_v33  ;;  %v4850_v0 = vadd.f32 %v1218_v18, %v1216_v5  ;;  %v2046_v16 = vpack.c.bf16 %v4820_v46, %v4816_v56  ;;  %v2283_v33 = vpack.c.bf16 %v4832_v43, %v4830_v4 }
 0x401   :  { %2535 = vst [vmem:[#allocation3 + $0x1a] sm:$0xff] %v2531_v26  ;;  %2536 = vst [vmem:[#allocation3 + $0x22] sm:$0xff] %v2532_v15  ;;  %278 = vrot.lane.b32.xlu0 %v4804_v59, %s4020_s28  ;;  %v4855_v58 = vadd.f32 %v1193_v28, %v4486_v10  ;;  %v3852_v29 = vld [vmem:[#allocation7 + $0x90] ss:$12 sps:$4 sm:$0xff]   ;;  %v3854_v63 = vld [vmem:[#allocation7 + $0xa8] ss:$12 sps:$4 sm:$0xff]  }
 0x402   :  { %v3851_v19 = vld [vmem:[%s5164_s4 + $0x78] ss:$20 sps:$4 sm:$0xff]   ;;  %v3856_v17 = vld [vmem:[#allocation7 + $0x8] ss:$12 sps:$4 sm:$0xff]   ;;  %v3857_v56 = vld [vmem:[%s5164_s4 + $0xf0] ss:$20 sps:$4 sm:$0xff]  }
 0x403   :  { %1153 = vrot.lane.b32.xlu1 %v4834_v48, %s4020_s28  ;;  %3651 = vmatpush3.bf16.msra.mxu0 %v3844_v53  ;;  %v3849_v53 = vld [vmem:[%s5164_s4 + $0x50] ss:$20 sps:$4 sm:$0xff]   ;;  %v3858_v52 = vld [vmem:[#allocation7 + $0x20] ss:$12 sps:$4 sm:$0xff]   ;;  %v3855_v18 = vld [vmem:[%s5164_s4 + $0xc8] ss:$20 sps:$4 sm:$0xff]  }
 0x404   :  { %3652 = vmatprep.subr.bf16.mxu0 %v3846_v6  ;;  %v3862_v46 = vld [vmem:[#allocation7 + $0x50] ss:$12 sps:$4 sm:$0xff]   ;;  %v3859_v4 = vld [vmem:[%s5164_s4 + $0x118] ss:$20 sps:$4 sm:$0xff]   ;;  %v3864_v43 = vld [vmem:[#allocation7 + $0x68] ss:$12 sps:$4 sm:$0xff]  }
 0x405   :  { %1128 = vrot.lane.b32.xlu0 %v4843_v49, %s4020_s28  ;;  %v3861_v5 = vld [vmem:[%s5164_s4 + $0x8] ss:$20 sps:$4 sm:$0xff]   ;;  %v3867_v54 = vld [vmem:[%s5164_s4 + $0x80] ss:$20 sps:$4 sm:$0xff]  }
 0x406   :  { %v2559_v3 = vld [vmem:[#allocation3 + $0x1] sm:$0xff]  ;;  %v2560_v39 = vld [vmem:[#allocation3 + $0x9] sm:$0xff] }
 0x407   :  { %1220 = vrot.lane.b32.xlu1 %v4850_v0, %s4020_s28  ;;  %3653 = vmatpush3.bf16.msra.mxu0 %v3846_v6  ;;  %v2537_v15 = vld [vmem:[#allocation3] sm:$0xff]  ;;  %v2563_v61 = vpack.c.bf16 %v2560_v39, %v2559_v3  ;;  %v2538_v42 = vld [vmem:[#allocation3 + $0x8] sm:$0xff]  ;;  %v2779_v3 = vpack.c.bf16 %v2530_v12, %v2529_v40  ;;  %v2284_v40 = vpack.c.bf16 %v4824_v22, %v4822_v50  ;;  %v3874_v50 = vld [vmem:[%s5164_s4 + $0xc] ss:$20 sps:$4 sm:$0xff]  }
 0x408   :  { %v2561_v32 = vld [vmem:[#allocation3 + $0x19] sm:$0xff]  ;;  %v2562_v20 = vld [vmem:[#allocation3 + $0x21] sm:$0xff]  ;;  %3654 = vmatprep.subr.bf16.mxu0 %v3848_v2  ;;  %v2541_v31 = vpack.c.bf16 %v2538_v42, %v2537_v15 }
 0x409   :  { %v2564_v26 = vpack.c.bf16 %v2562_v20, %v2561_v32  ;;  %1195 = vrot.lane.b32.xlu0 %v4855_v58, %s4020_s28  ;;  %3702 = vmatprep.mubr.bf16.mxu1 %v2563_v61  ;;  %v3860_v6 = vld [vmem:[#allocation7 + $0x38] ss:$12 sps:$4 sm:$0xff]   ;;  %v2539_v28 = vld [vmem:[#allocation3 + $0x18] sm:$0xff]  ;;  %v3870_v15 = vld [vmem:[#allocation7 + $0xb0] ss:$12 sps:$4 sm:$0xff]  }
 0x40a   :  { %v3866_v32 = vld [vmem:[#allocation7 + $0x80] ss:$12 sps:$4 sm:$0xff]   ;;  %v3868_v39 = vld [vmem:[#allocation7 + $0x98] ss:$12 sps:$4 sm:$0xff]   ;;  %v3869_v24 = vld [vmem:[%s5164_s4 + $0xa8] ss:$20 sps:$4 sm:$0xff]  }
 0x40b   :  { %3655 = vmatpush3.bf16.msra.mxu0 %v3848_v2  ;;  %3703 = vmatmul.mubr.bf16.vlgmr.msra.gmra.mrb[28].mxu1 %v2564_v26  ;;  %v2540_v2 = vld [vmem:[#allocation3 + $0x20] sm:$0xff]  ;;  %v3865_v26 = vld [vmem:[%s5164_s4 + $0x58] ss:$20 sps:$4 sm:$0xff]  }
 0x40c   :  { %3656 = vmatprep.subr.bf16.mxu0 %v3850_v41  ;;  %3707 = vmatpush3.bf16.msra.mxu1 %v4660_v36  ;;  %v3853_v36 = vld [vmem:[%s5164_s4 + $0xa0] ss:$20 sps:$4 sm:$0xff]   ;;  %v2542_v20 = vpack.c.bf16 %v2540_v2, %v2539_v28  ;;  %v3871_v12 = vld [vmem:[%s5164_s4 + $0xd0] ss:$20 sps:$4 sm:$0xff]   ;;  %v3872_v61 = vld [vmem:[%s5164_s4 + $0xf8] ss:$20 sps:$4 sm:$0xff]  }
 0x40d   :  { %3722 = vmatprep.mubr.bf16.mxu1 %v2541_v31  ;;  %3708 = vmatprep.subr.bf16.mxu1 %v3847_v30  ;;  %v3873_v42 = vld [vmem:[%s5164_s4 + $0x120] ss:$20 sps:$4 sm:$0xff]   ;;  %v3886_v28 = vld [vmem:[%s5164_s4 + $0xb0] ss:$20 sps:$4 sm:$0xff]   ;;  %v3887_v2 = vld [vmem:[%s5164_s4 + $0xd8] ss:$20 sps:$4 sm:$0xff]  }
 0x40e   :  { %v2898_v22 = vld [vmem:[#allocation3 + $0x3] sm:$0xff] }
 0x40f   :  { %3657 = vmatpush3.bf16.msra.mxu0 %v3850_v41  ;;  %v3863_v41 = vld [vmem:[%s5164_s4 + $0x30] ss:$20 sps:$4 sm:$0xff]   ;;  %v3875_v31 = vld [vmem:[%s5164_s4 + $0x34] ss:$20 sps:$4 sm:$0xff]  }
 0x410   :  { %3658 = vmatprep.subr.bf16.mxu0 %v3852_v29  ;;  %3709 = vmatpush3.bf16.msra.mxu1 %v3847_v30  ;;  %v2899_v30 = vld [vmem:[#allocation3 + $0xb] sm:$0xff] }
 0x411   :  { %3710 = vmatprep.subr.bf16.mxu1 %v3849_v53 }
 0x413   :  { %3659 = vmatpush3.bf16.msra.mxu0 %v3852_v29  ;;  %v2902_v29 = vpack.c.bf16 %v2899_v30, %v2898_v22 }
 0x414   :  { %3660 = vmatprep.subr.bf16.mxu0 %v3854_v63  ;;  %3711 = vmatpush3.bf16.msra.mxu1 %v3849_v53  ;;  %v3876_v53 = vld [vmem:[%s5164_s4 + $0x5c] ss:$20 sps:$4 sm:$0xff]  }
 0x415   :  { %3712 = vmatprep.subr.bf16.mxu1 %v3851_v19 }
 0x417   :  { %3661 = vmatpush3.bf16.msra.mxu0 %v3854_v63  ;;  %v3877_v63 = vld [vmem:[%s5164_s4 + $0x84] ss:$20 sps:$4 sm:$0xff]  }
 0x418   :  { %3666 = vmatprep.subr.bf16.mxu0 %v3856_v17  ;;  %3713 = vmatpush3.bf16.msra.mxu1 %v3851_v19  ;;  %v3878_v19 = vld [vmem:[%s5164_s4 + $0xac] ss:$20 sps:$4 sm:$0xff]  }
 0x419   :  { %3714 = vmatprep.subr.bf16.mxu1 %v3853_v36 }
 0x41a   :  { %3663 = vmatmul.mubr.bf16.vlgmr.msra.gmra.mrb[36].mxu0 %v2046_v16  ;;  %v3882_v16 = vld [vmem:[%s5164_s4 + $0x10] ss:$20 sps:$4 sm:$0xff]  }
 0x41b   :  { %3667 = vmatpush3.bf16.msra.mxu0 %v3856_v17  ;;  %3682 = vmatprep.mubr.bf16.mxu0 %v2283_v33  ;;  %v3880_v17 = vld [vmem:[%s5164_s4 + $0xfc] ss:$20 sps:$4 sm:$0xff]  }
 0x41c   :  { %3668 = vmatprep.subr.bf16.mxu0 %v3858_v52  ;;  %3715 = vmatpush3.bf16.msra.mxu1 %v3853_v36  ;;  %v3881_v36 = vld [vmem:[%s5164_s4 + $0x124] ss:$20 sps:$4 sm:$0xff]  }
 0x41d   :  { %3716 = vmatprep.subr.bf16.mxu1 %v3855_v18  ;;  %v2901_v33 = vld [vmem:[#allocation3 + $0x23] sm:$0xff] }
 0x41f   :  { %3669 = vmatpush3.bf16.msra.mxu0 %v3858_v52  ;;  %v2900_v52 = vld [vmem:[#allocation3 + $0x1b] sm:$0xff] }
 0x420   :  { %3670 = vmatprep.subr.bf16.mxu0 %v3860_v6  ;;  %3717 = vmatpush3.bf16.msra.mxu1 %v3855_v18  ;;  %v3021_v18 = vld [vmem:[#allocation3 + $0x4] sm:$0xff] }
 0x421   :  { %3718 = vmatprep.subr.bf16.mxu1 %v3857_v56 }
 0x423   :  { %3671 = vmatpush3.bf16.msra.mxu0 %v3860_v6  ;;  %v3022_v6 = vld [vmem:[#allocation3 + $0xc] sm:$0xff] }
 0x424   :  { %3672 = vmatprep.subr.bf16.mxu0 %v3862_v46  ;;  %3719 = vmatpush3.bf16.msra.mxu1 %v3857_v56  ;;  %v2903_v56 = vpack.c.bf16 %v2901_v33, %v2900_v52 }
 0x425   :  { %3720 = vmatprep.subr.bf16.mxu1 %v3859_v4 }
 0x427   :  { %3673 = vmatpush3.bf16.msra.mxu0 %v3862_v46  ;;  %v3883_v46 = vld [vmem:[%s5164_s4 + $0x38] ss:$20 sps:$4 sm:$0xff]  }
 0x428   :  { %3674 = vmatprep.subr.bf16.mxu0 %v3864_v43  ;;  %3721 = vmatpush3.bf16.msra.mxu1 %v3859_v4  ;;  %v3025_v4 = vpack.c.bf16 %v3022_v6, %v3021_v18 }
 0x429   :  { %3726 = vmatprep.subr.bf16.mxu1 %v3861_v5 }
 0x42b   :  { %3675 = vmatpush3.bf16.msra.mxu0 %v3864_v43  ;;  %3723 = vmatmul.mubr.bf16.vlgmr.msra.gmra.mrb[28].mxu1 %v2542_v20  ;;  %v3884_v43 = vld [vmem:[%s5164_s4 + $0x60] ss:$20 sps:$4 sm:$0xff]   ;;  %v3889_v20 = vld [vmem:[%s5164_s4 + $0x128] ss:$20 sps:$4 sm:$0xff]  }
 0x42c   :  { %3676 = vmatprep.subr.bf16.mxu0 %v3866_v32  ;;  %3727 = vmatpush3.bf16.msra.mxu1 %v3861_v5  ;;  %v3885_v5 = vld [vmem:[%s5164_s4 + $0x88] ss:$20 sps:$4 sm:$0xff]  }
 0x42d   :  { %3742 = vmatprep.mubr.bf16.mxu1 %v2779_v3  ;;  %3728 = vmatprep.subr.bf16.mxu1 %v3863_v41  ;;  %v3024_v3 = vld [vmem:[#allocation3 + $0x24] sm:$0xff] }
 0x42f   :  { %3677 = vmatpush3.bf16.msra.mxu0 %v3866_v32  ;;  %v3888_v32 = vld [vmem:[%s5164_s4 + $0x100] ss:$20 sps:$4 sm:$0xff]  }
 0x430   :  { %3678 = vmatprep.subr.bf16.mxu0 %v3868_v39  ;;  %3729 = vmatpush3.bf16.msra.mxu1 %v3863_v41  ;;  %v3023_v41 = vld [vmem:[#allocation3 + $0x1c] sm:$0xff] }
 0x431   :  { %3730 = vmatprep.subr.bf16.mxu1 %v3865_v26 }
 0x433   :  { %3679 = vmatpush3.bf16.msra.mxu0 %v3868_v39  ;;  %v3026_v39 = vpack.c.bf16 %v3024_v3, %v3023_v41 }
 0x434   :  { %3680 = vmatprep.subr.bf16.mxu0 %v3870_v15  ;;  %3731 = vmatpush3.bf16.msra.mxu1 %v3865_v26 }
 0x435   :  { %3732 = vmatprep.subr.bf16.mxu1 %v3867_v54 }
 0x437   :  { %3681 = vmatpush3.bf16.msra.mxu0 %v3870_v15 }
 0x438   :  { %3733 = vmatpush3.bf16.msra.mxu1 %v3867_v54 }
 0x439   :  { %3734 = vmatprep.subr.bf16.mxu1 %v3869_v24 }
 0x43a   :  { %3683 = vmatmul.mubr.bf16.vlgmr.msra.gmra.mrb[36].mxu0 %v2284_v40 }
 0x43c   :  { %3735 = vmatpush3.bf16.msra.mxu1 %v3869_v24 }
 0x43d   :  { %3736 = vmatprep.subr.bf16.mxu1 %v3871_v12 }
 0x440   :  { %3737 = vmatpush3.bf16.msra.mxu1 %v3871_v12 }
 0x441   :  { %3738 = vmatprep.subr.bf16.mxu1 %v3872_v61 }
 0x444   :  { %3739 = vmatpush3.bf16.msra.mxu1 %v3872_v61 }
 0x445   :  { %3740 = vmatprep.subr.bf16.mxu1 %v3873_v42 }
 0x448   :  { %3741 = vmatpush3.bf16.msra.mxu1 %v3873_v42 }
 0x449   :  { %3746 = vmatprep.subr.bf16.mxu1 %v3874_v50 }
 0x44b   :  { %3743 = vmatmul.mubr.bf16.vlgmr.msra.gmra.mrb[28].mxu1 %v4800_v11  ;;  %v3879_v11 = vld [vmem:[%s5164_s4 + $0xd4] ss:$20 sps:$4 sm:$0xff]   ;;  %s3228_s4 = sld [smem:[#allocation12 + $0x2]] }
 0x44c   :  { %3747 = vmatpush3.bf16.msra.mxu1 %v3874_v50  ;;  %3762 = vmatprep.mubr.bf16.mxu1 %v2902_v29 }
 0x44d   :  { %3748 = vmatprep.subr.bf16.mxu1 %v3875_v31 }
 0x450   :  { %3749 = vmatpush3.bf16.msra.mxu1 %v3875_v31 }
 0x451   :  { %3750 = vmatprep.subr.bf16.mxu1 %v3876_v53 }
 0x454   :  { %3751 = vmatpush3.bf16.msra.mxu1 %v3876_v53 }
 0x455   :  { %3752 = vmatprep.subr.bf16.mxu1 %v3877_v63 }
 0x458   :  { %3753 = vmatpush3.bf16.msra.mxu1 %v3877_v63 }
 0x459   :  { %3754 = vmatprep.subr.bf16.mxu1 %v3878_v19 }
 0x45c   :  { %3755 = vmatpush3.bf16.msra.mxu1 %v3878_v19 }
 0x45d   :  { %3756 = vmatprep.subr.bf16.mxu1 %v3879_v11 }
 0x460   :  { %3757 = vmatpush3.bf16.msra.mxu1 %v3879_v11 }
 0x461   :  { %3758 = vmatprep.subr.bf16.mxu1 %v3880_v17 }
 0x464   :  { %3759 = vmatpush3.bf16.msra.mxu1 %v3880_v17 }
 0x465   :  { %3760 = vmatprep.subr.bf16.mxu1 %v3881_v36 }
 0x468   :  { %3761 = vmatpush3.bf16.msra.mxu1 %v3881_v36 }
 0x469   :  { %3766 = vmatprep.subr.bf16.mxu1 %v3882_v16 }
 0x46b   :  { %3763 = vmatmul.mubr.bf16.vlgmr.msra.gmra.mrb[28].mxu1 %v2903_v56 }
 0x46c   :  { %3767 = vmatpush3.bf16.msra.mxu1 %v3882_v16  ;;  %3782 = vmatprep.mubr.bf16.mxu1 %v3025_v4 }
 0x46d   :  { %3768 = vmatprep.subr.bf16.mxu1 %v3883_v46  ;;  %v317_v18 = vpop.permute.xlu1 %316 }
 0x46e   :  { %v318_v41 = vadd.f32 %v317_v18, %v4778_v51 }
 0x46f   :  { %v254_v17 = vpop.permute.xlu0 %253 }
 0x470   :  { %3769 = vmatpush3.bf16.msra.mxu1 %v3883_v46 }
 0x471   :  { %3770 = vmatprep.subr.bf16.mxu1 %v3884_v43 }
 0x474   :  { %3771 = vmatpush3.bf16.msra.mxu1 %v3884_v43 }
 0x475   :  { %3772 = vmatprep.subr.bf16.mxu1 %v3885_v5 }
 0x478   :  { %3773 = vmatpush3.bf16.msra.mxu1 %v3885_v5 }
 0x479   :  { %3774 = vmatprep.subr.bf16.mxu1 %v3886_v28 }
 0x47c   :  { %3775 = vmatpush3.bf16.msra.mxu1 %v3886_v28  ;;  %v279_v28 = vpop.permute.xlu0 %278 }
 0x47d   :  { %3776 = vmatprep.subr.bf16.mxu1 %v3887_v2 }
 0x480   :  { %3777 = vmatpush3.bf16.msra.mxu1 %v3887_v2  ;;  %v1129_v3 = vpop.permute.xlu0 %1128 }
 0x481   :  { %3778 = vmatprep.subr.bf16.mxu1 %v3888_v32 }
 0x484   :  { %3779 = vmatpush3.bf16.msra.mxu1 %v3888_v32  ;;  %v342_v32 = vpop.permute.xlu1 %341 }
 0x485   :  { %3780 = vmatprep.subr.bf16.mxu1 %v3889_v20 }
 0x488   :  { %3781 = vmatpush3.bf16.msra.mxu1 %v3889_v20  ;;  %v255_v20 = vadd.f32 %v254_v17, %v4787_v9  ;;  %v1196_v9 = vpop.permute.xlu0 %1195 }
 0x48b   :  { %3783 = vmatmul.mubr.bf16.vlgmr.msra.gmra.mrb[28].mxu1 %v3026_v39  ;;  %v280_v39 = vadd.f32 %v279_v28, %v4804_v59 }
 0x50d   :  { %v4964_v26 = vpop.f32.mrb[36].mxu0 }
 0x50e   :  { %v4966_v15 = vpop.f32.mrb[37].mxu0  ;;  %v2426_v42 = vmul.f32 %v4964_v26, %v4964_v26 }
 0x50f   :  { %v4968_v54 = vpop.f32.mrb[38].mxu0  ;;  %v2424_v40 = vmul.f32 %v4966_v15, %v4966_v15 }
 0x510   :  { %v4970_v24 = vpop.f32.mrb[39].mxu0  ;;  %v2427_v31 = vmul.f32 %v4968_v54, %v4968_v54 }
 0x511   :  { %v2403_v12 = vadd.f32 %v4970_v24, %v4966_v15  ;;  %v2425_v61 = vmul.f32 %v4970_v24, %v4970_v24 }
 0x513   :  { %v2428_v50 = vadd.f32 %v2425_v61, %v2424_v40  ;;  %v2404_v22 = vadd.f32 %v4964_v26, %v2403_v12  ;;  %v1154_v40 = vpop.permute.xlu1 %1153  ;;  %v343_v12 = vadd.f32 %v342_v32, %v4789_v55  ;;  %v1130_v61 = vadd.f32 %v1129_v3, %v4843_v49 }
 0x515   :  { %v2405_v30 = vadd.f32 %v4968_v54, %v2404_v22  ;;  %v2429_v29 = vadd.f32 %v2428_v50, %v2426_v42  ;;  %v1155_v42 = vadd.f32 %v1154_v40, %v4834_v48  ;;  %v1197_v50 = vadd.f32 %v1196_v9, %v4855_v58 }
 0x517   :  { %2406 = vrot.lane.b32.xlu0 %v2405_v30, %s4020_s28  ;;  %v2430_v53 = vadd.f32 %v2429_v29, %v2427_v31  ;;  %v1221_v51 = vpop.permute.xlu1 %1220 }
 0x518   :  { %v1222_v59 = vadd.f32 %v1221_v51, %v4850_v0 }
 0x519   :  { %2431 = vrot.lane.b32.xlu1 %v2430_v53, %s4020_s28 }
 0x55e   :  { %v4986_v63 = vpop.f32.mrb[28].mxu1 }
 0x55f   :  { %5174 = vst [vmem:[#allocation17_spill] sm:$0xff] %v4986_v63  ;;  %v4988_v19 = vpop.f32.mrb[29].mxu1  ;;  %v3168_v6 = vmul.f32 %v4986_v63, %v4986_v63 }
 0x560   :  { %v4990_v11 = vpop.f32.mrb[30].mxu1  ;;  %v3166_v16 = vmul.f32 %v4988_v19, %v4988_v19 }
 0x561   :  { %5175 = vst [vmem:[#allocation18_spill] sm:$0xff] %v4990_v11  ;;  %v4992_v36 = vpop.f32.mrb[31].mxu1  ;;  %v3169_v43 = vmul.f32 %v4990_v11, %v4990_v11 }
 0x562   :  { %5176 = vst [vmem:[#allocation19_spill] sm:$0xff] %v4992_v36  ;;  %v3145_v52 = vadd.f32 %v4992_v36, %v4988_v19  ;;  %v3167_v33 = vmul.f32 %v4992_v36, %v4992_v36 }
 0x564   :  { %v3170_v56 = vadd.f32 %v3167_v33, %v3166_v16  ;;  %v3146_v46 = vadd.f32 %v4986_v63, %v3145_v52 }
 0x566   :  { %v3147_v4 = vadd.f32 %v4990_v11, %v3146_v46  ;;  %v3171_v5 = vadd.f32 %v3170_v56, %v3168_v6 }
 0x568   :  { %3148 = vrot.lane.b32.xlu0 %v3147_v4, %s4020_s28  ;;  %v3172_v2 = vadd.f32 %v3171_v5, %v3169_v43 }
 0x56a   :  { %3173 = vrot.lane.b32.xlu1 %v3172_v2, %s4020_s28  ;;  %s3229_s28 = sld [smem:[#allocation12 + $0x3]] }
 0x56c   :  { %256 = vrot.lane.b32.xlu0 %v255_v20, %s4025_s1 }
 0x56e   :  { %319 = vrot.lane.b32.xlu1 %v318_v41, %s4025_s1 }
 0x570   :  { %281 = vrot.lane.b32.xlu0 %v280_v39, %s4025_s1 }
 0x572   :  { %344 = vrot.lane.b32.xlu1 %v343_v12, %s4025_s1 }
 0x574   :  { %1131 = vrot.lane.b32.xlu0 %v1130_v61, %s4025_s1 }
 0x576   :  { %1156 = vrot.lane.b32.xlu1 %v1155_v42, %s4025_s1 }
 0x578   :  { %1198 = vrot.lane.b32.xlu0 %v1197_v50, %s4025_s1 }
 0x57a   :  { %1223 = vrot.lane.b32.xlu1 %v1222_v59, %s4025_s1 }
 0x589   :  { %v2407_v55 = vpop.permute.xlu0 %2406 }
 0x58a   :  { %v2408_v49 = vadd.f32 %v2407_v55, %v2405_v30 }
 0x58b   :  { %v2432_v22 = vpop.permute.xlu1 %2431 }
 0x58c   :  { %v2433_v31 = vadd.f32 %v2432_v22, %v2430_v53  ;;  %2409 = vrot.lane.b32.xlu0 %v2408_v49, %s4025_s1 }
 0x58e   :  { %2434 = vrot.lane.b32.xlu1 %v2433_v31, %s4025_s1 }
 0x5da   :  { %v3149_v48 = vpop.permute.xlu0 %3148 }
 0x5db   :  { %v3150_v29 = vadd.f32 %v3149_v48, %v3147_v4 }
 0x5dc   :  { %v3174_v17 = vpop.permute.xlu1 %3173 }
 0x5dd   :  { %v3175_v58 = vadd.f32 %v3174_v17, %v3172_v2  ;;  %3151 = vrot.lane.b32.xlu0 %v3150_v29, %s4025_s1 }
 0x5de   :  { %v257_v16 = vpop.permute.xlu0 %256 }
 0x5df   :  { %v258_v0 = vadd.f32 %v257_v16, %v255_v20  ;;  %3176 = vrot.lane.b32.xlu1 %v3175_v58, %s4025_s1  ;;  %s5080_s1 = sld [smem:[#allocation12 + $0x6]] }
 0x5e0   :  { %v320_v52 = vpop.permute.xlu1 %319 }
 0x5e1   :  { %v321_v33 = vadd.f32 %v320_v52, %v318_v41  ;;  %259 = vrot.lane.b32.xlu0 %v258_v0, %s4017_s14 }
 0x5e2   :  { %v282_v30 = vpop.permute.xlu0 %281 }
 0x5e3   :  { %v283_v53 = vadd.f32 %v282_v30, %v280_v39  ;;  %322 = vrot.lane.b32.xlu1 %v321_v33, %s4017_s14 }
 0x5e4   :  { %v345_v18 = vpop.permute.xlu1 %344 }
 0x5e5   :  { %v346_v6 = vadd.f32 %v345_v18, %v343_v12  ;;  %284 = vrot.lane.b32.xlu0 %v283_v53, %s4017_s14 }
 0x5e6   :  { %v1132_v56 = vpop.permute.xlu0 %1131 }
 0x5e7   :  { %v1133_v46 = vadd.f32 %v1132_v56, %v1130_v61  ;;  %347 = vrot.lane.b32.xlu1 %v346_v6, %s4017_s14 }
 0x5e8   :  { %v1157_v4 = vpop.permute.xlu1 %1156 }
 0x5e9   :  { %v1158_v43 = vadd.f32 %v1157_v4, %v1155_v42  ;;  %1134 = vrot.lane.b32.xlu0 %v1133_v46, %s4017_s14 }
 0x5ea   :  { %v1199_v5 = vpop.permute.xlu0 %1198 }
 0x5eb   :  { %v1200_v28 = vadd.f32 %v1199_v5, %v1197_v50  ;;  %1159 = vrot.lane.b32.xlu1 %v1158_v43, %s4017_s14 }
 0x5ec   :  { %v1224_v2 = vpop.permute.xlu1 %1223 }
 0x5ed   :  { %v1225_v32 = vadd.f32 %v1224_v2, %v1222_v59  ;;  %1201 = vrot.lane.b32.xlu0 %v1200_v28, %s4017_s14 }
 0x5ef   :  { %1226 = vrot.lane.b32.xlu1 %v1225_v32, %s4017_s14 }
 0x5fe   :  { %v2410_v20 = vpop.permute.xlu0 %2409 }
 0x5ff   :  { %v2411_v41 = vadd.f32 %v2410_v20, %v2408_v49 }
 0x600   :  { %v2435_v3 = vpop.permute.xlu1 %2434 }
 0x601   :  { %v2436_v39 = vadd.f32 %v2435_v3, %v2433_v31  ;;  %2412 = vrot.lane.b32.xlu0 %v2411_v41, %s4017_s14 }
 0x603   :  { %2437 = vrot.lane.b32.xlu1 %v2436_v39, %s4017_s14 }
 0x64f   :  { %v3152_v40 = vpop.permute.xlu0 %3151 }
 0x650   :  { %v3153_v12 = vadd.f32 %v3152_v40, %v3150_v29 }
 0x651   :  { %v3177_v61 = vpop.permute.xlu1 %3176 }
 0x652   :  { %v3178_v9 = vadd.f32 %v3177_v61, %v3175_v58  ;;  %3154 = vrot.lane.b32.xlu0 %v3153_v12, %s4017_s14 }
 0x653   :  { %v260_v42 = vpop.permute.xlu0 %259 }
 0x654   :  { %v261_v51 = vadd.f32 %v260_v42, %v258_v0  ;;  %3179 = vrot.lane.b32.xlu1 %v3178_v9, %s4017_s14  ;;  %s3227_s14 = sld [smem:[#allocation12 + $0x1]] }
 0x655   :  { %v323_v50 = vpop.permute.xlu1 %322 }
 0x656   :  { %v324_v59 = vadd.f32 %v323_v50, %v321_v33  ;;  %262 = vrot.lane.b32.xlu0 %v261_v51, %s4026_s8 }
 0x657   :  { %v285_v55 = vpop.permute.xlu0 %284 }
 0x658   :  { %v286_v49 = vadd.f32 %v285_v55, %v283_v53  ;;  %325 = vrot.lane.b32.xlu1 %v324_v59, %s4026_s8 }
 0x659   :  { %v348_v22 = vpop.permute.xlu1 %347 }
 0x65a   :  { %v349_v31 = vadd.f32 %v348_v22, %v346_v6  ;;  %287 = vrot.lane.b32.xlu0 %v286_v49, %s4026_s8 }
 0x65b   :  { %v1135_v48 = vpop.permute.xlu0 %1134 }
 0x65c   :  { %v1136_v29 = vadd.f32 %v1135_v48, %v1133_v46  ;;  %350 = vrot.lane.b32.xlu1 %v349_v31, %s4026_s8 }
 0x65d   :  { %v1160_v17 = vpop.permute.xlu1 %1159 }
 0x65e   :  { %v1161_v58 = vadd.f32 %v1160_v17, %v1158_v43  ;;  %1137 = vrot.lane.b32.xlu0 %v1136_v29, %s4026_s8 }
 0x65f   :  { %v1202_v16 = vpop.permute.xlu0 %1201 }
 0x660   :  { %v1203_v0 = vadd.f32 %v1202_v16, %v1200_v28  ;;  %1162 = vrot.lane.b32.xlu1 %v1161_v58, %s4026_s8 }
 0x661   :  { %v1227_v52 = vpop.permute.xlu1 %1226 }
 0x662   :  { %v1228_v33 = vadd.f32 %v1227_v52, %v1225_v32  ;;  %1204 = vrot.lane.b32.xlu0 %v1203_v0, %s4026_s8 }
 0x664   :  { %1229 = vrot.lane.b32.xlu1 %v1228_v33, %s4026_s8 }
 0x673   :  { %v2413_v30 = vpop.permute.xlu0 %2412 }
 0x674   :  { %v2414_v53 = vadd.f32 %v2413_v30, %v2411_v41 }
 0x675   :  { %v2438_v18 = vpop.permute.xlu1 %2437 }
 0x676   :  { %v2439_v6 = vadd.f32 %v2438_v18, %v2436_v39  ;;  %2415 = vrot.lane.b32.xlu0 %v2414_v53, %s4026_s8 }
 0x678   :  { %2440 = vrot.lane.b32.xlu1 %v2439_v6, %s4026_s8 }
 0x6c4   :  { %v3155_v56 = vpop.permute.xlu0 %3154 }
 0x6c5   :  { %v5050_v46 = vadd.f32 %v3155_v56, %v3153_v12 }
 0x6c6   :  { %v3180_v4 = vpop.permute.xlu1 %3179 }
 0x6c7   :  { %v5052_v43 = vadd.f32 %v3180_v4, %v3178_v9  ;;  %3157 = vrot.lane.b32.xlu0 %v5050_v46, %s4026_s8 }
 0x6c8   :  { %v263_v5 = vpop.permute.xlu0 %262 }
 0x6c9   :  { %3182 = vrot.lane.b32.xlu1 %v5052_v43, %s4026_s8  ;;  %v264_v3 = vadd.f32 %v263_v5, %v261_v51  ;;  %s5082_s8 = sld [smem:[#allocation12 + $0x7]] }
 0x6ca   :  { %v326_v28 = vpop.permute.xlu1 %325 }
 0x6cb   :  { %v327_v20 = vadd.f32 %v326_v28, %v324_v59  ;;  %v265_v42 = vrot.slane %v264_v3, 4 }
 0x6cc   :  { %v288_v2 = vpop.permute.xlu0 %287 }
 0x6cd   :  { %v328_v40 = vrot.slane %v327_v20, 4  ;;  %v289_v12 = vadd.f32 %v288_v2, %v286_v49  ;;  %v266_v17 = vadd.f32 %v265_v42, %v264_v3 }
 0x6ce   :  { %v351_v32 = vpop.permute.xlu1 %350 }
 0x6cf   :  { %v352_v39 = vadd.f32 %v351_v32, %v349_v31  ;;  %v329_v55 = vadd.f32 %v328_v40, %v327_v20  ;;  %v290_v22 = vrot.slane %v289_v12, 4  ;;  %v267_v31 = vrot.slane %v266_v17, 2 }
 0x6d0   :  { %v1138_v41 = vpop.permute.xlu0 %1137 }
 0x6d1   :  { %v353_v9 = vrot.slane %v352_v39, 4  ;;  %v1139_v48 = vadd.f32 %v1138_v41, %v1136_v29  ;;  %v330_v56 = vrot.slane %v329_v55, 2  ;;  %v291_v4 = vadd.f32 %v290_v22, %v289_v12 }
 0x6d2   :  { %v1163_v61 = vpop.permute.xlu1 %1162  ;;  %v268_v3 = vadd.f32 %v267_v31, %v266_v17 }
 0x6d3   :  { %v354_v16 = vadd.f32 %v353_v9, %v352_v39  ;;  %v1140_v59 = vrot.slane %v1139_v48, 4  ;;  %v1164_v28 = vadd.f32 %v1163_v61, %v1161_v58  ;;  %v331_v11 = vadd.f32 %v330_v56, %v329_v55 }
 0x6d4   :  { %v1205_v50 = vpop.permute.xlu0 %1204  ;;  %v292_v63 = vrot.slane %v291_v4, 2  ;;  %v269_v22 = vrot.slane %v268_v3, 1 }
 0x6d5   :  { %v1206_v52 = vadd.f32 %v1205_v50, %v1203_v0  ;;  %v355_v5 = vrot.slane %v354_v16, 2  ;;  %v1141_v20 = vadd.f32 %v1140_v59, %v1139_v48  ;;  %v1165_v40 = vrot.slane %v1164_v28, 4 }
 0x6d6   :  { %v1230_v30 = vpop.permute.xlu1 %1229  ;;  %v332_v9 = vrot.slane %v331_v11, 1  ;;  %v293_v12 = vadd.f32 %v292_v63, %v291_v4  ;;  %v270_v17 = vadd.f32 %v269_v22, %v268_v3 }
 0x6d7   :  { %v1207_v49 = vrot.slane %v1206_v52, 4  ;;  %v1231_v2 = vadd.f32 %v1230_v30, %v1228_v33  ;;  %v356_v0 = vadd.f32 %v355_v5, %v354_v16  ;;  %v1142_v50 = vrot.slane %v1141_v20, 2 }
 0x6d8   :  { %v1166_v58 = vadd.f32 %v1165_v40, %v1164_v28  ;;  %v333_v55 = vadd.f32 %v332_v9, %v331_v11  ;;  %v294_v56 = vrot.slane %v293_v12, 1 }
 0x6d9   :  { %v1208_v39 = vadd.f32 %v1207_v49, %v1206_v52  ;;  %v1232_v42 = vrot.slane %v1231_v2, 4  ;;  %v1143_v48 = vadd.f32 %v1142_v50, %v1141_v20 }
 0x6da   :  { %v1167_v59 = vrot.slane %v1166_v58, 2  ;;  %v5058_v5 = vmul.f32 0.001953125, %v333_v55  ;;  %v295_v63 = vadd.f32 %v294_v56, %v293_v12 }
 0x6db   :  { %v1209_v33 = vrot.slane %v1208_v39, 2  ;;  %v1233_v30 = vadd.f32 %v1232_v42, %v1231_v2  ;;  %v1144_v4 = vrot.slane %v1143_v48, 1 }
 0x6dc   :  { %v1168_v28 = vadd.f32 %v1167_v59, %v1166_v58  ;;  %v297_v20 = vmul.f32 0.001953125, %v295_v63 }
 0x6dd   :  { %v1210_v52 = vadd.f32 %v1209_v33, %v1208_v39  ;;  %v1234_v31 = vrot.slane %v1233_v30, 2 }
 0x6de   :  { %v1169_v3 = vrot.slane %v1168_v28, 1 }
 0x6df   :  { %v1211_v11 = vrot.slane %v1210_v52, 1  ;;  %v1235_v40 = vadd.f32 %v1234_v31, %v1233_v30 }
 0x6e1   :  { %v1212_v12 = vadd.f32 %v1211_v11, %v1210_v52 }
 0x6e3   :  { %v5068_v33 = vmul.f32 0.001953125, %v1212_v12  ;;  %v369_v12 = vstv %s3228_s4 }
 0x6e8   :  { %v2416_v18 = vpop.permute.xlu0 %2415 }
 0x6e9   :  { %v2417_v51 = vadd.f32 %v2416_v18, %v2414_v53  ;;  %v357_v18 = vrot.slane %v356_v0, 1 }
 0x6ea   :  { %v2441_v32 = vpop.permute.xlu1 %2440 }
 0x6eb   :  { %v2418_v29 = vrot.slane %v2417_v51, 4  ;;  %v2442_v41 = vadd.f32 %v2441_v32, %v2439_v6  ;;  %v358_v16 = vadd.f32 %v357_v18, %v356_v0  ;;  %v5060_v32 = vmul.f32 0.001953125, %v270_v17 }
 0x6ed   :  { %v2419_v53 = vadd.f32 %v2418_v29, %v2417_v51  ;;  %v2443_v61 = vrot.slane %v2442_v41, 4  ;;  %v360_v2 = vmul.f32 0.001953125, %v358_v16  ;;  %v361_v29 = vmul.f32 %v5058_v5, %v5058_v5 }
 0x6ee   :  { %v298_v42 = vmul.f32 %v5060_v32, %v5060_v32  ;;  %v1240_v16 = vmul.f32 %v5068_v33, %v5068_v33 }
 0x6ef   :  { %v2420_v36 = vrot.slane %v2419_v53, 2  ;;  %v2444_v6 = vadd.f32 %v2443_v61, %v2442_v41  ;;  %v1145_v41 = vadd.f32 %v1144_v4, %v1143_v48  ;;  %v362_v9 = vsub.f32 %v360_v2, %v361_v29 }
 0x6f0   :  { %v299_v50 = vsub.f32 %v297_v20, %v298_v42 }
 0x6f1   :  { %v2421_v51 = vadd.f32 %v2420_v36, %v2419_v53  ;;  %v2445_v49 = vrot.slane %v2444_v6, 2  ;;  %v1236_v36 = vrot.slane %v1235_v40, 1  ;;  %v5066_v58 = vmul.f32 0.001953125, %v1145_v41 }
 0x6f2   :  { %v1170_v53 = vadd.f32 %v1169_v3, %v1168_v28  ;;  %v363_v18 = vadd.f32 1e-05, %v362_v9  ;;  %v300_v55 = vadd.f32 1e-05, %v299_v50 }
 0x6f3   :  { %v2422_v0 = vrot.slane %v2421_v51, 1  ;;  %v2446_v39 = vadd.f32 %v2445_v49, %v2444_v6  ;;  %v1237_v30 = vadd.f32 %v1236_v36, %v1235_v40  ;;  %v1173_v48 = vmul.f32 %v5066_v58, %v5066_v58 }
 0x6f4   :  { %v1172_v56 = vmul.f32 0.001953125, %v1170_v53  ;;  %3894 = vrsqrt.f32 %v363_v18 }
 0x6f5   :  { %v2423_v61 = vadd.f32 %v2422_v0, %v2421_v51  ;;  %v2447_v22 = vrot.slane %v2446_v39, 1  ;;  %v1239_v17 = vmul.f32 0.001953125, %v1237_v30  ;;  %3896 = vrsqrt.f32 %v300_v55 }
 0x6f6   :  { %v1174_v63 = vsub.f32 %v1172_v56, %v1173_v48  ;;  %v365_v55 = vsub.f32 %v4709_v45, %v5058_v5  ;;  %v366_v56 = vsub.f32 %v4713_v27, %v5058_v5  ;;  %v380_v48 = vstv %s3229_s28 }
 0x6f7   :  { %v5072_v59 = vmul.f32 0.001953125, %v2423_v61  ;;  %v2448_v6 = vadd.f32 %v2447_v22, %v2446_v39  ;;  %v1241_v11 = vsub.f32 %v1239_v17, %v1240_v16  ;;  %v306_v61 = vstv %s3227_s14 }
 0x6f8   :  { %v1175_v29 = vadd.f32 1e-05, %v1174_v63  ;;  %v367_v45 = vsub.f32 %v4736_v60, %v5058_v5  ;;  %v368_v27 = vsub.f32 %v4769_v1, %v5058_v5  ;;  %v304_v63 = vsub.f32 %v4767_v8, %v5060_v32 }
 0x6f9   :  { %v2450_v28 = vmul.f32 0.001953125, %v2448_v6  ;;  %v2451_v51 = vmul.f32 %v5072_v59, %v5072_v59  ;;  %v1242_v0 = vadd.f32 1e-05, %v1241_v11  ;;  %v381_v1 = vmul.f32 %v380_v48, %v4151_v13 }
 0x6fa   :  { %3898 = vrsqrt.f32 %v1175_v29  ;;  %v382_v5 = vmul.f32 %v380_v48, %v4156_v14  ;;  %v1181_v11 = vstv %s5080_s1 }
 0x6fb   :  { %v2452_v41 = vsub.f32 %v2450_v28, %v2451_v51  ;;  %3900 = vrsqrt.f32 %v1242_v0 }
 0x6fd   :  { %v2453_v36 = vadd.f32 1e-05, %v2452_v41  ;;  %v383_v41 = vmul.f32 %v380_v48, %v4167_v37  ;;  %v1179_v37 = vsub.f32 %v4478_v57, %v5066_v58  ;;  %v1246_v57 = vsub.f32 %v4482_v47, %v5068_v33 }
 0x6fe   :  { %v3895_v9 = vpop.eup %3894  ;;  %v2458_v47 = vsub.f32 %v4968_v54, %v5072_v59  ;;  %v5178_v54 = vld [vmem:[#allocation17_spill] sm:$0xff] }
 0x6ff   :  { %v3897_v53 = vpop.eup %3896  ;;  %v370_v22 = vmul.f32 %v3895_v9, %v369_v12  ;;  %3902 = vrsqrt.f32 %v2453_v36  ;;  %v2459_v12 = vstv %s5088_s25  ;;  %v1177_v36 = vsub.f32 %v4474_v35, %v5066_v58 }
 0x700   :  { %v307_v6 = vmul.f32 %v3897_v53, %v306_v61  ;;  %v1244_v61 = vsub.f32 %v4484_v21, %v5068_v33 }
 0x701   :  { %v371_v28 = vmul.f32 %v370_v22, %v365_v55  ;;  %v373_v51 = vmul.f32 %v370_v22, %v367_v45  ;;  %v2457_v45 = vsub.f32 %v4964_v26, %v5072_v59 }
 0x704   :  { %v3899_v8 = vpop.eup %3898 }
 0x705   :  { %v3901_v0 = vpop.eup %3900  ;;  %v1182_v14 = vmul.f32 %v3899_v8, %v1181_v11  ;;  %v5179_v8 = vld [vmem:[#allocation18_spill] sm:$0xff] }
 0x709   :  { %v3903_v53 = vpop.eup %3902 }
 0x739   :  { %v3158_v52 = vpop.permute.xlu0 %3157 }
 0x73a   :  { %v3159_v31 = vadd.f32 %v3158_v52, %v5050_v46  ;;  %v302_v52 = vsub.f32 %v4738_v62, %v5060_v32  ;;  %v372_v62 = vmul.f32 %v370_v22, %v366_v56  ;;  %v1183_v56 = vmul.f32 %v1182_v14, %v1177_v36 }
 0x73b   :  { %v3183_v4 = vpop.permute.xlu1 %3182 }
 0x73c   :  { %v3160_v49 = vrot.slane %v3159_v31, 4  ;;  %v3184_v2 = vadd.f32 %v3183_v4, %v5052_v43  ;;  %v305_v4 = vsub.f32 %v4775_v25, %v5060_v32 }
 0x73e   :  { %v3161_v40 = vadd.f32 %v3160_v49, %v3159_v31  ;;  %v3185_v20 = vrot.slane %v3184_v2, 4  ;;  %v303_v31 = vsub.f32 %v4749_v34, %v5060_v32  ;;  %v374_v49 = vmul.f32 %v370_v22, %v368_v27 }
 0x73f   :  { %v311_v25 = vmul.f32 %v307_v6, %v305_v4 }
 0x740   :  { %v3162_v3 = vrot.slane %v3161_v40, 2  ;;  %v3186_v46 = vadd.f32 %v3185_v20, %v3184_v2  ;;  %v308_v2 = vmul.f32 %v307_v6, %v302_v52  ;;  %v310_v20 = vmul.f32 %v307_v6, %v304_v63 }
 0x741   :  { %v378_v13 = vadd.f32 %v374_v49, %v311_v25  ;;  %v2455_v52 = vsub.f32 %v4966_v15, %v5072_v59 }
 0x742   :  { %v3163_v39 = vadd.f32 %v3162_v3, %v3161_v40  ;;  %v3187_v42 = vrot.slane %v3186_v46, 2  ;;  %v309_v40 = vmul.f32 %v307_v6, %v303_v31  ;;  %v375_v29 = vadd.f32 %v371_v28, %v308_v2 }
 0x743   :  { %v384_v3 = vmul.f32 %v380_v48, %v4172_v38  ;;  %v1180_v38 = vsub.f32 %v4480_v7, %v5066_v58  ;;  %v1247_v7 = vsub.f32 %v4486_v10, %v5068_v33  ;;  %v2456_v31 = vsub.f32 %v4970_v24, %v5072_v59 }
 0x744   :  { %v3164_v50 = vrot.slane %v3163_v39, 1  ;;  %v3188_v43 = vadd.f32 %v3187_v42, %v3186_v46  ;;  %v1248_v46 = vstv %s5082_s8  ;;  %v377_v42 = vadd.f32 %v373_v51, %v310_v20 }
 0x745   :  { %v1249_v22 = vmul.f32 %v3901_v0, %v1248_v46  ;;  %v388_v35 = vadd.f32 %v384_v3, %v378_v13  ;;  %v1186_v6 = vmul.f32 %v1182_v14, %v1180_v38 }
 0x746   :  { %v3165_v18 = vadd.f32 %v3164_v50, %v3163_v39  ;;  %v3189_v30 = vrot.slane %v3188_v43, 1  ;;  %v376_v39 = vadd.f32 %v372_v62, %v309_v40  ;;  %v1178_v50 = vsub.f32 %v4476_v44, %v5066_v58 }
 0x747   :  { %v387_v55 = vadd.f32 %v383_v41, %v377_v42  ;;  %v1185_v44 = vmul.f32 %v1182_v14, %v1179_v37  ;;  %v2460_v58 = vmul.f32 %v3903_v53, %v2459_v12  ;;  %v1250_v21 = vmul.f32 %v1249_v22, %v1244_v61 }
 0x748   :  { %v5090_v17 = vmul.f32 0.001953125, %v3165_v18  ;;  %v3190_v16 = vadd.f32 %v3189_v30, %v3188_v43  ;;  %v3201_v43 = vstv %s5100_s26  ;;  %v385_v18 = vadd.f32 %v381_v1, %v375_v29 }
 0x749   :  { %v386_v30 = vadd.f32 %v382_v5, %v376_v39  ;;  %v1184_v48 = vmul.f32 %v1182_v14, %v1178_v50  ;;  %v1252_v63 = vmul.f32 %v1249_v22, %v1246_v57  ;;  %v1189_v10 = vadd.f32 %v1185_v44, %v387_v55  ;;  %v5177_v5 = vld [vmem:[#allocation19_spill] sm:$0xff] }
 0x74a   :  { %v3192_v34 = vmul.f32 0.001953125, %v3190_v16  ;;  %v3193_v60 = vmul.f32 %v5090_v17, %v5090_v17  ;;  %v1245_v16 = vsub.f32 %v4488_v23, %v5068_v33  ;;  %v1253_v23 = vmul.f32 %v1249_v22, %v1247_v7 }
 0x74b   :  { %v1187_v4 = vadd.f32 %v1183_v56, %v385_v18  ;;  %v1188_v28 = vadd.f32 %v1184_v48, %v386_v30  ;;  %v1190_v33 = vadd.f32 %v1186_v6, %v388_v35  ;;  %v2461_v62 = vmul.f32 %v2460_v58, %v2455_v52 }
 0x74c   :  { %v3194_v32 = vsub.f32 %v3192_v34, %v3193_v60  ;;  %v1251_v27 = vmul.f32 %v1249_v22, %v1245_v16  ;;  %v2462_v51 = vmul.f32 %v2460_v58, %v2456_v31  ;;  %v2463_v49 = vmul.f32 %v2460_v58, %v2457_v45 }
 0x74d   :  { %v2464_v15 = vmul.f32 %v2460_v58, %v2458_v47  ;;  %v1254_v34 = vadd.f32 %v1250_v21, %v1187_v4  ;;  %v1256_v2 = vadd.f32 %v1252_v63, %v1189_v10  ;;  %v1257_v1 = vadd.f32 %v1253_v23, %v1190_v33 }
 0x74e   :  { %v3195_v9 = vadd.f32 1e-05, %v3194_v32  ;;  %v1255_v24 = vadd.f32 %v1251_v27, %v1188_v28  ;;  %v3197_v26 = vsub.f32 %v4988_v19, %v5090_v17  ;;  %v3198_v11 = vsub.f32 %v5177_v5, %v5090_v17 }
 0x74f   :  { %v3199_v59 = vsub.f32 %v5178_v54, %v5090_v17  ;;  %v3200_v40 = vsub.f32 %v5179_v8, %v5090_v17  ;;  %v2465_v25 = vadd.f32 %v2461_v62, %v1254_v34  ;;  %v2467_v29 = vadd.f32 %v2463_v49, %v1256_v2 }
 0x750   :  { %3904 = vrsqrt.f32 %v3195_v9  ;;  %v2466_v32 = vadd.f32 %v2462_v51, %v1255_v24  ;;  %v2468_v41 = vadd.f32 %v2464_v15, %v1257_v1 }
 0x75a   :  { %v3905_v60 = vpop.eup %3904 }
 0x75b   :  { %v3202_v20 = vmul.f32 %v3905_v60, %v3201_v43 }
 0x75d   :  { %v3203_v3 = vmul.f32 %v3202_v20, %v3197_v26  ;;  %v3204_v46 = vmul.f32 %v3202_v20, %v3198_v11  ;;  %v3205_v0 = vmul.f32 %v3202_v20, %v3199_v59  ;;  %v3206_v39 = vmul.f32 %v3202_v20, %v3200_v40 }
 0x75f   :  { %v3207_v42 = vadd.f32 %v3203_v3, %v2465_v25  ;;  %v3208_v19 = vadd.f32 %v3204_v46, %v2466_v32  ;;  %v3209_v13 = vadd.f32 %v3205_v0, %v2467_v29  ;;  %v3210_v9 = vadd.f32 %v3206_v39, %v2468_v41 }
 0x761   :  { %3211 = vst [vmem:[%s5170_s10] sm:$0xff] %v3207_v42  ;;  %3212 = vst [vmem:[%s5170_s10 + $0x8] sm:$0xff] %v3208_v19 }
 0x762   :  { %3213 = vst [vmem:[%s5170_s10 + $0x10] sm:$0xff] %v3209_v13  ;;  %3214 = vst [vmem:[%s5170_s10 + $0x18] sm:$0xff] %v3210_v9 }
 0x763   :  { %3219 = vsyncpa [#allocation5], 1 }
 0x764   :  { %3220 = vsyncpa [#allocation8], 1 }
 0x765   :  { %3221 = vsyncpa [#allocation11], 1 }
 0x766   :  { %3222 = vsyncpa [#allocation6], 1 }

</bundles_post_ra>
